<compile_context>
chip_gen: v5e
topology: v5e:2x2
jax: 0.10.0
libtpu: 0.0.40
codegen_flags: <defaults>
</compile_context>

<pallas_src>
import jax
import jax.numpy as jnp
from jax.experimental import pallas as pl
from jax.experimental.pallas import tpu as pltpu

# ------------------------- model hyperparameters (small) -------------------------
BATCH = 2
IN_CHANS = 3
IMG_SIZE = 16
PATCH = 4                         # dinov2_vitb14 uses 14; scaled down
EMBED_DIM = 64                    # dinov2_vitb14 uses 768; scaled down
HEADS = 4
HEAD_DIM = EMBED_DIM // HEADS
MLP_DIM = 4 * EMBED_DIM
DEPTH = 2                         # dinov2_vitb14 uses 12; scaled down
NUM_PATCHES = (IMG_SIZE // PATCH) ** 2          # 16
NUM_TOKENS = NUM_PATCHES + 1                    # 17 (+ CLS token)
N_PAD = ((NUM_TOKENS + 7) // 8) * 8             # 24 (sublane multiple of 8)
ROWS = BATCH * N_PAD                            # 48 resident activation rows
PATCH_DIM = IN_CHANS * PATCH * PATCH            # 48
LS_INIT = 1e-5                    # LayerScale init (DINOv2 default)
LN_EPS = 1e-6
L2_EPS = 1e-12
ATTN_SCALE = HEAD_DIM ** -0.5
NEG_INF = -1e30


# ------------------------------- fused Pallas kernel ------------------------------
def _fused_backbone_kernel(
    # constant inputs (all loaded once; grid is a single step)
    patches_ref, add_tok_ref, patch_w_ref, attn_mask_ref,
    # stacked per-block weights (DEPTH, ...)
    ln1_g_ref, ln1_b_ref, w_qkv_ref, b_qkv_ref, w_proj_ref, b_proj_ref, ls1_ref,
    ln2_g_ref, ln2_b_ref, w_fc1_ref, b_fc1_ref, w_fc2_ref, b_fc2_ref, ls2_ref,
    # final-norm params
    ln_f_g_ref, ln_f_b_ref,
    # packed output: (B, 2*D) = [global_feat | projected_feat]
    out_ref,
    # VMEM scratch for per-head attention outputs (lane-sliced writes, no concatenate)
    attn_sc,
):
    def layer_norm(x, g, b):
        # two independent cross-lane reductions (E[x] and E[x^2]) -> XLU can overlap them
        mean = jnp.mean(x, axis=-1, keepdims=True)
        mean_sq = jnp.mean(x * x, axis=-1, keepdims=True)
        var = mean_sq - mean * mean
        return (x - mean) * (jax.lax.rsqrt(var + LN_EPS) * g) + b

    # ---------------- token assembly: one matmul + one add -----------------------
    # CLS / positional / bias contributions are pre-folded into add_tok by the wrapper;
    # CLS and pad rows of patches are zero, so this single matmul covers all 48 rows.
    x = jnp.dot(patches_ref[...], patch_w_ref[...],
                preferred_element_type=jnp.float32) + add_tok_ref[...]

    # additive mask (0 / -1e30): block-diagonal over batch + padded-key masking,
    # precomputed once in the wrapper, added directly to every head's score tile.
    attn_mask = attn_mask_ref[...]                         # (ROWS, ROWS)

    # ---------------- transformer blocks (static unroll over DEPTH) --------------
    for d in range(DEPTH):
        # --- attention branch ---
        h = layer_norm(x, ln1_g_ref[d], ln1_b_ref[d])
        qkv = jnp.dot(h, w_qkv_ref[d],
                      preferred_element_type=jnp.float32) + b_qkv_ref[d]

        for hd in range(HEADS):                            # static, unrolled (4 heads)
            c0 = hd * HEAD_DIM
            q = qkv[:, c0:c0 + HEAD_DIM] * ATTN_SCALE
            k = qkv[:, EMBED_DIM + c0:EMBED_DIM + c0 + HEAD_DIM]
            v = qkv[:, 2 * EMBED_DIM + c0:2 * EMBED_DIM + c0 + HEAD_DIM]
            # full-slab scores: (ROWS, ROWS) = (48, 48); batch separation via attn_mask
            s = jax.lax.dot_general(q, k, (((1,), (1,)), ((), ())),
                                    preferred_element_type=jnp.float32)
            s = s + attn_mask
            s = s - jnp.max(s, axis=-1, keepdims=True)
            p = jnp.exp(s)
            p = p * pl.reciprocal(jnp.sum(p, axis=-1, keepdims=True), approx=True)
            # write this head's output into its lane slice of the scratch slab
            attn_sc[:, c0:c0 + HEAD_DIM] = jnp.dot(
                p, v, preferred_element_type=jnp.float32)

        proj = jnp.dot(attn_sc[...], w_proj_ref[d],
                       preferred_element_type=jnp.float32) + b_proj_ref[d]
        x = x + proj * ls1_ref[d]                          # residual + LayerScale

        # --- MLP branch ---
        h2 = layer_norm(x, ln2_g_ref[d], ln2_b_ref[d])
        m = jnp.dot(h2, w_fc1_ref[d],
                    preferred_element_type=jnp.float32) + b_fc1_ref[d]
        # TODO(synk): torch nn.GELU default is exact erf; tanh approximation used for
        # Mosaic-friendly lowering (EUP tanh/exp).
        m = jax.nn.gelu(m, approximate=True)
        m = jnp.dot(m, w_fc2_ref[d],
                    preferred_element_type=jnp.float32) + b_fc2_ref[d]
        x = x + m * ls2_ref[d]                             # residual + LayerScale

    # ---------------- final LN on CLS rows + L2 normalize, packed output ---------
    cls = jnp.concatenate(
        [x[b * N_PAD:b * N_PAD + 1, :] for b in range(BATCH)], axis=0)   # (B, D)
    f = layer_norm(cls, ln_f_g_ref[...], ln_f_b_ref[...])
    # F.normalize(x, dim=1): x / max(||x||_2, eps) — exact divide for the output
    nrm = jnp.maximum(jnp.sqrt(jnp.sum(f * f, axis=-1, keepdims=True)), L2_EPS)
    out_ref[...] = jnp.concatenate([f, f / nrm], axis=-1).astype(out_ref.dtype)


# --------------------------------- wrapper -----------------------------------------
def _full_spec(shape):
    zeros = (0,) * len(shape)
    return pl.BlockSpec(shape, lambda i, _z=zeros: _z)


@jax.jit
def network_moco_forward(x_img, params):
    B, C, H, W = x_img.shape
    nh, nw = H // PATCH, W // PATCH
    D = EMBED_DIM

    # ---- one-time layout glue in the wrapper (outside the hot kernel path) ----
    # Patch extraction: conv(k=PATCH, s=PATCH) == unfold + matmul; (C, p, p) flatten
    # order matches PyTorch Conv2d weight layout (D, C, p, p).
    patches = (
        x_img.reshape(B, C, nh, PATCH, nw, PATCH)
        .transpose(0, 2, 4, 1, 3, 5)
        .reshape(B, nh * nw, C * PATCH * PATCH)
    )
    # (ROWS, PATCH_DIM) with zero rows at CLS / pad positions
    patches_full = (
        jnp.zeros((B, N_PAD, PATCH_DIM), jnp.float32)
        .at[:, 1:NUM_TOKENS, :].set(patches)
        .reshape(ROWS, PATCH_DIM)
    )
    # additive token tensor: CLS row -> cls+pos[0]; patch rows -> pos[1:]+patch_b; pads -> 0
    add_one = jnp.zeros((N_PAD, D), jnp.float32)
    add_one = add_one.at[0:1, :].set(params["cls_token"] + params["pos_embed"][0:1])
    add_one = add_one.at[1:NUM_TOKENS, :].set(
        params["pos_embed"][1:NUM_TOKENS] + params["patch_b"])
    add_tok = jnp.tile(add_one[None], (B, 1, 1)).reshape(ROWS, D)

    # additive attention mask: same-batch block diagonal AND key-token < NUM_TOKENS
    row_batch = jnp.arange(ROWS, dtype=jnp.int32) // N_PAD
    key_tok = jnp.arange(ROWS, dtype=jnp.int32) % N_PAD
    valid = (row_batch[:, None] == row_batch[None, :]) & (key_tok[None, :] < NUM_TOKENS)
    attn_mask = jnp.where(valid, 0.0, NEG_INF).astype(jnp.float32)

    in_specs = [
        _full_spec((ROWS, PATCH_DIM)),                     # patches_full
        _full_spec((ROWS, D)),                             # add_tok
        _full_spec((PATCH_DIM, D)),                        # patch_w
        _full_spec((ROWS, ROWS)),                          # attn_mask
        _full_spec((DEPTH, 1, D)), _full_spec((DEPTH, 1, D)),          # ln1_g, ln1_b
        _full_spec((DEPTH, D, 3 * D)), _full_spec((DEPTH, 1, 3 * D)),  # w_qkv, b_qkv
        _full_spec((DEPTH, D, D)), _full_spec((DEPTH, 1, D)),          # w_proj, b_proj
        _full_spec((DEPTH, 1, D)),                                     # ls1
        _full_spec((DEPTH, 1, D)), _full_spec((DEPTH, 1, D)),          # ln2_g, ln2_b
        _full_spec((DEPTH, D, MLP_DIM)), _full_spec((DEPTH, 1, MLP_DIM)),  # w_fc1, b_fc1
        _full_spec((DEPTH, MLP_DIM, D)), _full_spec((DEPTH, 1, D)),    # w_fc2, b_fc2
        _full_spec((DEPTH, 1, D)),                                     # ls2
        _full_spec((1, D)), _full_spec((1, D)),                        # ln_f_g, ln_f_b
    ]
    out_spec = pl.BlockSpec((B, 2 * D), lambda i: (0, 0))
    out_shape = jax.ShapeDtypeStruct((B, 2 * D), jnp.float32)

    packed = pl.pallas_call(
        _fused_backbone_kernel,
        out_shape=out_shape,
        grid_spec=pltpu.PrefetchScalarGridSpec(
            num_scalar_prefetch=0,
            grid=(1,),                                     # single fused step
            in_specs=in_specs,
            out_specs=out_spec,
            scratch_shapes=[pltpu.VMEM((ROWS, D), jnp.float32)],  # per-head attn slab
        ),
        compiler_params=pltpu.CompilerParams(
            dimension_semantics=("arbitrary",)),
    )(
        patches_full, add_tok, params["patch_w"], attn_mask,
        params["ln1_g"], params["ln1_b"], params["w_qkv"], params["b_qkv"],
        params["w_proj"], params["b_proj"], params["ls1"],
        params["ln2_g"], params["ln2_b"], params["w_fc1"], params["b_fc1"],
        params["w_fc2"], params["b_fc2"], params["ls2"],
        params["ln_f_g"], params["ln_f_b"],
    )
    feat = packed[:, :D]
    projected = packed[:, D:]
    return {"global_feat": feat, "global_projected_feat": projected}


# -------------------------------- parameter init ----------------------------------
def init_params(key):
    keys = iter(jax.random.split(key, 4 + 4 * DEPTH))

    def nrm(shape, std=0.02):
        return std * jax.random.normal(next(keys), shape, dtype=jnp.float32)

    def stack(fn):
        return jnp.stack([fn() for _ in range(DEPTH)], axis=0)

    return {
        "patch_w": nrm((PATCH_DIM, EMBED_DIM)),
        "patch_b": jnp.zeros((1, EMBED_DIM), jnp.float32),
        "cls_token": nrm((1, EMBED_DIM)),
        "pos_embed": nrm((NUM_TOKENS, EMBED_DIM)),
        "ln_f_g": jnp.ones((1, EMBED_DIM), jnp.float32),
        "ln_f_b": jnp.zeros((1, EMBED_DIM), jnp.float32),
        # stacked per-block weights (DEPTH, ...)
        "ln1_g": jnp.ones((DEPTH, 1, EMBED_DIM), jnp.float32),
        "ln1_b": jnp.zeros((DEPTH, 1, EMBED_DIM), jnp.float32),
        "w_qkv": stack(lambda: nrm((EMBED_DIM, 3 * EMBED_DIM))),
        "b_qkv": jnp.zeros((DEPTH, 1, 3 * EMBED_DIM), jnp.float32),
        "w_proj": stack(lambda: nrm((EMBED_DIM, EMBED_DIM))),
        "b_proj": jnp.zeros((DEPTH, 1, EMBED_DIM), jnp.float32),
        "ls1": jnp.full((DEPTH, 1, EMBED_DIM), LS_INIT, jnp.float32),
        "ln2_g": jnp.ones((DEPTH, 1, EMBED_DIM), jnp.float32),
        "ln2_b": jnp.zeros((DEPTH, 1, EMBED_DIM), jnp.float32),
        "w_fc1": stack(lambda: nrm((EMBED_DIM, MLP_DIM))),
        "b_fc1": jnp.zeros((DEPTH, 1, MLP_DIM), jnp.float32),
        "w_fc2": stack(lambda: nrm((MLP_DIM, EMBED_DIM))),
        "b_fc2": jnp.zeros((DEPTH, 1, EMBED_DIM), jnp.float32),
        "ls2": jnp.full((DEPTH, 1, EMBED_DIM), LS_INIT, jnp.float32),
    }


# --------------------------------------- main --------------------------------------
if __name__ == "__main__":
    key = jax.random.PRNGKey(0)
    pkey, xkey = jax.random.split(key)
    params = init_params(pkey)
    x = jax.random.normal(xkey, (BATCH, IN_CHANS, IMG_SIZE, IMG_SIZE), dtype=jnp.float32)

    out = network_moco_forward(x, params)
    out = jax.block_until_ready(out)

    assert out["global_feat"].shape == (BATCH, EMBED_DIM)
    assert out["global_projected_feat"].shape == (BATCH, EMBED_DIM)
    assert bool(jnp.all(jnp.isfinite(out["global_feat"])))
    # projected features must be unit-norm along dim=1
    norms = jnp.sqrt(jnp.sum(out["global_projected_feat"] ** 2, axis=1))
    assert bool(jnp.all(jnp.abs(norms - 1.0) < 1e-4))
    print("KERNEL_OK")
</pallas_src>

<mosaic_0001>
module attributes {stable_mosaic.version = 11 : i64} {
  func.func @_fused_backbone_kernel(%arg0: i32, %arg1: memref<48x48xf32, #tpu.memory_space<vmem>>, %arg2: memref<48x64xf32, #tpu.memory_space<vmem>>, %arg3: memref<48x64xf32, #tpu.memory_space<vmem>>, %arg4: memref<48x48xf32, #tpu.memory_space<vmem>>, %arg5: memref<2x1x64xf32, #tpu.memory_space<vmem>>, %arg6: memref<2x1x64xf32, #tpu.memory_space<vmem>>, %arg7: memref<2x64x192xf32, #tpu.memory_space<vmem>>, %arg8: memref<2x1x192xf32, #tpu.memory_space<vmem>>, %arg9: memref<2x64x64xf32, #tpu.memory_space<vmem>>, %arg10: memref<2x1x64xf32, #tpu.memory_space<vmem>>, %arg11: memref<2x1x64xf32, #tpu.memory_space<vmem>>, %arg12: memref<2x1x64xf32, #tpu.memory_space<vmem>>, %arg13: memref<2x1x64xf32, #tpu.memory_space<vmem>>, %arg14: memref<2x64x256xf32, #tpu.memory_space<vmem>>, %arg15: memref<2x1x256xf32, #tpu.memory_space<vmem>>, %arg16: memref<2x256x64xf32, #tpu.memory_space<vmem>>, %arg17: memref<2x1x64xf32, #tpu.memory_space<vmem>>, %arg18: memref<2x1x64xf32, #tpu.memory_space<vmem>>, %arg19: memref<1x64xf32, #tpu.memory_space<vmem>>, %arg20: memref<1x64xf32, #tpu.memory_space<vmem>>, %arg21: memref<2x128xf32, #tpu.memory_space<vmem>>, %arg22: memref<48x64xf32, #tpu.memory_space<vmem>>) attributes {dimension_semantics = [#tpu.dimension_semantics<arbitrary>], iteration_bounds = array<i64: 1>, scalar_prefetch = 0 : i64, scratch_operands = 1 : i64, tpu.core_type = #tpu.core_type<tc>, window_params = [{pipeline_mode = #tpu.pipeline_mode<synchronous>, transform_indices = @transform_0, window_bounds = array<i64: 48, 48>}, {pipeline_mode = #tpu.pipeline_mode<synchronous>, transform_indices = @transform_1, window_bounds = array<i64: 48, 64>}, {pipeline_mode = #tpu.pipeline_mode<synchronous>, transform_indices = @transform_2, window_bounds = array<i64: 48, 64>}, {pipeline_mode = #tpu.pipeline_mode<synchronous>, transform_indices = @transform_3, window_bounds = array<i64: 48, 48>}, {pipeline_mode = #tpu.pipeline_mode<synchronous>, transform_indices = @transform_4, window_bounds = array<i64: 2, 1, 64>}, {pipeline_mode = #tpu.pipeline_mode<synchronous>, transform_indices = @transform_5, window_bounds = array<i64: 2, 1, 64>}, {pipeline_mode = #tpu.pipeline_mode<synchronous>, transform_indices = @transform_6, window_bounds = array<i64: 2, 64, 192>}, {pipeline_mode = #tpu.pipeline_mode<synchronous>, transform_indices = @transform_7, window_bounds = array<i64: 2, 1, 192>}, {pipeline_mode = #tpu.pipeline_mode<synchronous>, transform_indices = @transform_8, window_bounds = array<i64: 2, 64, 64>}, {pipeline_mode = #tpu.pipeline_mode<synchronous>, transform_indices = @transform_9, window_bounds = array<i64: 2, 1, 64>}, {pipeline_mode = #tpu.pipeline_mode<synchronous>, transform_indices = @transform_10, window_bounds = array<i64: 2, 1, 64>}, {pipeline_mode = #tpu.pipeline_mode<synchronous>, transform_indices = @transform_11, window_bounds = array<i64: 2, 1, 64>}, {pipeline_mode = #tpu.pipeline_mode<synchronous>, transform_indices = @transform_12, window_bounds = array<i64: 2, 1, 64>}, {pipeline_mode = #tpu.pipeline_mode<synchronous>, transform_indices = @transform_13, window_bounds = array<i64: 2, 64, 256>}, {pipeline_mode = #tpu.pipeline_mode<synchronous>, transform_indices = @transform_14, window_bounds = array<i64: 2, 1, 256>}, {pipeline_mode = #tpu.pipeline_mode<synchronous>, transform_indices = @transform_15, window_bounds = array<i64: 2, 256, 64>}, {pipeline_mode = #tpu.pipeline_mode<synchronous>, transform_indices = @transform_16, window_bounds = array<i64: 2, 1, 64>}, {pipeline_mode = #tpu.pipeline_mode<synchronous>, transform_indices = @transform_17, window_bounds = array<i64: 2, 1, 64>}, {pipeline_mode = #tpu.pipeline_mode<synchronous>, transform_indices = @transform_18, window_bounds = array<i64: 1, 64>}, {pipeline_mode = #tpu.pipeline_mode<synchronous>, transform_indices = @transform_19, window_bounds = array<i64: 1, 64>}, {pipeline_mode = #tpu.pipeline_mode<synchronous>, transform_indices = @transform_20, window_bounds = array<i64: 2, 128>}]} {
    %c0 = arith.constant 0 : index
    %c0_0 = arith.constant 0 : index
    %0 = vector.load %arg1[%c0, %c0_0] : memref<48x48xf32, #tpu.memory_space<vmem>>, vector<48x48xf32>
    %c0_1 = arith.constant 0 : index
    %c0_2 = arith.constant 0 : index
    %1 = vector.load %arg3[%c0_1, %c0_2] : memref<48x64xf32, #tpu.memory_space<vmem>>, vector<48x64xf32>
    %cst = arith.constant dense<0.000000e+00> : vector<48x64xf32>
    %2 = tpu.matmul %0, %1, %cst {dimension_numbers = #tpu.dot_dimension_numbers<[1], [0], [0], [1], [0, 0, 1, 1], [], []>} : vector<48x48xf32>, vector<48x64xf32>, vector<48x64xf32> -> vector<48x64xf32>
    %c0_3 = arith.constant 0 : index
    %c0_4 = arith.constant 0 : index
    %3 = vector.load %arg2[%c0_3, %c0_4] : memref<48x64xf32, #tpu.memory_space<vmem>>, vector<48x64xf32>
    %4 = arith.addf %2, %3 : vector<48x64xf32>
    %c0_5 = arith.constant 0 : index
    %c0_6 = arith.constant 0 : index
    %5 = vector.load %arg4[%c0_5, %c0_6] : memref<48x48xf32, #tpu.memory_space<vmem>>, vector<48x48xf32>
    %c0_7 = arith.constant 0 : index
    %c0_8 = arith.constant 0 : index
    %c0_9 = arith.constant 0 : index
    %6 = vector.load %arg5[%c0_7, %c0_8, %c0_9] : memref<2x1x64xf32, #tpu.memory_space<vmem>>, vector<1x1x64xf32>
    %7 = vector.shape_cast %6 : vector<1x1x64xf32> to vector<1x64xf32>
    %c0_10 = arith.constant 0 : index
    %c0_11 = arith.constant 0 : index
    %c0_12 = arith.constant 0 : index
    %8 = vector.load %arg6[%c0_10, %c0_11, %c0_12] : memref<2x1x64xf32, #tpu.memory_space<vmem>>, vector<1x1x64xf32>
    %9 = vector.shape_cast %8 : vector<1x1x64xf32> to vector<1x64xf32>
    %cst_13 = arith.constant dense<0.000000e+00> : vector<48xf32>
    %10 = vector.multi_reduction <add>, %4, %cst_13 [1] : vector<48x64xf32> to vector<48xf32>
    %11 = vector.shape_cast %10 : vector<48xf32> to vector<48x1xf32>
    %cst_14 = arith.constant 6.400000e+01 : f32
    %12 = vector.broadcast %cst_14 : f32 to vector<48x1xf32>
    %13 = arith.divf %11, %12 : vector<48x1xf32>
    %14 = arith.mulf %4, %4 : vector<48x64xf32>
    %cst_15 = arith.constant dense<0.000000e+00> : vector<48xf32>
    %15 = vector.multi_reduction <add>, %14, %cst_15 [1] : vector<48x64xf32> to vector<48xf32>
    %16 = vector.shape_cast %15 : vector<48xf32> to vector<48x1xf32>
    %cst_16 = arith.constant 6.400000e+01 : f32
    %17 = vector.broadcast %cst_16 : f32 to vector<48x1xf32>
    %18 = arith.divf %16, %17 : vector<48x1xf32>
    %19 = arith.mulf %13, %13 : vector<48x1xf32>
    %20 = arith.subf %18, %19 : vector<48x1xf32>
    %21 = vector.broadcast %13 : vector<48x1xf32> to vector<48x64xf32>
    %22 = arith.subf %4, %21 : vector<48x64xf32>
    %cst_17 = arith.constant 9.99999997E-7 : f32
    %23 = vector.broadcast %cst_17 : f32 to vector<48x1xf32>
    %24 = arith.addf %20, %23 : vector<48x1xf32>
    %25 = math.rsqrt %24 : vector<48x1xf32>
    %26 = vector.broadcast %25 : vector<48x1xf32> to vector<48x64xf32>
    %27 = vector.broadcast %7 : vector<1x64xf32> to vector<48x64xf32>
    %28 = arith.mulf %26, %27 : vector<48x64xf32>
    %29 = arith.mulf %22, %28 : vector<48x64xf32>
    %30 = vector.broadcast %9 : vector<1x64xf32> to vector<48x64xf32>
    %31 = arith.addf %29, %30 : vector<48x64xf32>
    %c0_18 = arith.constant 0 : index
    %c0_19 = arith.constant 0 : index
    %c0_20 = arith.constant 0 : index
    %32 = vector.load %arg7[%c0_18, %c0_19, %c0_20] : memref<2x64x192xf32, #tpu.memory_space<vmem>>, vector<1x64x192xf32>
    %33 = vector.shape_cast %32 : vector<1x64x192xf32> to vector<64x192xf32>
    %cst_21 = arith.constant dense<0.000000e+00> : vector<48x192xf32>
    %34 = tpu.matmul %31, %33, %cst_21 {dimension_numbers = #tpu.dot_dimension_numbers<[1], [0], [0], [1], [0, 0, 1, 1], [], []>} : vector<48x64xf32>, vector<64x192xf32>, vector<48x192xf32> -> vector<48x192xf32>
    %c0_22 = arith.constant 0 : index
    %c0_23 = arith.constant 0 : index
    %c0_24 = arith.constant 0 : index
    %35 = vector.load %arg8[%c0_22, %c0_23, %c0_24] : memref<2x1x192xf32, #tpu.memory_space<vmem>>, vector<1x1x192xf32>
    %36 = vector.shape_cast %35 : vector<1x1x192xf32> to vector<1x192xf32>
    %37 = vector.broadcast %36 : vector<1x192xf32> to vector<48x192xf32>
    %38 = arith.addf %34, %37 : vector<48x192xf32>
    %39 = vector.extract_strided_slice %38 {offsets = [0, 0], sizes = [48, 16], strides = [1, 1]} : vector<48x192xf32> to vector<48x16xf32>
    %cst_25 = arith.constant 2.500000e-01 : f32
    %40 = vector.broadcast %cst_25 : f32 to vector<48x16xf32>
    %41 = arith.mulf %39, %40 : vector<48x16xf32>
    %42 = vector.extract_strided_slice %38 {offsets = [0, 64], sizes = [48, 16], strides = [1, 1]} : vector<48x192xf32> to vector<48x16xf32>
    %43 = vector.extract_strided_slice %38 {offsets = [0, 128], sizes = [48, 16], strides = [1, 1]} : vector<48x192xf32> to vector<48x16xf32>
    %cst_26 = arith.constant dense<0.000000e+00> : vector<48x48xf32>
    %44 = tpu.matmul %41, %42, %cst_26 {dimension_numbers = #tpu.dot_dimension_numbers<[1], [1], [0], [0], [0, 0, 1, 0], [], []>} : vector<48x16xf32>, vector<48x16xf32>, vector<48x48xf32> -> vector<48x48xf32>
    %45 = arith.addf %44, %5 : vector<48x48xf32>
    %cst_27 = arith.constant dense<0xFF800000> : vector<48xf32>
    %46 = vector.multi_reduction <maximumf>, %45, %cst_27 [1] : vector<48x48xf32> to vector<48xf32>
    %47 = vector.shape_cast %46 : vector<48xf32> to vector<48x1xf32>
    %48 = vector.broadcast %47 : vector<48x1xf32> to vector<48x48xf32>
    %49 = arith.subf %45, %48 : vector<48x48xf32>
    %50 = math.exp %49 : vector<48x48xf32>
    %cst_28 = arith.constant dense<0.000000e+00> : vector<48xf32>
    %51 = vector.multi_reduction <add>, %50, %cst_28 [1] : vector<48x48xf32> to vector<48xf32>
    %52 = vector.shape_cast %51 : vector<48xf32> to vector<48x1xf32>
    %53 = tpu.reciprocal %52 {approx = true} : vector<48x1xf32> -> vector<48x1xf32>
    %54 = vector.broadcast %53 : vector<48x1xf32> to vector<48x48xf32>
    %55 = arith.mulf %50, %54 : vector<48x48xf32>
    %cst_29 = arith.constant dense<0.000000e+00> : vector<48x16xf32>
    %56 = tpu.matmul %55, %43, %cst_29 {dimension_numbers = #tpu.dot_dimension_numbers<[1], [0], [0], [1], [0, 0, 1, 1], [], []>} : vector<48x48xf32>, vector<48x16xf32>, vector<48x16xf32> -> vector<48x16xf32>
    %c0_30 = arith.constant 0 : index
    %c0_31 = arith.constant 0 : index
    %57 = vector.load %arg22[%c0_30, %c0_31] : memref<48x64xf32, #tpu.memory_space<vmem>>, vector<48x16xf32>
    tpu.vector_store %arg22[%c0_30, %c0_31], %56 {strides = array<i32>} : memref<48x64xf32, #tpu.memory_space<vmem>>, vector<48x16xf32>,
    %58 = vector.extract_strided_slice %38 {offsets = [0, 16], sizes = [48, 16], strides = [1, 1]} : vector<48x192xf32> to vector<48x16xf32>
    %cst_32 = arith.constant 2.500000e-01 : f32
    %59 = vector.broadcast %cst_32 : f32 to vector<48x16xf32>
    %60 = arith.mulf %58, %59 : vector<48x16xf32>
    %61 = vector.extract_strided_slice %38 {offsets = [0, 80], sizes = [48, 16], strides = [1, 1]} : vector<48x192xf32> to vector<48x16xf32>
    %62 = vector.extract_strided_slice %38 {offsets = [0, 144], sizes = [48, 16], strides = [1, 1]} : vector<48x192xf32> to vector<48x16xf32>
    %cst_33 = arith.constant dense<0.000000e+00> : vector<48x48xf32>
    %63 = tpu.matmul %60, %61, %cst_33 {dimension_numbers = #tpu.dot_dimension_numbers<[1], [1], [0], [0], [0, 0, 1, 0], [], []>} : vector<48x16xf32>, vector<48x16xf32>, vector<48x48xf32> -> vector<48x48xf32>
    %64 = arith.addf %63, %5 : vector<48x48xf32>
    %cst_34 = arith.constant dense<0xFF800000> : vector<48xf32>
    %65 = vector.multi_reduction <maximumf>, %64, %cst_34 [1] : vector<48x48xf32> to vector<48xf32>
    %66 = vector.shape_cast %65 : vector<48xf32> to vector<48x1xf32>
    %67 = vector.broadcast %66 : vector<48x1xf32> to vector<48x48xf32>
    %68 = arith.subf %64, %67 : vector<48x48xf32>
    %69 = math.exp %68 : vector<48x48xf32>
    %cst_35 = arith.constant dense<0.000000e+00> : vector<48xf32>
    %70 = vector.multi_reduction <add>, %69, %cst_35 [1] : vector<48x48xf32> to vector<48xf32>
    %71 = vector.shape_cast %70 : vector<48xf32> to vector<48x1xf32>
    %72 = tpu.reciprocal %71 {approx = true} : vector<48x1xf32> -> vector<48x1xf32>
    %73 = vector.broadcast %72 : vector<48x1xf32> to vector<48x48xf32>
    %74 = arith.mulf %69, %73 : vector<48x48xf32>
    %cst_36 = arith.constant dense<0.000000e+00> : vector<48x16xf32>
    %75 = tpu.matmul %74, %62, %cst_36 {dimension_numbers = #tpu.dot_dimension_numbers<[1], [0], [0], [1], [0, 0, 1, 1], [], []>} : vector<48x48xf32>, vector<48x16xf32>, vector<48x16xf32> -> vector<48x16xf32>
    %c0_37 = arith.constant 0 : index
    %c16 = arith.constant 16 : index
    %76 = vector.load %arg22[%c0_37, %c16] : memref<48x64xf32, #tpu.memory_space<vmem>>, vector<48x16xf32>
    tpu.vector_store %arg22[%c0_37, %c16], %75 {strides = array<i32>} : memref<48x64xf32, #tpu.memory_space<vmem>>, vector<48x16xf32>,
    %77 = vector.extract_strided_slice %38 {offsets = [0, 32], sizes = [48, 16], strides = [1, 1]} : vector<48x192xf32> to vector<48x16xf32>
    %cst_38 = arith.constant 2.500000e-01 : f32
    %78 = vector.broadcast %cst_38 : f32 to vector<48x16xf32>
    %79 = arith.mulf %77, %78 : vector<48x16xf32>
    %80 = vector.extract_strided_slice %38 {offsets = [0, 96], sizes = [48, 16], strides = [1, 1]} : vector<48x192xf32> to vector<48x16xf32>
    %81 = vector.extract_strided_slice %38 {offsets = [0, 160], sizes = [48, 16], strides = [1, 1]} : vector<48x192xf32> to vector<48x16xf32>
    %cst_39 = arith.constant dense<0.000000e+00> : vector<48x48xf32>
    %82 = tpu.matmul %79, %80, %cst_39 {dimension_numbers = #tpu.dot_dimension_numbers<[1], [1], [0], [0], [0, 0, 1, 0], [], []>} : vector<48x16xf32>, vector<48x16xf32>, vector<48x48xf32> -> vector<48x48xf32>
    %83 = arith.addf %82, %5 : vector<48x48xf32>
    %cst_40 = arith.constant dense<0xFF800000> : vector<48xf32>
    %84 = vector.multi_reduction <maximumf>, %83, %cst_40 [1] : vector<48x48xf32> to vector<48xf32>
    %85 = vector.shape_cast %84 : vector<48xf32> to vector<48x1xf32>
    %86 = vector.broadcast %85 : vector<48x1xf32> to vector<48x48xf32>
    %87 = arith.subf %83, %86 : vector<48x48xf32>
    %88 = math.exp %87 : vector<48x48xf32>
    %cst_41 = arith.constant dense<0.000000e+00> : vector<48xf32>
    %89 = vector.multi_reduction <add>, %88, %cst_41 [1] : vector<48x48xf32> to vector<48xf32>
    %90 = vector.shape_cast %89 : vector<48xf32> to vector<48x1xf32>
    %91 = tpu.reciprocal %90 {approx = true} : vector<48x1xf32> -> vector<48x1xf32>
    %92 = vector.broadcast %91 : vector<48x1xf32> to vector<48x48xf32>
    %93 = arith.mulf %88, %92 : vector<48x48xf32>
    %cst_42 = arith.constant dense<0.000000e+00> : vector<48x16xf32>
    %94 = tpu.matmul %93, %81, %cst_42 {dimension_numbers = #tpu.dot_dimension_numbers<[1], [0], [0], [1], [0, 0, 1, 1], [], []>} : vector<48x48xf32>, vector<48x16xf32>, vector<48x16xf32> -> vector<48x16xf32>
    %c0_43 = arith.constant 0 : index
    %c32 = arith.constant 32 : index
    %95 = vector.load %arg22[%c0_43, %c32] : memref<48x64xf32, #tpu.memory_space<vmem>>, vector<48x16xf32>
    tpu.vector_store %arg22[%c0_43, %c32], %94 {strides = array<i32>} : memref<48x64xf32, #tpu.memory_space<vmem>>, vector<48x16xf32>,
    %96 = vector.extract_strided_slice %38 {offsets = [0, 48], sizes = [48, 16], strides = [1, 1]} : vector<48x192xf32> to vector<48x16xf32>
    %cst_44 = arith.constant 2.500000e-01 : f32
    %97 = vector.broadcast %cst_44 : f32 to vector<48x16xf32>
    %98 = arith.mulf %96, %97 : vector<48x16xf32>
    %99 = vector.extract_strided_slice %38 {offsets = [0, 112], sizes = [48, 16], strides = [1, 1]} : vector<48x192xf32> to vector<48x16xf32>
    %100 = vector.extract_strided_slice %38 {offsets = [0, 176], sizes = [48, 16], strides = [1, 1]} : vector<48x192xf32> to vector<48x16xf32>
    %cst_45 = arith.constant dense<0.000000e+00> : vector<48x48xf32>
    %101 = tpu.matmul %98, %99, %cst_45 {dimension_numbers = #tpu.dot_dimension_numbers<[1], [1], [0], [0], [0, 0, 1, 0], [], []>} : vector<48x16xf32>, vector<48x16xf32>, vector<48x48xf32> -> vector<48x48xf32>
    %102 = arith.addf %101, %5 : vector<48x48xf32>
    %cst_46 = arith.constant dense<0xFF800000> : vector<48xf32>
    %103 = vector.multi_reduction <maximumf>, %102, %cst_46 [1] : vector<48x48xf32> to vector<48xf32>
    %104 = vector.shape_cast %103 : vector<48xf32> to vector<48x1xf32>
    %105 = vector.broadcast %104 : vector<48x1xf32> to vector<48x48xf32>
    %106 = arith.subf %102, %105 : vector<48x48xf32>
    %107 = math.exp %106 : vector<48x48xf32>
    %cst_47 = arith.constant dense<0.000000e+00> : vector<48xf32>
    %108 = vector.multi_reduction <add>, %107, %cst_47 [1] : vector<48x48xf32> to vector<48xf32>
    %109 = vector.shape_cast %108 : vector<48xf32> to vector<48x1xf32>
    %110 = tpu.reciprocal %109 {approx = true} : vector<48x1xf32> -> vector<48x1xf32>
    %111 = vector.broadcast %110 : vector<48x1xf32> to vector<48x48xf32>
    %112 = arith.mulf %107, %111 : vector<48x48xf32>
    %cst_48 = arith.constant dense<0.000000e+00> : vector<48x16xf32>
    %113 = tpu.matmul %112, %100, %cst_48 {dimension_numbers = #tpu.dot_dimension_numbers<[1], [0], [0], [1], [0, 0, 1, 1], [], []>} : vector<48x48xf32>, vector<48x16xf32>, vector<48x16xf32> -> vector<48x16xf32>
    %c0_49 = arith.constant 0 : index
    %c48 = arith.constant 48 : index
    %114 = vector.load %arg22[%c0_49, %c48] : memref<48x64xf32, #tpu.memory_space<vmem>>, vector<48x16xf32>
    tpu.vector_store %arg22[%c0_49, %c48], %113 {strides = array<i32>} : memref<48x64xf32, #tpu.memory_space<vmem>>, vector<48x16xf32>,
    %c0_50 = arith.constant 0 : index
    %c0_51 = arith.constant 0 : index
    %115 = vector.load %arg22[%c0_50, %c0_51] : memref<48x64xf32, #tpu.memory_space<vmem>>, vector<48x64xf32>
    %c0_52 = arith.constant 0 : index
    %c0_53 = arith.constant 0 : index
    %c0_54 = arith.constant 0 : index
    %116 = vector.load %arg9[%c0_52, %c0_53, %c0_54] : memref<2x64x64xf32, #tpu.memory_space<vmem>>, vector<1x64x64xf32>
    %117 = vector.shape_cast %116 : vector<1x64x64xf32> to vector<64x64xf32>
    %cst_55 = arith.constant dense<0.000000e+00> : vector<48x64xf32>
    %118 = tpu.matmul %115, %117, %cst_55 {dimension_numbers = #tpu.dot_dimension_numbers<[1], [0], [0], [1], [0, 0, 1, 1], [], []>} : vector<48x64xf32>, vector<64x64xf32>, vector<48x64xf32> -> vector<48x64xf32>
    %c0_56 = arith.constant 0 : index
    %c0_57 = arith.constant 0 : index
    %c0_58 = arith.constant 0 : index
    %119 = vector.load %arg10[%c0_56, %c0_57, %c0_58] : memref<2x1x64xf32, #tpu.memory_space<vmem>>, vector<1x1x64xf32>
    %120 = vector.shape_cast %119 : vector<1x1x64xf32> to vector<1x64xf32>
    %121 = vector.broadcast %120 : vector<1x64xf32> to vector<48x64xf32>
    %122 = arith.addf %118, %121 : vector<48x64xf32>
    %c0_59 = arith.constant 0 : index
    %c0_60 = arith.constant 0 : index
    %c0_61 = arith.constant 0 : index
    %123 = vector.load %arg11[%c0_59, %c0_60, %c0_61] : memref<2x1x64xf32, #tpu.memory_space<vmem>>, vector<1x1x64xf32>
    %124 = vector.shape_cast %123 : vector<1x1x64xf32> to vector<1x64xf32>
    %125 = vector.broadcast %124 : vector<1x64xf32> to vector<48x64xf32>
    %126 = arith.mulf %122, %125 : vector<48x64xf32>
    %127 = arith.addf %4, %126 : vector<48x64xf32>
    %c0_62 = arith.constant 0 : index
    %c0_63 = arith.constant 0 : index
    %c0_64 = arith.constant 0 : index
    %128 = vector.load %arg12[%c0_62, %c0_63, %c0_64] : memref<2x1x64xf32, #tpu.memory_space<vmem>>, vector<1x1x64xf32>
    %129 = vector.shape_cast %128 : vector<1x1x64xf32> to vector<1x64xf32>
    %c0_65 = arith.constant 0 : index
    %c0_66 = arith.constant 0 : index
    %c0_67 = arith.constant 0 : index
    %130 = vector.load %arg13[%c0_65, %c0_66, %c0_67] : memref<2x1x64xf32, #tpu.memory_space<vmem>>, vector<1x1x64xf32>
    %131 = vector.shape_cast %130 : vector<1x1x64xf32> to vector<1x64xf32>
    %cst_68 = arith.constant dense<0.000000e+00> : vector<48xf32>
    %132 = vector.multi_reduction <add>, %127, %cst_68 [1] : vector<48x64xf32> to vector<48xf32>
    %133 = vector.shape_cast %132 : vector<48xf32> to vector<48x1xf32>
    %cst_69 = arith.constant 6.400000e+01 : f32
    %134 = vector.broadcast %cst_69 : f32 to vector<48x1xf32>
    %135 = arith.divf %133, %134 : vector<48x1xf32>
    %136 = arith.mulf %127, %127 : vector<48x64xf32>
    %cst_70 = arith.constant dense<0.000000e+00> : vector<48xf32>
    %137 = vector.multi_reduction <add>, %136, %cst_70 [1] : vector<48x64xf32> to vector<48xf32>
    %138 = vector.shape_cast %137 : vector<48xf32> to vector<48x1xf32>
    %cst_71 = arith.constant 6.400000e+01 : f32
    %139 = vector.broadcast %cst_71 : f32 to vector<48x1xf32>
    %140 = arith.divf %138, %139 : vector<48x1xf32>
    %141 = arith.mulf %135, %135 : vector<48x1xf32>
    %142 = arith.subf %140, %141 : vector<48x1xf32>
    %143 = vector.broadcast %135 : vector<48x1xf32> to vector<48x64xf32>
    %144 = arith.subf %127, %143 : vector<48x64xf32>
    %cst_72 = arith.constant 9.99999997E-7 : f32
    %145 = vector.broadcast %cst_72 : f32 to vector<48x1xf32>
    %146 = arith.addf %142, %145 : vector<48x1xf32>
    %147 = math.rsqrt %146 : vector<48x1xf32>
    %148 = vector.broadcast %147 : vector<48x1xf32> to vector<48x64xf32>
    %149 = vector.broadcast %129 : vector<1x64xf32> to vector<48x64xf32>
    %150 = arith.mulf %148, %149 : vector<48x64xf32>
    %151 = arith.mulf %144, %150 : vector<48x64xf32>
    %152 = vector.broadcast %131 : vector<1x64xf32> to vector<48x64xf32>
    %153 = arith.addf %151, %152 : vector<48x64xf32>
    %c0_73 = arith.constant 0 : index
    %c0_74 = arith.constant 0 : index
    %c0_75 = arith.constant 0 : index
    %154 = vector.load %arg14[%c0_73, %c0_74, %c0_75] : memref<2x64x256xf32, #tpu.memory_space<vmem>>, vector<1x64x256xf32>
    %155 = vector.shape_cast %154 : vector<1x64x256xf32> to vector<64x256xf32>
    %cst_76 = arith.constant dense<0.000000e+00> : vector<48x256xf32>
    %156 = tpu.matmul %153, %155, %cst_76 {dimension_numbers = #tpu.dot_dimension_numbers<[1], [0], [0], [1], [0, 0, 1, 1], [], []>} : vector<48x64xf32>, vector<64x256xf32>, vector<48x256xf32> -> vector<48x256xf32>
    %c0_77 = arith.constant 0 : index
    %c0_78 = arith.constant 0 : index
    %c0_79 = arith.constant 0 : index
    %157 = vector.load %arg15[%c0_77, %c0_78, %c0_79] : memref<2x1x256xf32, #tpu.memory_space<vmem>>, vector<1x1x256xf32>
    %158 = vector.shape_cast %157 : vector<1x1x256xf32> to vector<1x256xf32>
    %159 = vector.broadcast %158 : vector<1x256xf32> to vector<48x256xf32>
    %160 = arith.addf %156, %159 : vector<48x256xf32>
    %161 = arith.mulf %160, %160 : vector<48x256xf32>
    %162 = arith.mulf %160, %161 : vector<48x256xf32>
    %cst_80 = arith.constant 4.471500e-02 : f32
    %163 = vector.broadcast %cst_80 : f32 to vector<48x256xf32>
    %164 = arith.mulf %163, %162 : vector<48x256xf32>
    %165 = arith.addf %160, %164 : vector<48x256xf32>
    %cst_81 = arith.constant 0.797884583 : f32
    %166 = vector.broadcast %cst_81 : f32 to vector<48x256xf32>
    %167 = arith.mulf %166, %165 : vector<48x256xf32>
    %168 = math.tanh %167 : vector<48x256xf32>
    %cst_82 = arith.constant 1.000000e+00 : f32
    %169 = vector.broadcast %cst_82 : f32 to vector<48x256xf32>
    %170 = arith.addf %169, %168 : vector<48x256xf32>
    %cst_83 = arith.constant 5.000000e-01 : f32
    %171 = vector.broadcast %cst_83 : f32 to vector<48x256xf32>
    %172 = arith.mulf %171, %170 : vector<48x256xf32>
    %173 = arith.mulf %160, %172 : vector<48x256xf32>
    %c0_84 = arith.constant 0 : index
    %c0_85 = arith.constant 0 : index
    %c0_86 = arith.constant 0 : index
    %174 = vector.load %arg16[%c0_84, %c0_85, %c0_86] : memref<2x256x64xf32, #tpu.memory_space<vmem>>, vector<1x256x64xf32>
    %175 = vector.shape_cast %174 : vector<1x256x64xf32> to vector<256x64xf32>
    %cst_87 = arith.constant dense<0.000000e+00> : vector<48x64xf32>
    %176 = tpu.matmul %173, %175, %cst_87 {dimension_numbers = #tpu.dot_dimension_numbers<[1], [0], [0], [1], [0, 0, 1, 1], [], []>} : vector<48x256xf32>, vector<256x64xf32>, vector<48x64xf32> -> vector<48x64xf32>
    %c0_88 = arith.constant 0 : index
    %c0_89 = arith.constant 0 : index
    %c0_90 = arith.constant 0 : index
    %177 = vector.load %arg17[%c0_88, %c0_89, %c0_90] : memref<2x1x64xf32, #tpu.memory_space<vmem>>, vector<1x1x64xf32>
    %178 = vector.shape_cast %177 : vector<1x1x64xf32> to vector<1x64xf32>
    %179 = vector.broadcast %178 : vector<1x64xf32> to vector<48x64xf32>
    %180 = arith.addf %176, %179 : vector<48x64xf32>
    %c0_91 = arith.constant 0 : index
    %c0_92 = arith.constant 0 : index
    %c0_93 = arith.constant 0 : index
    %181 = vector.load %arg18[%c0_91, %c0_92, %c0_93] : memref<2x1x64xf32, #tpu.memory_space<vmem>>, vector<1x1x64xf32>
    %182 = vector.shape_cast %181 : vector<1x1x64xf32> to vector<1x64xf32>
    %183 = vector.broadcast %182 : vector<1x64xf32> to vector<48x64xf32>
    %184 = arith.mulf %180, %183 : vector<48x64xf32>
    %185 = arith.addf %127, %184 : vector<48x64xf32>
    %c1 = arith.constant 1 : index
    %c0_94 = arith.constant 0 : index
    %c0_95 = arith.constant 0 : index
    %186 = vector.load %arg5[%c1, %c0_94, %c0_95] : memref<2x1x64xf32, #tpu.memory_space<vmem>>, vector<1x1x64xf32>
    %187 = vector.shape_cast %186 : vector<1x1x64xf32> to vector<1x64xf32>
    %c1_96 = arith.constant 1 : index
    %c0_97 = arith.constant 0 : index
    %c0_98 = arith.constant 0 : index
    %188 = vector.load %arg6[%c1_96, %c0_97, %c0_98] : memref<2x1x64xf32, #tpu.memory_space<vmem>>, vector<1x1x64xf32>
    %189 = vector.shape_cast %188 : vector<1x1x64xf32> to vector<1x64xf32>
    %cst_99 = arith.constant dense<0.000000e+00> : vector<48xf32>
    %190 = vector.multi_reduction <add>, %185, %cst_99 [1] : vector<48x64xf32> to vector<48xf32>
    %191 = vector.shape_cast %190 : vector<48xf32> to vector<48x1xf32>
    %cst_100 = arith.constant 6.400000e+01 : f32
    %192 = vector.broadcast %cst_100 : f32 to vector<48x1xf32>
    %193 = arith.divf %191, %192 : vector<48x1xf32>
    %194 = arith.mulf %185, %185 : vector<48x64xf32>
    %cst_101 = arith.constant dense<0.000000e+00> : vector<48xf32>
    %195 = vector.multi_reduction <add>, %194, %cst_101 [1] : vector<48x64xf32> to vector<48xf32>
    %196 = vector.shape_cast %195 : vector<48xf32> to vector<48x1xf32>
    %cst_102 = arith.constant 6.400000e+01 : f32
    %197 = vector.broadcast %cst_102 : f32 to vector<48x1xf32>
    %198 = arith.divf %196, %197 : vector<48x1xf32>
    %199 = arith.mulf %193, %193 : vector<48x1xf32>
    %200 = arith.subf %198, %199 : vector<48x1xf32>
    %201 = vector.broadcast %193 : vector<48x1xf32> to vector<48x64xf32>
    %202 = arith.subf %185, %201 : vector<48x64xf32>
    %cst_103 = arith.constant 9.99999997E-7 : f32
    %203 = vector.broadcast %cst_103 : f32 to vector<48x1xf32>
    %204 = arith.addf %200, %203 : vector<48x1xf32>
    %205 = math.rsqrt %204 : vector<48x1xf32>
    %206 = vector.broadcast %205 : vector<48x1xf32> to vector<48x64xf32>
    %207 = vector.broadcast %187 : vector<1x64xf32> to vector<48x64xf32>
    %208 = arith.mulf %206, %207 : vector<48x64xf32>
    %209 = arith.mulf %202, %208 : vector<48x64xf32>
    %210 = vector.broadcast %189 : vector<1x64xf32> to vector<48x64xf32>
    %211 = arith.addf %209, %210 : vector<48x64xf32>
    %c1_104 = arith.constant 1 : index
    %c0_105 = arith.constant 0 : index
    %c0_106 = arith.constant 0 : index
    %212 = vector.load %arg7[%c1_104, %c0_105, %c0_106] : memref<2x64x192xf32, #tpu.memory_space<vmem>>, vector<1x64x192xf32>
    %213 = vector.shape_cast %212 : vector<1x64x192xf32> to vector<64x192xf32>
    %cst_107 = arith.constant dense<0.000000e+00> : vector<48x192xf32>
    %214 = tpu.matmul %211, %213, %cst_107 {dimension_numbers = #tpu.dot_dimension_numbers<[1], [0], [0], [1], [0, 0, 1, 1], [], []>} : vector<48x64xf32>, vector<64x192xf32>, vector<48x192xf32> -> vector<48x192xf32>
    %c1_108 = arith.constant 1 : index
    %c0_109 = arith.constant 0 : index
    %c0_110 = arith.constant 0 : index
    %215 = vector.load %arg8[%c1_108, %c0_109, %c0_110] : memref<2x1x192xf32, #tpu.memory_space<vmem>>, vector<1x1x192xf32>
    %216 = vector.shape_cast %215 : vector<1x1x192xf32> to vector<1x192xf32>
    %217 = vector.broadcast %216 : vector<1x192xf32> to vector<48x192xf32>
    %218 = arith.addf %214, %217 : vector<48x192xf32>
    %219 = vector.extract_strided_slice %218 {offsets = [0, 0], sizes = [48, 16], strides = [1, 1]} : vector<48x192xf32> to vector<48x16xf32>
    %cst_111 = arith.constant 2.500000e-01 : f32
    %220 = vector.broadcast %cst_111 : f32 to vector<48x16xf32>
    %221 = arith.mulf %219, %220 : vector<48x16xf32>
    %222 = vector.extract_strided_slice %218 {offsets = [0, 64], sizes = [48, 16], strides = [1, 1]} : vector<48x192xf32> to vector<48x16xf32>
    %223 = vector.extract_strided_slice %218 {offsets = [0, 128], sizes = [48, 16], strides = [1, 1]} : vector<48x192xf32> to vector<48x16xf32>
    %cst_112 = arith.constant dense<0.000000e+00> : vector<48x48xf32>
    %224 = tpu.matmul %221, %222, %cst_112 {dimension_numbers = #tpu.dot_dimension_numbers<[1], [1], [0], [0], [0, 0, 1, 0], [], []>} : vector<48x16xf32>, vector<48x16xf32>, vector<48x48xf32> -> vector<48x48xf32>
    %225 = arith.addf %224, %5 : vector<48x48xf32>
    %cst_113 = arith.constant dense<0xFF800000> : vector<48xf32>
    %226 = vector.multi_reduction <maximumf>, %225, %cst_113 [1] : vector<48x48xf32> to vector<48xf32>
    %227 = vector.shape_cast %226 : vector<48xf32> to vector<48x1xf32>
    %228 = vector.broadcast %227 : vector<48x1xf32> to vector<48x48xf32>
    %229 = arith.subf %225, %228 : vector<48x48xf32>
    %230 = math.exp %229 : vector<48x48xf32>
    %cst_114 = arith.constant dense<0.000000e+00> : vector<48xf32>
    %231 = vector.multi_reduction <add>, %230, %cst_114 [1] : vector<48x48xf32> to vector<48xf32>
    %232 = vector.shape_cast %231 : vector<48xf32> to vector<48x1xf32>
    %233 = tpu.reciprocal %232 {approx = true} : vector<48x1xf32> -> vector<48x1xf32>
    %234 = vector.broadcast %233 : vector<48x1xf32> to vector<48x48xf32>
    %235 = arith.mulf %230, %234 : vector<48x48xf32>
    %cst_115 = arith.constant dense<0.000000e+00> : vector<48x16xf32>
    %236 = tpu.matmul %235, %223, %cst_115 {dimension_numbers = #tpu.dot_dimension_numbers<[1], [0], [0], [1], [0, 0, 1, 1], [], []>} : vector<48x48xf32>, vector<48x16xf32>, vector<48x16xf32> -> vector<48x16xf32>
    %c0_116 = arith.constant 0 : index
    %c0_117 = arith.constant 0 : index
    %237 = vector.load %arg22[%c0_116, %c0_117] : memref<48x64xf32, #tpu.memory_space<vmem>>, vector<48x16xf32>
    tpu.vector_store %arg22[%c0_116, %c0_117], %236 {strides = array<i32>} : memref<48x64xf32, #tpu.memory_space<vmem>>, vector<48x16xf32>,
    %238 = vector.extract_strided_slice %218 {offsets = [0, 16], sizes = [48, 16], strides = [1, 1]} : vector<48x192xf32> to vector<48x16xf32>
    %cst_118 = arith.constant 2.500000e-01 : f32
    %239 = vector.broadcast %cst_118 : f32 to vector<48x16xf32>
    %240 = arith.mulf %238, %239 : vector<48x16xf32>
    %241 = vector.extract_strided_slice %218 {offsets = [0, 80], sizes = [48, 16], strides = [1, 1]} : vector<48x192xf32> to vector<48x16xf32>
    %242 = vector.extract_strided_slice %218 {offsets = [0, 144], sizes = [48, 16], strides = [1, 1]} : vector<48x192xf32> to vector<48x16xf32>
    %cst_119 = arith.constant dense<0.000000e+00> : vector<48x48xf32>
    %243 = tpu.matmul %240, %241, %cst_119 {dimension_numbers = #tpu.dot_dimension_numbers<[1], [1], [0], [0], [0, 0, 1, 0], [], []>} : vector<48x16xf32>, vector<48x16xf32>, vector<48x48xf32> -> vector<48x48xf32>
    %244 = arith.addf %243, %5 : vector<48x48xf32>
    %cst_120 = arith.constant dense<0xFF800000> : vector<48xf32>
    %245 = vector.multi_reduction <maximumf>, %244, %cst_120 [1] : vector<48x48xf32> to vector<48xf32>
    %246 = vector.shape_cast %245 : vector<48xf32> to vector<48x1xf32>
    %247 = vector.broadcast %246 : vector<48x1xf32> to vector<48x48xf32>
    %248 = arith.subf %244, %247 : vector<48x48xf32>
    %249 = math.exp %248 : vector<48x48xf32>
    %cst_121 = arith.constant dense<0.000000e+00> : vector<48xf32>
    %250 = vector.multi_reduction <add>, %249, %cst_121 [1] : vector<48x48xf32> to vector<48xf32>
    %251 = vector.shape_cast %250 : vector<48xf32> to vector<48x1xf32>
    %252 = tpu.reciprocal %251 {approx = true} : vector<48x1xf32> -> vector<48x1xf32>
    %253 = vector.broadcast %252 : vector<48x1xf32> to vector<48x48xf32>
    %254 = arith.mulf %249, %253 : vector<48x48xf32>
    %cst_122 = arith.constant dense<0.000000e+00> : vector<48x16xf32>
    %255 = tpu.matmul %254, %242, %cst_122 {dimension_numbers = #tpu.dot_dimension_numbers<[1], [0], [0], [1], [0, 0, 1, 1], [], []>} : vector<48x48xf32>, vector<48x16xf32>, vector<48x16xf32> -> vector<48x16xf32>
    %c0_123 = arith.constant 0 : index
    %c16_124 = arith.constant 16 : index
    %256 = vector.load %arg22[%c0_123, %c16_124] : memref<48x64xf32, #tpu.memory_space<vmem>>, vector<48x16xf32>
    tpu.vector_store %arg22[%c0_123, %c16_124], %255 {strides = array<i32>} : memref<48x64xf32, #tpu.memory_space<vmem>>, vector<48x16xf32>,
    %257 = vector.extract_strided_slice %218 {offsets = [0, 32], sizes = [48, 16], strides = [1, 1]} : vector<48x192xf32> to vector<48x16xf32>
    %cst_125 = arith.constant 2.500000e-01 : f32
    %258 = vector.broadcast %cst_125 : f32 to vector<48x16xf32>
    %259 = arith.mulf %257, %258 : vector<48x16xf32>
    %260 = vector.extract_strided_slice %218 {offsets = [0, 96], sizes = [48, 16], strides = [1, 1]} : vector<48x192xf32> to vector<48x16xf32>
    %261 = vector.extract_strided_slice %218 {offsets = [0, 160], sizes = [48, 16], strides = [1, 1]} : vector<48x192xf32> to vector<48x16xf32>
    %cst_126 = arith.constant dense<0.000000e+00> : vector<48x48xf32>
    %262 = tpu.matmul %259, %260, %cst_126 {dimension_numbers = #tpu.dot_dimension_numbers<[1], [1], [0], [0], [0, 0, 1, 0], [], []>} : vector<48x16xf32>, vector<48x16xf32>, vector<48x48xf32> -> vector<48x48xf32>
    %263 = arith.addf %262, %5 : vector<48x48xf32>
    %cst_127 = arith.constant dense<0xFF800000> : vector<48xf32>
    %264 = vector.multi_reduction <maximumf>, %263, %cst_127 [1] : vector<48x48xf32> to vector<48xf32>
    %265 = vector.shape_cast %264 : vector<48xf32> to vector<48x1xf32>
    %266 = vector.broadcast %265 : vector<48x1xf32> to vector<48x48xf32>
    %267 = arith.subf %263, %266 : vector<48x48xf32>
    %268 = math.exp %267 : vector<48x48xf32>
    %cst_128 = arith.constant dense<0.000000e+00> : vector<48xf32>
    %269 = vector.multi_reduction <add>, %268, %cst_128 [1] : vector<48x48xf32> to vector<48xf32>
    %270 = vector.shape_cast %269 : vector<48xf32> to vector<48x1xf32>
    %271 = tpu.reciprocal %270 {approx = true} : vector<48x1xf32> -> vector<48x1xf32>
    %272 = vector.broadcast %271 : vector<48x1xf32> to vector<48x48xf32>
    %273 = arith.mulf %268, %272 : vector<48x48xf32>
    %cst_129 = arith.constant dense<0.000000e+00> : vector<48x16xf32>
    %274 = tpu.matmul %273, %261, %cst_129 {dimension_numbers = #tpu.dot_dimension_numbers<[1], [0], [0], [1], [0, 0, 1, 1], [], []>} : vector<48x48xf32>, vector<48x16xf32>, vector<48x16xf32> -> vector<48x16xf32>
    %c0_130 = arith.constant 0 : index
    %c32_131 = arith.constant 32 : index
    %275 = vector.load %arg22[%c0_130, %c32_131] : memref<48x64xf32, #tpu.memory_space<vmem>>, vector<48x16xf32>
    tpu.vector_store %arg22[%c0_130, %c32_131], %274 {strides = array<i32>} : memref<48x64xf32, #tpu.memory_space<vmem>>, vector<48x16xf32>,
    %276 = vector.extract_strided_slice %218 {offsets = [0, 48], sizes = [48, 16], strides = [1, 1]} : vector<48x192xf32> to vector<48x16xf32>
    %cst_132 = arith.constant 2.500000e-01 : f32
    %277 = vector.broadcast %cst_132 : f32 to vector<48x16xf32>
    %278 = arith.mulf %276, %277 : vector<48x16xf32>
    %279 = vector.extract_strided_slice %218 {offsets = [0, 112], sizes = [48, 16], strides = [1, 1]} : vector<48x192xf32> to vector<48x16xf32>
    %280 = vector.extract_strided_slice %218 {offsets = [0, 176], sizes = [48, 16], strides = [1, 1]} : vector<48x192xf32> to vector<48x16xf32>
    %cst_133 = arith.constant dense<0.000000e+00> : vector<48x48xf32>
    %281 = tpu.matmul %278, %279, %cst_133 {dimension_numbers = #tpu.dot_dimension_numbers<[1], [1], [0], [0], [0, 0, 1, 0], [], []>} : vector<48x16xf32>, vector<48x16xf32>, vector<48x48xf32> -> vector<48x48xf32>
    %282 = arith.addf %281, %5 : vector<48x48xf32>
    %cst_134 = arith.constant dense<0xFF800000> : vector<48xf32>
    %283 = vector.multi_reduction <maximumf>, %282, %cst_134 [1] : vector<48x48xf32> to vector<48xf32>
    %284 = vector.shape_cast %283 : vector<48xf32> to vector<48x1xf32>
    %285 = vector.broadcast %284 : vector<48x1xf32> to vector<48x48xf32>
    %286 = arith.subf %282, %285 : vector<48x48xf32>
    %287 = math.exp %286 : vector<48x48xf32>
    %cst_135 = arith.constant dense<0.000000e+00> : vector<48xf32>
    %288 = vector.multi_reduction <add>, %287, %cst_135 [1] : vector<48x48xf32> to vector<48xf32>
    %289 = vector.shape_cast %288 : vector<48xf32> to vector<48x1xf32>
    %290 = tpu.reciprocal %289 {approx = true} : vector<48x1xf32> -> vector<48x1xf32>
    %291 = vector.broadcast %290 : vector<48x1xf32> to vector<48x48xf32>
    %292 = arith.mulf %287, %291 : vector<48x48xf32>
    %cst_136 = arith.constant dense<0.000000e+00> : vector<48x16xf32>
    %293 = tpu.matmul %292, %280, %cst_136 {dimension_numbers = #tpu.dot_dimension_numbers<[1], [0], [0], [1], [0, 0, 1, 1], [], []>} : vector<48x48xf32>, vector<48x16xf32>, vector<48x16xf32> -> vector<48x16xf32>
    %c0_137 = arith.constant 0 : index
    %c48_138 = arith.constant 48 : index
    %294 = vector.load %arg22[%c0_137, %c48_138] : memref<48x64xf32, #tpu.memory_space<vmem>>, vector<48x16xf32>
    tpu.vector_store %arg22[%c0_137, %c48_138], %293 {strides = array<i32>} : memref<48x64xf32, #tpu.memory_space<vmem>>, vector<48x16xf32>,
    %c0_139 = arith.constant 0 : index
    %c0_140 = arith.constant 0 : index
    %295 = vector.load %arg22[%c0_139, %c0_140] : memref<48x64xf32, #tpu.memory_space<vmem>>, vector<48x64xf32>
    %c1_141 = arith.constant 1 : index
    %c0_142 = arith.constant 0 : index
    %c0_143 = arith.constant 0 : index
    %296 = vector.load %arg9[%c1_141, %c0_142, %c0_143] : memref<2x64x64xf32, #tpu.memory_space<vmem>>, vector<1x64x64xf32>
    %297 = vector.shape_cast %296 : vector<1x64x64xf32> to vector<64x64xf32>
    %cst_144 = arith.constant dense<0.000000e+00> : vector<48x64xf32>
    %298 = tpu.matmul %295, %297, %cst_144 {dimension_numbers = #tpu.dot_dimension_numbers<[1], [0], [0], [1], [0, 0, 1, 1], [], []>} : vector<48x64xf32>, vector<64x64xf32>, vector<48x64xf32> -> vector<48x64xf32>
    %c1_145 = arith.constant 1 : index
    %c0_146 = arith.constant 0 : index
    %c0_147 = arith.constant 0 : index
    %299 = vector.load %arg10[%c1_145, %c0_146, %c0_147] : memref<2x1x64xf32, #tpu.memory_space<vmem>>, vector<1x1x64xf32>
    %300 = vector.shape_cast %299 : vector<1x1x64xf32> to vector<1x64xf32>
    %301 = vector.broadcast %300 : vector<1x64xf32> to vector<48x64xf32>
    %302 = arith.addf %298, %301 : vector<48x64xf32>
    %c1_148 = arith.constant 1 : index
    %c0_149 = arith.constant 0 : index
    %c0_150 = arith.constant 0 : index
    %303 = vector.load %arg11[%c1_148, %c0_149, %c0_150] : memref<2x1x64xf32, #tpu.memory_space<vmem>>, vector<1x1x64xf32>
    %304 = vector.shape_cast %303 : vector<1x1x64xf32> to vector<1x64xf32>
    %305 = vector.broadcast %304 : vector<1x64xf32> to vector<48x64xf32>
    %306 = arith.mulf %302, %305 : vector<48x64xf32>
    %307 = arith.addf %185, %306 : vector<48x64xf32>
    %c1_151 = arith.constant 1 : index
    %c0_152 = arith.constant 0 : index
    %c0_153 = arith.constant 0 : index
    %308 = vector.load %arg12[%c1_151, %c0_152, %c0_153] : memref<2x1x64xf32, #tpu.memory_space<vmem>>, vector<1x1x64xf32>
    %309 = vector.shape_cast %308 : vector<1x1x64xf32> to vector<1x64xf32>
    %c1_154 = arith.constant 1 : index
    %c0_155 = arith.constant 0 : index
    %c0_156 = arith.constant 0 : index
    %310 = vector.load %arg13[%c1_154, %c0_155, %c0_156] : memref<2x1x64xf32, #tpu.memory_space<vmem>>, vector<1x1x64xf32>
    %311 = vector.shape_cast %310 : vector<1x1x64xf32> to vector<1x64xf32>
    %cst_157 = arith.constant dense<0.000000e+00> : vector<48xf32>
    %312 = vector.multi_reduction <add>, %307, %cst_157 [1] : vector<48x64xf32> to vector<48xf32>
    %313 = vector.shape_cast %312 : vector<48xf32> to vector<48x1xf32>
    %cst_158 = arith.constant 6.400000e+01 : f32
    %314 = vector.broadcast %cst_158 : f32 to vector<48x1xf32>
    %315 = arith.divf %313, %314 : vector<48x1xf32>
    %316 = arith.mulf %307, %307 : vector<48x64xf32>
    %cst_159 = arith.constant dense<0.000000e+00> : vector<48xf32>
    %317 = vector.multi_reduction <add>, %316, %cst_159 [1] : vector<48x64xf32> to vector<48xf32>
    %318 = vector.shape_cast %317 : vector<48xf32> to vector<48x1xf32>
    %cst_160 = arith.constant 6.400000e+01 : f32
    %319 = vector.broadcast %cst_160 : f32 to vector<48x1xf32>
    %320 = arith.divf %318, %319 : vector<48x1xf32>
    %321 = arith.mulf %315, %315 : vector<48x1xf32>
    %322 = arith.subf %320, %321 : vector<48x1xf32>
    %323 = vector.broadcast %315 : vector<48x1xf32> to vector<48x64xf32>
    %324 = arith.subf %307, %323 : vector<48x64xf32>
    %cst_161 = arith.constant 9.99999997E-7 : f32
    %325 = vector.broadcast %cst_161 : f32 to vector<48x1xf32>
    %326 = arith.addf %322, %325 : vector<48x1xf32>
    %327 = math.rsqrt %326 : vector<48x1xf32>
    %328 = vector.broadcast %327 : vector<48x1xf32> to vector<48x64xf32>
    %329 = vector.broadcast %309 : vector<1x64xf32> to vector<48x64xf32>
    %330 = arith.mulf %328, %329 : vector<48x64xf32>
    %331 = arith.mulf %324, %330 : vector<48x64xf32>
    %332 = vector.broadcast %311 : vector<1x64xf32> to vector<48x64xf32>
    %333 = arith.addf %331, %332 : vector<48x64xf32>
    %c1_162 = arith.constant 1 : index
    %c0_163 = arith.constant 0 : index
    %c0_164 = arith.constant 0 : index
    %334 = vector.load %arg14[%c1_162, %c0_163, %c0_164] : memref<2x64x256xf32, #tpu.memory_space<vmem>>, vector<1x64x256xf32>
    %335 = vector.shape_cast %334 : vector<1x64x256xf32> to vector<64x256xf32>
    %cst_165 = arith.constant dense<0.000000e+00> : vector<48x256xf32>
    %336 = tpu.matmul %333, %335, %cst_165 {dimension_numbers = #tpu.dot_dimension_numbers<[1], [0], [0], [1], [0, 0, 1, 1], [], []>} : vector<48x64xf32>, vector<64x256xf32>, vector<48x256xf32> -> vector<48x256xf32>
    %c1_166 = arith.constant 1 : index
    %c0_167 = arith.constant 0 : index
    %c0_168 = arith.constant 0 : index
    %337 = vector.load %arg15[%c1_166, %c0_167, %c0_168] : memref<2x1x256xf32, #tpu.memory_space<vmem>>, vector<1x1x256xf32>
    %338 = vector.shape_cast %337 : vector<1x1x256xf32> to vector<1x256xf32>
    %339 = vector.broadcast %338 : vector<1x256xf32> to vector<48x256xf32>
    %340 = arith.addf %336, %339 : vector<48x256xf32>
    %341 = arith.mulf %340, %340 : vector<48x256xf32>
    %342 = arith.mulf %340, %341 : vector<48x256xf32>
    %cst_169 = arith.constant 4.471500e-02 : f32
    %343 = vector.broadcast %cst_169 : f32 to vector<48x256xf32>
    %344 = arith.mulf %343, %342 : vector<48x256xf32>
    %345 = arith.addf %340, %344 : vector<48x256xf32>
    %cst_170 = arith.constant 0.797884583 : f32
    %346 = vector.broadcast %cst_170 : f32 to vector<48x256xf32>
    %347 = arith.mulf %346, %345 : vector<48x256xf32>
    %348 = math.tanh %347 : vector<48x256xf32>
    %cst_171 = arith.constant 1.000000e+00 : f32
    %349 = vector.broadcast %cst_171 : f32 to vector<48x256xf32>
    %350 = arith.addf %349, %348 : vector<48x256xf32>
    %cst_172 = arith.constant 5.000000e-01 : f32
    %351 = vector.broadcast %cst_172 : f32 to vector<48x256xf32>
    %352 = arith.mulf %351, %350 : vector<48x256xf32>
    %353 = arith.mulf %340, %352 : vector<48x256xf32>
    %c1_173 = arith.constant 1 : index
    %c0_174 = arith.constant 0 : index
    %c0_175 = arith.constant 0 : index
    %354 = vector.load %arg16[%c1_173, %c0_174, %c0_175] : memref<2x256x64xf32, #tpu.memory_space<vmem>>, vector<1x256x64xf32>
    %355 = vector.shape_cast %354 : vector<1x256x64xf32> to vector<256x64xf32>
    %cst_176 = arith.constant dense<0.000000e+00> : vector<48x64xf32>
    %356 = tpu.matmul %353, %355, %cst_176 {dimension_numbers = #tpu.dot_dimension_numbers<[1], [0], [0], [1], [0, 0, 1, 1], [], []>} : vector<48x256xf32>, vector<256x64xf32>, vector<48x64xf32> -> vector<48x64xf32>
    %c1_177 = arith.constant 1 : index
    %c0_178 = arith.constant 0 : index
    %c0_179 = arith.constant 0 : index
    %357 = vector.load %arg17[%c1_177, %c0_178, %c0_179] : memref<2x1x64xf32, #tpu.memory_space<vmem>>, vector<1x1x64xf32>
    %358 = vector.shape_cast %357 : vector<1x1x64xf32> to vector<1x64xf32>
    %359 = vector.broadcast %358 : vector<1x64xf32> to vector<48x64xf32>
    %360 = arith.addf %356, %359 : vector<48x64xf32>
    %c1_180 = arith.constant 1 : index
    %c0_181 = arith.constant 0 : index
    %c0_182 = arith.constant 0 : index
    %361 = vector.load %arg18[%c1_180, %c0_181, %c0_182] : memref<2x1x64xf32, #tpu.memory_space<vmem>>, vector<1x1x64xf32>
    %362 = vector.shape_cast %361 : vector<1x1x64xf32> to vector<1x64xf32>
    %363 = vector.broadcast %362 : vector<1x64xf32> to vector<48x64xf32>
    %364 = arith.mulf %360, %363 : vector<48x64xf32>
    %365 = arith.addf %307, %364 : vector<48x64xf32>
    %366 = vector.extract_strided_slice %365 {offsets = [0, 0], sizes = [1, 64], strides = [1, 1]} : vector<48x64xf32> to vector<1x64xf32>
    %367 = vector.extract_strided_slice %365 {offsets = [24, 0], sizes = [1, 64], strides = [1, 1]} : vector<48x64xf32> to vector<1x64xf32>
    %368 = tpu.concatenate %366, %367 in 0 : vector<1x64xf32>, vector<1x64xf32> -> vector<2x64xf32>
    %c0_183 = arith.constant 0 : index
    %c0_184 = arith.constant 0 : index
    %369 = vector.load %arg19[%c0_183, %c0_184] : memref<1x64xf32, #tpu.memory_space<vmem>>, vector<1x64xf32>
    %c0_185 = arith.constant 0 : index
    %c0_186 = arith.constant 0 : index
    %370 = vector.load %arg20[%c0_185, %c0_186] : memref<1x64xf32, #tpu.memory_space<vmem>>, vector<1x64xf32>
    %cst_187 = arith.constant dense<0.000000e+00> : vector<2xf32>
    %371 = vector.multi_reduction <add>, %368, %cst_187 [1] : vector<2x64xf32> to vector<2xf32>
    %372 = vector.shape_cast %371 : vector<2xf32> to vector<2x1xf32>
    %cst_188 = arith.constant 6.400000e+01 : f32
    %373 = vector.broadcast %cst_188 : f32 to vector<2x1xf32>
    %374 = arith.divf %372, %373 : vector<2x1xf32>
    %375 = arith.mulf %368, %368 : vector<2x64xf32>
    %cst_189 = arith.constant dense<0.000000e+00> : vector<2xf32>
    %376 = vector.multi_reduction <add>, %375, %cst_189 [1] : vector<2x64xf32> to vector<2xf32>
    %377 = vector.shape_cast %376 : vector<2xf32> to vector<2x1xf32>
    %cst_190 = arith.constant 6.400000e+01 : f32
    %378 = vector.broadcast %cst_190 : f32 to vector<2x1xf32>
    %379 = arith.divf %377, %378 : vector<2x1xf32>
    %380 = arith.mulf %374, %374 : vector<2x1xf32>
    %381 = arith.subf %379, %380 : vector<2x1xf32>
    %382 = vector.broadcast %374 : vector<2x1xf32> to vector<2x64xf32>
    %383 = arith.subf %368, %382 : vector<2x64xf32>
    %cst_191 = arith.constant 9.99999997E-7 : f32
    %384 = vector.broadcast %cst_191 : f32 to vector<2x1xf32>
    %385 = arith.addf %381, %384 : vector<2x1xf32>
    %386 = math.rsqrt %385 : vector<2x1xf32>
    %387 = vector.broadcast %386 : vector<2x1xf32> to vector<2x64xf32>
    %388 = vector.broadcast %369 : vector<1x64xf32> to vector<2x64xf32>
    %389 = arith.mulf %387, %388 : vector<2x64xf32>
    %390 = arith.mulf %383, %389 : vector<2x64xf32>
    %391 = vector.broadcast %370 : vector<1x64xf32> to vector<2x64xf32>
    %392 = arith.addf %390, %391 : vector<2x64xf32>
    %393 = arith.mulf %392, %392 : vector<2x64xf32>
    %cst_192 = arith.constant dense<0.000000e+00> : vector<2xf32>
    %394 = vector.multi_reduction <add>, %393, %cst_192 [1] : vector<2x64xf32> to vector<2xf32>
    %395 = vector.shape_cast %394 : vector<2xf32> to vector<2x1xf32>
    %396 = math.sqrt %395 : vector<2x1xf32>
    %cst_193 = arith.constant 9.99999996E-13 : f32
    %397 = vector.broadcast %cst_193 : f32 to vector<2x1xf32>
    %398 = arith.maximumf %396, %397 : vector<2x1xf32>
    %399 = vector.broadcast %398 : vector<2x1xf32> to vector<2x64xf32>
    %400 = arith.divf %392, %399 : vector<2x64xf32>
    %401 = tpu.concatenate %392, %400 in 1 : vector<2x64xf32>, vector<2x64xf32> -> vector<2x128xf32>
    %c0_194 = arith.constant 0 : index
    %c0_195 = arith.constant 0 : index
    %402 = vector.load %arg21[%c0_194, %c0_195] : memref<2x128xf32, #tpu.memory_space<vmem>>, vector<2x128xf32>
    tpu.vector_store %arg21[%c0_194, %c0_195], %401 {strides = array<i32>} : memref<2x128xf32, #tpu.memory_space<vmem>>, vector<2x128xf32>,
    return
  }
  func.func @transform_0(%arg0: i32) -> (i32, i32) {
    %c0_i32 = arith.constant 0 : i32
    %c0_i32_0 = arith.constant 0 : i32
    %c0_i32_1 = arith.constant 0 : i32
    return %c0_i32, %c0_i32_0 : i32, i32
  }
  func.func @transform_1(%arg0: i32) -> (i32, i32) {
    %c0_i32 = arith.constant 0 : i32
    %c0_i32_0 = arith.constant 0 : i32
    %c0_i32_1 = arith.constant 0 : i32
    return %c0_i32, %c0_i32_0 : i32, i32
  }
  func.func @transform_2(%arg0: i32) -> (i32, i32) {
    %c0_i32 = arith.constant 0 : i32
    %c0_i32_0 = arith.constant 0 : i32
    %c0_i32_1 = arith.constant 0 : i32
    return %c0_i32, %c0_i32_0 : i32, i32
  }
  func.func @transform_3(%arg0: i32) -> (i32, i32) {
    %c0_i32 = arith.constant 0 : i32
    %c0_i32_0 = arith.constant 0 : i32
    %c0_i32_1 = arith.constant 0 : i32
    return %c0_i32, %c0_i32_0 : i32, i32
  }
  func.func @transform_4(%arg0: i32) -> (i32, i32, i32) {
    %c0_i32 = arith.constant 0 : i32
    %c0_i32_0 = arith.constant 0 : i32
    %c0_i32_1 = arith.constant 0 : i32
    %c0_i32_2 = arith.constant 0 : i32
    return %c0_i32, %c0_i32_0, %c0_i32_1 : i32, i32, i32
  }
  func.func @transform_5(%arg0: i32) -> (i32, i32, i32) {
    %c0_i32 = arith.constant 0 : i32
    %c0_i32_0 = arith.constant 0 : i32
    %c0_i32_1 = arith.constant 0 : i32
    %c0_i32_2 = arith.constant 0 : i32
    return %c0_i32, %c0_i32_0, %c0_i32_1 : i32, i32, i32
  }
  func.func @transform_6(%arg0: i32) -> (i32, i32, i32) {
    %c0_i32 = arith.constant 0 : i32
    %c0_i32_0 = arith.constant 0 : i32
    %c0_i32_1 = arith.constant 0 : i32
    %c0_i32_2 = arith.constant 0 : i32
    return %c0_i32, %c0_i32_0, %c0_i32_1 : i32, i32, i32
  }
  func.func @transform_7(%arg0: i32) -> (i32, i32, i32) {
    %c0_i32 = arith.constant 0 : i32
    %c0_i32_0 = arith.constant 0 : i32
    %c0_i32_1 = arith.constant 0 : i32
    %c0_i32_2 = arith.constant 0 : i32
    return %c0_i32, %c0_i32_0, %c0_i32_1 : i32, i32, i32
  }
  func.func @transform_8(%arg0: i32) -> (i32, i32, i32) {
    %c0_i32 = arith.constant 0 : i32
    %c0_i32_0 = arith.constant 0 : i32
    %c0_i32_1 = arith.constant 0 : i32
    %c0_i32_2 = arith.constant 0 : i32
    return %c0_i32, %c0_i32_0, %c0_i32_1 : i32, i32, i32
  }
  func.func @transform_9(%arg0: i32) -> (i32, i32, i32) {
    %c0_i32 = arith.constant 0 : i32
    %c0_i32_0 = arith.constant 0 : i32
    %c0_i32_1 = arith.constant 0 : i32
    %c0_i32_2 = arith.constant 0 : i32
    return %c0_i32, %c0_i32_0, %c0_i32_1 : i32, i32, i32
  }
  func.func @transform_10(%arg0: i32) -> (i32, i32, i32) {
    %c0_i32 = arith.constant 0 : i32
    %c0_i32_0 = arith.constant 0 : i32
    %c0_i32_1 = arith.constant 0 : i32
    %c0_i32_2 = arith.constant 0 : i32
    return %c0_i32, %c0_i32_0, %c0_i32_1 : i32, i32, i32
  }
  func.func @transform_11(%arg0: i32) -> (i32, i32, i32) {
    %c0_i32 = arith.constant 0 : i32
    %c0_i32_0 = arith.constant 0 : i32
    %c0_i32_1 = arith.constant 0 : i32
    %c0_i32_2 = arith.constant 0 : i32
    return %c0_i32, %c0_i32_0, %c0_i32_1 : i32, i32, i32
  }
  func.func @transform_12(%arg0: i32) -> (i32, i32, i32) {
    %c0_i32 = arith.constant 0 : i32
    %c0_i32_0 = arith.constant 0 : i32
    %c0_i32_1 = arith.constant 0 : i32
    %c0_i32_2 = arith.constant 0 : i32
    return %c0_i32, %c0_i32_0, %c0_i32_1 : i32, i32, i32
  }
  func.func @transform_13(%arg0: i32) -> (i32, i32, i32) {
    %c0_i32 = arith.constant 0 : i32
    %c0_i32_0 = arith.constant 0 : i32
    %c0_i32_1 = arith.constant 0 : i32
    %c0_i32_2 = arith.constant 0 : i32
    return %c0_i32, %c0_i32_0, %c0_i32_1 : i32, i32, i32
  }
  func.func @transform_14(%arg0: i32) -> (i32, i32, i32) {
    %c0_i32 = arith.constant 0 : i32
    %c0_i32_0 = arith.constant 0 : i32
    %c0_i32_1 = arith.constant 0 : i32
    %c0_i32_2 = arith.constant 0 : i32
    return %c0_i32, %c0_i32_0, %c0_i32_1 : i32, i32, i32
  }
  func.func @transform_15(%arg0: i32) -> (i32, i32, i32) {
    %c0_i32 = arith.constant 0 : i32
    %c0_i32_0 = arith.constant 0 : i32
    %c0_i32_1 = arith.constant 0 : i32
    %c0_i32_2 = arith.constant 0 : i32
    return %c0_i32, %c0_i32_0, %c0_i32_1 : i32, i32, i32
  }
  func.func @transform_16(%arg0: i32) -> (i32, i32, i32) {
    %c0_i32 = arith.constant 0 : i32
    %c0_i32_0 = arith.constant 0 : i32
    %c0_i32_1 = arith.constant 0 : i32
    %c0_i32_2 = arith.constant 0 : i32
    return %c0_i32, %c0_i32_0, %c0_i32_1 : i32, i32, i32
  }
  func.func @transform_17(%arg0: i32) -> (i32, i32, i32) {
    %c0_i32 = arith.constant 0 : i32
    %c0_i32_0 = arith.constant 0 : i32
    %c0_i32_1 = arith.constant 0 : i32
    %c0_i32_2 = arith.constant 0 : i32
    return %c0_i32, %c0_i32_0, %c0_i32_1 : i32, i32, i32
  }
  func.func @transform_18(%arg0: i32) -> (i32, i32) {
    %c0_i32 = arith.constant 0 : i32
    %c0_i32_0 = arith.constant 0 : i32
    %c0_i32_1 = arith.constant 0 : i32
    return %c0_i32, %c0_i32_0 : i32, i32
  }
  func.func @transform_19(%arg0: i32) -> (i32, i32) {
    %c0_i32 = arith.constant 0 : i32
    %c0_i32_0 = arith.constant 0 : i32
    %c0_i32_1 = arith.constant 0 : i32
    return %c0_i32, %c0_i32_0 : i32, i32
  }
  func.func @transform_20(%arg0: i32) -> (i32, i32) {
    %c0_i32 = arith.constant 0 : i32
    %c0_i32_0 = arith.constant 0 : i32
    %c0_i32_1 = arith.constant 0 : i32
    return %c0_i32, %c0_i32_0 : i32, i32
  }
}

</mosaic_0001>

<bundles_post_ra>
// kernel: network_moco_forward.1
= control target key start
LH: loop header
LB: loop body
LE: loop exit
PB: predicated region body
PF: predicated region fallthrough
CT: control target
= control target key end

     0   :  { %vm83_vm0 = vcmask 392192   ;;  %vm145_vm1 = vcmask 523264   ;;  %v4637_v48 = vmov 64.0   ;;  %s4638_s25 = smov 64   ;;  %s6819_s26 = smov 16   ;;  %s6789_s2 = inlined_call_operand.vmem [shape: f32[48,64], index: 2, kind: input, shape index: {}]   ;;  %s6790_s0 = inlined_call_operand.vmem [shape: f32[48,48], index: 0, kind: input, shape index: {}]   ;;  %s6791_s1 = inlined_call_operand.vmem [shape: f32[48,64], index: 1, kind: input, shape index: {}]   ;;  %s6792_s4 = inlined_call_operand.vmem [shape: f32[2,1,64], index: 4, kind: input, shape index: {}]   ;;  %s6793_s5 = inlined_call_operand.vmem [shape: f32[2,1,64], index: 5, kind: input, shape index: {}]   ;;  %s6794_s6 = inlined_call_operand.vmem [shape: f32[2,64,192], index: 6, kind: input, shape index: {}]   ;;  %s6795_s7 = inlined_call_operand.vmem [shape: f32[2,1,192], index: 7, kind: input, shape index: {}]   ;;  %s6796_s3 = inlined_call_operand.vmem [shape: f32[48,48], index: 3, kind: input, shape index: {}]   ;;  %s6797_s8 = inlined_call_operand.vmem [shape: f32[2,64,64], index: 8, kind: input, shape index: {}]   ;;  %s6798_s9 = inlined_call_operand.vmem [shape: f32[2,1,64], index: 9, kind: input, shape index: {}]   ;;  %s6799_s10 = inlined_call_operand.vmem [shape: f32[2,1,64], index: 10, kind: input, shape index: {}]   ;;  %s6800_s11 = inlined_call_operand.vmem [shape: f32[2,1,64], index: 11, kind: input, shape index: {}]   ;;  %s6801_s12 = inlined_call_operand.vmem [shape: f32[2,1,64], index: 12, kind: input, shape index: {}]   ;;  %s6802_s13 = inlined_call_operand.vmem [shape: f32[2,64,256], index: 13, kind: input, shape index: {}]   ;;  %s6803_s15 = inlined_call_operand.vmem [shape: f32[2,256,64], index: 15, kind: input, shape index: {}]   ;;  %s6804_s16 = inlined_call_operand.vmem [shape: f32[2,1,64], index: 16, kind: input, shape index: {}]   ;;  %s6805_s14 = inlined_call_operand.vmem [shape: f32[2,1,256], index: 14, kind: input, shape index: {}]   ;;  %s6806_s17 = inlined_call_operand.vmem [shape: f32[2,1,64], index: 17, kind: input, shape index: {}]   ;;  %s6807_s18 = inlined_call_operand.vmem [shape: f32[1,64], index: 18, kind: input, shape index: {}]   ;;  %s6808_s19 = inlined_call_operand.vmem [shape: f32[1,64], index: 19, kind: input, shape index: {}]   ;;  %s6809_s20 = inlined_call_operand.vmem [shape: f32[2,128], index: 20, kind: output, shape index: {}]  }
   0x1   :  { %6823 = sst [smem:[#allocation3_spill]] %s6789_s2  ;;  %4335 = vrcp.f32 %v4637_v48  ;;  %v329_v52 = vld [vmem:[%s6794_s6 + $0x70] sm:$0xff]  ;;  %v327_v53 = vld [vmem:[%s6794_s6 + $0x60] sm:$0xff]  ;;  %s6821_s27 = smov 32  }
   0x2   :  { %6824 = sst [smem:[#allocation4_spill]] %s6790_s0  ;;  %4197 = vmatpush.msra.mxu3 %v329_v52  ;;  %363 = vmatpush.msra.mxu1 %v329_v52  ;;  %v325_v55 = vld [vmem:[%s6794_s6 + $0x50] sm:$0xff]  ;;  %v323_v56 = vld [vmem:[%s6794_s6 + $0x40] sm:$0xff]  ;;  %s6815_s28 = smov 80  }
   0x3   :  { %6825 = sst [smem:[#allocation5_spill]] %s6791_s1  ;;  %v321_v58 = vld [vmem:[%s6794_s6 + $0x30] sm:$0xff]  ;;  %v319_v60 = vld [vmem:[%s6794_s6 + $0x20] sm:$0xff]  ;;  %s6834_s22 = smov 16  }
   0x4   :  { %6826 = sst [smem:[#allocation6_spill]] %s6792_s4  ;;  %4198 = vmatpush.msra.mxu3 %v327_v53  ;;  %364 = vmatpush.msra.mxu1 %v327_v53  ;;  %v317_v62 = vld [vmem:[%s6794_s6 + $0x10] sm:$0xff]  ;;  %s4640_s4 = smov 112  }
   0x5   :  { %6827 = sst [smem:[#allocation7_spill]] %s6793_s5  ;;  %s6817_s5 = smov 96  }
   0x6   :  { %s6828_s23 = sld [smem:[#allocation3_spill]]  ;;  %4199 = vmatpush.msra.mxu3 %v325_v55  ;;  %365 = vmatpush.msra.mxu1 %v325_v55  ;;  %s6835_s24 = smov 96  }
   0x7   :  { %s6829_s0 = sld [smem:[#allocation4_spill]]  ;;  %v4336_v49 = vpop.eup %4335  ;;  %s6836_s1 = smov 80  }
   0x8   :  { %s6830_s2 = sld [smem:[#allocation5_spill]]  ;;  %v165_v50 = vmul.f32 64.0, %v4336_v49  ;;  %4200 = vmatpush.msra.mxu3 %v323_v56  ;;  %366 = vmatpush.msra.mxu1 %v323_v56  ;;  %vm169_vm2 = vweird.f32 %v4336_v49 }
   0xa   :  { %v166_v51 = vsub.f32 1.0, %v165_v50  ;;  %4201 = vmatpush.msra.mxu3 %v321_v58  ;;  %367 = vmatpush.msra.mxu1 %v321_v58 }
   0xc   :  { %v76_v0 = vld [vmem:[%s6828_s23 + $0x28] sm:$0xff]  ;;  %v75_v1 = vld [vmem:[%s6828_s23 + $0x20] sm:$0xff]  ;;  %v74_v2 = vld [vmem:[%s6828_s23 + $0x18] sm:$0xff]  ;;  %v167_v54 = vmul.f32 %v4336_v49, %v166_v51  ;;  %4202 = vmatpush.msra.mxu3 %v319_v60  ;;  %368 = vmatpush.msra.mxu1 %v319_v60 }
   0xd   :  { %112 = vmatpush.msra.mxu0 %v76_v0  ;;  %v73_v3 = vld [vmem:[%s6828_s23 + $0x10] sm:$0xff]  ;;  %v72_v4 = vld [vmem:[%s6828_s23 + $0x8] sm:$0xff]  ;;  %v71_v5 = vld [vmem:[%s6828_s23] sm:$0xff]  ;;  %s4639_s23 = smov 48  }
   0xe   :  { %v65_v6 = vld [vmem:[%s6829_s0] sm:$0xff]  ;;  %v66_v7 = vld [vmem:[%s6829_s0 + $0x8] sm:$0xff]  ;;  %v67_v8 = vld [vmem:[%s6829_s0 + $0x10] sm:$0xff]  ;;  %v168_v57 = vadd.f32 %v4336_v49, %v167_v54  ;;  %4203 = vmatpush.msra.mxu3 %v317_v62  ;;  %369 = vmatpush.msra.mxu1 %v317_v62 }
   0xf   :  { %113 = vmatpush.msra.mxu0 %v75_v1  ;;  %v68_v9 = vld [vmem:[%s6829_s0 + $0x18] sm:$0xff]  ;;  %v69_v10 = vld [vmem:[%s6829_s0 + $0x20] sm:$0xff]  ;;  %v70_v11 = vld [vmem:[%s6829_s0 + $0x28] sm:$0xff]  ;;  %s6832_s0 = sld [smem:[#allocation7_spill]] }
  0x10   :  { %v80_v15 = vld [vmem:[%s6830_s2 + $0x18] sm:$0xff]  ;;  %v81_v19 = vld [vmem:[%s6830_s2 + $0x20] sm:$0xff]  ;;  %v82_v25 = vld [vmem:[%s6830_s2 + $0x28] sm:$0xff]  ;;  %v4870_v61 = vsel %vm169_vm2, %v4336_v49, %v168_v57 }
  0x11   :  { %114 = vmatpush.msra.mxu0 %v74_v2  ;;  %v77_v27 = vld [vmem:[%s6830_s2] sm:$0xff]  ;;  %v78_v30 = vld [vmem:[%s6830_s2 + $0x8] sm:$0xff]  ;;  %v79_v41 = vld [vmem:[%s6830_s2 + $0x10] sm:$0xff]  ;;  %s6831_s2 = sld [smem:[#allocation6_spill]] }
  0x12   :  { %v315_v0 = vld [vmem:[%s6794_s6] sm:$0xff] }
  0x13   :  { %115 = vmatpush.msra.mxu0 %v73_v3  ;;  %4204 = vmatpush.msra.mxu3 %v315_v0 }
  0x14   :  { %370 = vmatpush.msra.mxu1 %v315_v0 }
  0x15   :  { %116 = vmatpush.msra.mxu0 %v72_v4  ;;  %v4944_v0 = vld [vmem:[%s6832_s0] ss:$0 sm:$0xff] }
  0x17   :  { %117 = vmatpush.msra.mxu0 %v71_v5  ;;  %v330_v5 = vld [vmem:[%s6794_s6 + $0x78] sm:$0xff] }
  0x18   :  { %3905 = vmatmul.msk.f32.vlgmr.msra.gmra.mxu0 %vm83_vm0, %v65_v6  ;;  %398 = vmatpush.msra.mxu2 %v330_v5 }
  0x20   :  { %3906 = vmatmul.msk.f32.gmra.mxu0 %vm83_vm0, %v66_v7  ;;  %v328_v7 = vld [vmem:[%s6794_s6 + $0x68] sm:$0xff] }
  0x21   :  { %399 = vmatpush.msra.mxu2 %v328_v7 }
  0x28   :  { %3907 = vmatmul.msk.f32.gmra.mxu0 %vm83_vm0, %v67_v8 }
  0x30   :  { %3908 = vmatmul.msk.f32.gmra.mxu0 %vm83_vm0, %v68_v9 }
  0x38   :  { %3909 = vmatmul.msk.f32.gmra.mxu0 %vm83_vm0, %v69_v10  ;;  %v326_v10 = vld [vmem:[%s6794_s6 + $0x58] sm:$0xff] }
  0x39   :  { %400 = vmatpush.msra.mxu2 %v326_v10 }
  0x40   :  { %3910 = vmatmul.msk.f32.gmra.mxu0 %vm83_vm0, %v70_v11 }
  0x95   :  { %v119_v12 = vpop.f32.mrf.mxu0 }
  0x96   :  { %v4822_v31 = vadd.f32 %v119_v12, %v77_v27 }
  0x98   :  { %v177_v37 = vmul.f32 %v4822_v31, %v4822_v31  ;;  %v146_v40 = vsel %vm145_vm1, %v4822_v31, 0.0 }
  0x9a   :  { %v183_v39 = vsel %vm145_vm1, %v177_v37, 0.0  ;;  %v316_v37 = vld [vmem:[%s6794_s6 + $0x8] sm:$0xff] }
  0x9d   :  { %v122_v13 = vpop.f32.mrf.mxu0 }
  0x9e   :  { %v4829_v35 = vadd.f32 %v122_v13, %v78_v30  ;;  %v324_v13 = vld [vmem:[%s6794_s6 + $0x48] sm:$0xff]  ;;  %v318_v30 = vld [vmem:[%s6794_s6 + $0x18] sm:$0xff] }
  0x9f   :  { %401 = vmatpush.msra.mxu2 %v324_v13 }
  0xa0   :  { %v178_v38 = vmul.f32 %v4829_v35, %v4829_v35  ;;  %v149_v45 = vsel %vm145_vm1, %v4829_v35, 0.0 }
  0xa2   :  { %v186_v42 = vsel %vm145_vm1, %v178_v38, 0.0 }
  0xa5   :  { %v125_v14 = vpop.f32.mrf.mxu0 }
  0xa6   :  { %v4843_v43 = vadd.f32 %v125_v14, %v79_v41 }
  0xa8   :  { %v152_v44 = vsel %vm145_vm1, %v4843_v43, 0.0  ;;  %v179_v46 = vmul.f32 %v4843_v43, %v4843_v43 }
  0xaa   :  { %v189_v47 = vsel %vm145_vm1, %v179_v46, 0.0 }
  0xad   :  { %v128_v16 = vpop.f32.mrf.mxu0 }
  0xae   :  { %v4795_v17 = vadd.f32 %v128_v16, %v80_v15 }
  0xb0   :  { %v155_v18 = vsel %vm145_vm1, %v4795_v17, 0.0  ;;  %v180_v20 = vmul.f32 %v4795_v17, %v4795_v17 }
  0xb1   :  { %156 = vadd.xlane.f32.xlu0 %v155_v18 }
  0xb2   :  { %v192_v24 = vsel %vm145_vm1, %v180_v20, 0.0 }
  0xb5   :  { %v131_v21 = vpop.f32.mrf.mxu0 }
  0xb6   :  { %v4804_v22 = vadd.f32 %v131_v21, %v81_v19  ;;  %v322_v19 = vld [vmem:[%s6794_s6 + $0x38] sm:$0xff] }
  0xb7   :  { %402 = vmatpush.msra.mxu2 %v322_v19 }
  0xb8   :  { %v158_v23 = vsel %vm145_vm1, %v4804_v22, 0.0  ;;  %v181_v26 = vmul.f32 %v4804_v22, %v4804_v22 }
  0xb9   :  { %159 = vadd.xlane.f32.xlu1 %v158_v23  ;;  %193 = vadd.xlane.f32.xlu0 %v192_v24  ;;  %v320_v24 = vld [vmem:[%s6794_s6 + $0x28] sm:$0xff] }
  0xba   :  { %v195_v33 = vsel %vm145_vm1, %v181_v26, 0.0  ;;  %403 = vmatpush.msra.mxu2 %v320_v24 }
  0xbc   :  { %404 = vmatpush.msra.mxu2 %v318_v30 }
  0xbd   :  { %v134_v28 = vpop.f32.mrf.mxu0 }
  0xbe   :  { %v4817_v29 = vadd.f32 %v134_v28, %v82_v25  ;;  %405 = vmatpush.msra.mxu2 %v316_v37 }
  0xc0   :  { %v161_v32 = vsel %vm145_vm1, %v4817_v29, 0.0  ;;  %v182_v34 = vmul.f32 %v4817_v29, %v4817_v29 }
  0xc1   :  { %162 = vadd.xlane.f32.xlu2 %v161_v32  ;;  %196 = vadd.xlane.f32.xlu1 %v195_v33 }
  0xc2   :  { %v198_v36 = vsel %vm145_vm1, %v182_v34, 0.0 }
  0xc3   :  { %199 = vadd.xlane.f32.xlu0 %v198_v36 }
  0xc9   :  { %184 = vadd.xlane.f32.xlu1 %v183_v39  ;;  %147 = vadd.xlane.f32.xlu2 %v146_v40 }
  0xcb   :  { %187 = vadd.xlane.f32.xlu0 %v186_v42 }
  0xd1   :  { %153 = vadd.xlane.f32.xlu1 %v152_v44  ;;  %150 = vadd.xlane.f32.xlu2 %v149_v45 }
  0xd9   :  { %190 = vadd.xlane.f32.xlu2 %v189_v47  ;;  %v4932_v47 = vld [vmem:[%s6831_s2] ss:$0 sm:$0xff] }
 0x124   :  { %v157_v59 = vpop.xlane.xlu0 %156 }
 0x125   :  { %v4876_v63 = vmul.f32 %v4870_v61, %v157_v59 }
 0x127   :  { %v210_v3 = vmul.f32 %v4876_v63, %v4876_v63  ;;  %v222_v57 = vsub.f32 %v4795_v17, %v4876_v63 }
 0x12c   :  { %v160_v1 = vpop.xlane.xlu1 %159  ;;  %v194_v2 = vpop.xlane.xlu0 %193 }
 0x12d   :  { %v204_v4 = vmul.f32 %v194_v2, %v4870_v61  ;;  %v4891_v8 = vmul.f32 %v4870_v61, %v160_v1 }
 0x12f   :  { %v216_v6 = vsub.f32 %v204_v4, %v210_v3  ;;  %v211_v14 = vmul.f32 %v4891_v8, %v4891_v8 }
 0x131   :  { %v228_v9 = vadd.f32 1e-06, %v216_v6 }
 0x133   :  { %4337 = vrsqrt.f32 %v228_v9  ;;  %vm267_vm4 = vweird.f32 %v228_v9 }
 0x134   :  { %v163_v11 = vpop.xlane.xlu2 %162  ;;  %v197_v12 = vpop.xlane.xlu1 %196 }
 0x135   :  { %v4902_v15 = vmul.f32 %v4870_v61, %v163_v11  ;;  %v205_v16 = vmul.f32 %v197_v12, %v4870_v61  ;;  %v223_v12 = vsub.f32 %v4804_v22, %v4891_v8 }
 0x136   :  { %v200_v18 = vpop.xlane.xlu0 %199 }
 0x137   :  { %v212_v20 = vmul.f32 %v4902_v15, %v4902_v15  ;;  %v217_v21 = vsub.f32 %v205_v16, %v211_v14  ;;  %v206_v23 = vmul.f32 %v200_v18, %v4870_v61 }
 0x139   :  { %v4338_v25 = vpop.eup %4337  ;;  %v229_v26 = vadd.f32 1e-06, %v217_v21  ;;  %v218_v27 = vsub.f32 %v206_v23, %v212_v20 }
 0x13a   :  { %v262_v28 = vmul.f32 %v4338_v25, %v228_v9  ;;  %vm268_vm3 = vweird.f32 %v4338_v25 }
 0x13b   :  { %4339 = vrsqrt.f32 %v229_v26  ;;  %v4917_v32 = vadd.f32 1e-06, %v218_v27  ;;  %vm269_vm5 = vmor %vm267_vm4, %vm268_vm3  ;;  %vm277_vm7 = vweird.f32 %v229_v26 }
 0x13c   :  { %v263_v33 = vmul.f32 %v4338_v25, %v262_v28  ;;  %v185_v34 = vpop.xlane.xlu1 %184  ;;  %v148_v36 = vpop.xlane.xlu2 %147 }
 0x13d   :  { %4341 = vrsqrt.f32 %v4917_v32  ;;  %v4924_v38 = vmul.f32 %v4870_v61, %v148_v36  ;;  %v201_v40 = vmul.f32 %v185_v34, %v4870_v61  ;;  %vm287_vm10 = vweird.f32 %v4917_v32 }
 0x13e   :  { %v264_v39 = vmul.f32 0.5, %v263_v33  ;;  %v188_v53 = vpop.xlane.xlu0 %187  ;;  %v224_v36 = vsub.f32 %v4817_v29, %v4902_v15 }
 0x13f   :  { %v207_v41 = vmul.f32 %v4924_v38, %v4924_v38  ;;  %v202_v1 = vmul.f32 %v188_v53, %v4870_v61 }
 0x140   :  { %v265_v42 = vsub.f32 1.5, %v264_v39 }
 0x141   :  { %v4340_v44 = vpop.eup %4339  ;;  %v213_v45 = vsub.f32 %v201_v40, %v207_v41 }
 0x142   :  { %v272_v46 = vmul.f32 %v4340_v44, %v229_v26  ;;  %v266_v48 = vmul.f32 %v4338_v25, %v265_v42  ;;  %vm278_vm6 = vweird.f32 %v4340_v44 }
 0x143   :  { %v4342_v49 = vpop.eup %4341  ;;  %v225_v50 = vadd.f32 1e-06, %v213_v45  ;;  %vm279_vm8 = vmor %vm277_vm7, %vm278_vm6  ;;  %vm449_vm7 = vcmask 130048  }
 0x144   :  { %v273_v51 = vmul.f32 %v4340_v44, %v272_v46  ;;  %v282_v52 = vmul.f32 %v4342_v49, %v4917_v32  ;;  %v151_v54 = vpop.xlane.xlu2 %150  ;;  %v270_v55 = vsel %vm269_vm5, %v4338_v25, %v266_v48  ;;  %v154_v60 = vpop.xlane.xlu1 %153  ;;  %vm288_vm9 = vweird.f32 %v4342_v49 }
 0x145   :  { %4343 = vrsqrt.f32 %v225_v50  ;;  %v4936_v56 = vmul.f32 %v4870_v61, %v151_v54  ;;  %v297_v62 = vmul.f32 %v4932_v47, %v270_v55  ;;  %v4950_v63 = vmul.f32 %v4870_v61, %v154_v60  ;;  %vm289_vm11 = vmor %vm287_vm10, %vm288_vm9 }
 0x146   :  { %v274_v58 = vmul.f32 0.5, %v273_v51  ;;  %v283_v59 = vmul.f32 %v4342_v49, %v282_v52  ;;  %vm237_vm13 = vweird.f32 %v225_v50  ;;  %vm1141_vm9 = vcmask 392448  }
 0x147   :  { %v208_v2 = vmul.f32 %v4936_v56, %v4936_v56  ;;  %v303_v5 = vmul.f32 %v297_v62, %v222_v57  ;;  %v209_v20 = vmul.f32 %v4950_v63, %v4950_v63  ;;  %v220_v57 = vsub.f32 %v4829_v35, %v4936_v56 }
 0x148   :  { %v275_v3 = vsub.f32 1.5, %v274_v58  ;;  %v284_v4 = vmul.f32 0.5, %v283_v59  ;;  %vm1392_vm10 = vcmask 523648  }
 0x149   :  { %v214_v6 = vsub.f32 %v202_v1, %v208_v2  ;;  %v4953_v9 = vadd.f32 %v4944_v0, %v303_v5 }
 0x14a   :  { %v285_v7 = vsub.f32 1.5, %v284_v4  ;;  %v276_v10 = vmul.f32 %v4340_v44, %v275_v3  ;;  %v221_v3 = vsub.f32 %v4843_v43, %v4950_v63  ;;  %v331_v63 = vld [vmem:[%s6795_s7] sm:$0x3] }
 0x14b   :  { %v4344_v11 = vpop.eup %4343  ;;  %v226_v13 = vadd.f32 1e-06, %v214_v6  ;;  %3914 = vmatmul.msk.f32.vlgmr.msra.gmra.mxu3 %vm145_vm1, %v4953_v9  ;;  %v333_v6 = vperm.slane %v331_v63, 0 }
 0x14c   :  { %v232_v14 = vmul.f32 %v4344_v11, %v225_v50  ;;  %v191_v16 = vpop.xlane.xlu2 %190  ;;  %v280_v18 = vsel %vm279_vm8, %v4340_v44, %v276_v10  ;;  %v286_v19 = vmul.f32 %v4342_v49, %v285_v7  ;;  %vm238_vm12 = vweird.f32 %v4344_v11 }
 0x14d   :  { %4345 = vrsqrt.f32 %v226_v13  ;;  %v203_v21 = vmul.f32 %v191_v16, %v4870_v61  ;;  %v298_v8 = vmul.f32 %v4932_v47, %v280_v18  ;;  %vm239_vm14 = vmor %vm237_vm13, %vm238_vm12  ;;  %v219_v44 = vsub.f32 %v4822_v31, %v4924_v38 }
 0x14e   :  { %v233_v23 = vmul.f32 %v4344_v11, %v232_v14  ;;  %v290_v26 = vsel %vm289_vm11, %v4342_v49, %v286_v19  ;;  %vm247_vm2 = vweird.f32 %v226_v13  ;;  %v334_v16 = vperm.slane %v331_v63, 1 }
 0x14f   :  { %v215_v24 = vsub.f32 %v203_v21, %v209_v20  ;;  %v304_v25 = vmul.f32 %v298_v8, %v223_v12  ;;  %v299_v33 = vmul.f32 %v4932_v47, %v290_v26  ;;  %vm890_vm8 = vcmask 261248  }
 0x150   :  { %v234_v27 = vmul.f32 0.5, %v233_v23 }
 0x151   :  { %v227_v28 = vadd.f32 1e-06, %v215_v24  ;;  %v313_v30 = vadd.f32 %v4944_v0, %v304_v25  ;;  %v305_v42 = vmul.f32 %v299_v33, %v224_v36 }
 0x152   :  { %v235_v32 = vsub.f32 1.5, %v234_v27 }
 0x153   :  { %v4346_v34 = vpop.eup %4345  ;;  %4347 = vrsqrt.f32 %v227_v28  ;;  %3915 = vmatmul.msk.f32.gmra.mxu3 %vm145_vm1, %v313_v30  ;;  %v314_v50 = vadd.f32 %v4944_v0, %v305_v42  ;;  %vm257_vm5 = vweird.f32 %v227_v28 }
 0x154   :  { %v236_v37 = vmul.f32 %v4344_v11, %v235_v32  ;;  %v242_v39 = vmul.f32 %v4346_v34, %v226_v13  ;;  %vm248_vm15 = vweird.f32 %v4346_v34 }
 0x155   :  { %vm249_vm3 = vmor %vm247_vm2, %vm248_vm15 }
 0x156   :  { %v240_v40 = vsel %vm239_vm14, %v4344_v11, %v236_v37  ;;  %v243_v41 = vmul.f32 %v4346_v34, %v242_v39 }
 0x157   :  { %v294_v45 = vmul.f32 %v4932_v47, %v240_v40 }
 0x158   :  { %v244_v46 = vmul.f32 0.5, %v243_v41 }
 0x159   :  { %v4348_v48 = vpop.eup %4347  ;;  %v300_v49 = vmul.f32 %v294_v45, %v219_v44 }
 0x15a   :  { %v245_v51 = vsub.f32 1.5, %v244_v46  ;;  %v252_v15 = vmul.f32 %v4348_v48, %v227_v28  ;;  %vm258_vm4 = vweird.f32 %v4348_v48 }
 0x15b   :  { %v309_v52 = vadd.f32 %v4944_v0, %v300_v49  ;;  %3916 = vmatmul.msk.f32.gmra.mxu3 %vm145_vm1, %v314_v50  ;;  %vm259_vm6 = vmor %vm257_vm5, %vm258_vm4 }
 0x15c   :  { %v246_v53 = vmul.f32 %v4346_v34, %v245_v51  ;;  %v253_v54 = vmul.f32 %v4348_v48, %v252_v15 }
 0x15d   :  { %3911 = vmatmul.msk.f32.vlgmr.msra.gmra.mxu1 %vm145_vm1, %v309_v52  ;;  %3917 = vmatmul.msk.f32.vlgmr.msra.gmra.mxu2 %vm145_vm1, %v309_v52 }
 0x15e   :  { %v250_v38 = vsel %vm249_vm3, %v4346_v34, %v246_v53  ;;  %v254_v55 = vmul.f32 0.5, %v253_v54 }
 0x15f   :  { %v295_v58 = vmul.f32 %v4932_v47, %v250_v38 }
 0x160   :  { %v255_v59 = vsub.f32 1.5, %v254_v55 }
 0x161   :  { %v301_v60 = vmul.f32 %v295_v58, %v220_v57 }
 0x162   :  { %v256_v62 = vmul.f32 %v4348_v48, %v255_v59 }
 0x163   :  { %v310_v1 = vadd.f32 %v4944_v0, %v301_v60 }
 0x164   :  { %v260_v2 = vsel %vm259_vm6, %v4348_v48, %v256_v62 }
 0x165   :  { %3912 = vmatmul.msk.f32.gmra.mxu1 %vm145_vm1, %v310_v1  ;;  %3918 = vmatmul.msk.f32.gmra.mxu2 %vm145_vm1, %v310_v1  ;;  %v296_v56 = vmul.f32 %v4932_v47, %v260_v2 }
 0x167   :  { %v302_v4 = vmul.f32 %v296_v56, %v221_v3 }
 0x169   :  { %v311_v5 = vadd.f32 %v4944_v0, %v302_v4 }
 0x16d   :  { %3913 = vmatmul.msk.f32.gmra.mxu1 %vm145_vm1, %v311_v5  ;;  %3919 = vmatmul.msk.f32.gmra.mxu2 %vm145_vm1, %v311_v5 }
 0x175   :  { %3920 = vmatmul.msk.f32.gmra.mxu2 %vm145_vm1, %v4953_v9 }
 0x17d   :  { %3921 = vmatmul.msk.f32.gmra.mxu2 %vm145_vm1, %v313_v30 }
 0x185   :  { %3922 = vmatmul.msk.f32.gmra.mxu2 %vm145_vm1, %v314_v50 }
 0x1ce   :  { %v381_v47 = vpop.f32.mrf.mxu3 }
 0x1cf   :  { %v4996_v7 = vadd.f32 %v381_v47, %v333_v6 }
 0x1d1   :  { %443 = vrot.lane.b32.xlu2 %v4996_v7, %s4638_s25  ;;  %v5029_v39 = vmul.f32 0.25, %v4996_v7 }
 0x1d6   :  { %v384_v0 = vpop.f32.mrf.mxu3 }
 0x1d7   :  { %v385_v10 = vadd.f32 %v384_v0, %v333_v6 }
 0x1d9   :  { %660 = vrot.lane.b32.xlu0 %v385_v10, %s4639_s23  ;;  %445 = vrot.lane.b32.xlu2 %v385_v10, %s4638_s25  ;;  %v5034_v41 = vmul.f32 0.25, %v385_v10 }
 0x1da   :  { %v372_v9 = vpop.f32.mrf.mxu1 }
 0x1db   :  { %v373_v26 = vadd.f32 %v372_v9, %v333_v6 }
 0x1dd   :  { %v5014_v32 = vmul.f32 0.25, %v373_v26 }
 0x1de   :  { %v387_v11 = vpop.f32.mrf.mxu3 }
 0x1df   :  { %v388_v12 = vadd.f32 %v387_v11, %v333_v6 }
 0x1e0   :  { %v407_v13 = vpop.f32.mrf.mxu2 }
 0x1e1   :  { %447 = vrot.lane.b32.xlu0 %v388_v12, %s4638_s25  ;;  %662 = vrot.lane.b32.xlu1 %v388_v12, %s4639_s23  ;;  %v408_v19 = vadd.f32 %v407_v13, %v334_v16  ;;  %v5051_v46 = vmul.f32 0.25, %v388_v12 }
 0x1e2   :  { %v375_v14 = vpop.f32.mrf.mxu1 }
 0x1e3   :  { %v376_v24 = vadd.f32 %v375_v14, %v333_v6 }
 0x1e5   :  { %v5016_v33 = vmul.f32 0.25, %v376_v24 }
 0x1e8   :  { %v410_v18 = vpop.f32.mrf.mxu2 }
 0x1e9   :  { %v411_v20 = vadd.f32 %v410_v18, %v334_v16  ;;  %658 = vrot.lane.b32.xlu1 %v4996_v7, %s4639_s23 }
 0x1ea   :  { %v378_v21 = vpop.f32.mrf.mxu1 }
 0x1eb   :  { %v379_v8 = vadd.f32 %v378_v21, %v333_v6  ;;  %v5006_v23 = vpack.i.bf16 %v408_v19, %v411_v20 }
 0x1ed   :  { %656 = vrot.lane.b32.xlu2 %v379_v8, %s4639_s23  ;;  %441 = vrot.lane.b32.xlu0 %v379_v8, %s4638_s25  ;;  %v5024_v37 = vmul.f32 0.25, %v379_v8 }
 0x1f0   :  { %v413_v25 = vpop.f32.mrf.mxu2 }
 0x1f1   :  { %439 = vrot.lane.b32.xlu1 %v376_v24, %s4638_s25  ;;  %v414_v28 = vadd.f32 %v413_v25, %v334_v16 }
 0x1f5   :  { %437 = vrot.lane.b32.xlu2 %v373_v26, %s4638_s25  ;;  %654 = vrot.lane.b32.xlu0 %v376_v24, %s4639_s23 }
 0x1f8   :  { %v416_v27 = vpop.f32.mrf.mxu2 }
 0x1f9   :  { %v417_v30 = vadd.f32 %v416_v27, %v334_v16  ;;  %652 = vrot.lane.b32.xlu1 %v373_v26, %s4639_s23 }
 0x1fb   :  { %v5018_v34 = vpack.i.bf16 %v414_v28, %v417_v30 }
 0x1fd   :  { %642 = vrot.lane.b32.xlu2 %v5016_v33, %s4640_s4  ;;  %640 = vrot.lane.b32.xlu0 %v5014_v32, %s4640_s4 }
 0x200   :  { %v419_v36 = vpop.f32.mrf.mxu2 }
 0x201   :  { %644 = vrot.lane.b32.xlu1 %v5024_v37, %s4640_s4  ;;  %v420_v42 = vadd.f32 %v419_v36, %v334_v16 }
 0x205   :  { %1168 = vrot.lane.b32.xlu2 %v385_v10, %s6819_s26  ;;  %646 = vrot.lane.b32.xlu0 %v5029_v39, %s4640_s4 }
 0x208   :  { %v422_v40 = vpop.f32.mrf.mxu2 }
 0x209   :  { %v423_v44 = vadd.f32 %v422_v40, %v334_v16  ;;  %648 = vrot.lane.b32.xlu1 %v5034_v41, %s4640_s4 }
 0x20b   :  { %609 = vmatpush.msrb.mxu0 %v423_v44  ;;  %v5038_v45 = vpack.i.bf16 %v420_v42, %v423_v44 }
 0x20d   :  { %610 = vmatpush.msrb.mxu0 %v420_v42  ;;  %1166 = vrot.lane.b32.xlu2 %v4996_v7, %s6819_s26 }
 0x20e   :  { %917 = vrot.lane.b32.xlu0 %v385_v10, %s6821_s27 }
 0x20f   :  { %611 = vmatpush.msrb.mxu0 %v417_v30 }
 0x211   :  { %612 = vmatpush.msrb.mxu0 %v414_v28  ;;  %1170 = vrot.lane.b32.xlu1 %v388_v12, %s6819_s26 }
 0x213   :  { %613 = vmatpush.msrb.mxu0 %v411_v20 }
 0x215   :  { %614 = vmatpush.msrb.mxu0 %v408_v19  ;;  %919 = vrot.lane.b32.xlu2 %v388_v12, %s6821_s27 }
 0x216   :  { %915 = vrot.lane.b32.xlu0 %v4996_v7, %s6821_s27 }
 0x219   :  { %913 = vrot.lane.b32.xlu1 %v379_v8, %s6821_s27 }
 0x21d   :  { %909 = vrot.lane.b32.xlu2 %v373_v26, %s6821_s27 }
 0x21e   :  { %1164 = vrot.lane.b32.xlu0 %v379_v8, %s6819_s26 }
 0x221   :  { %911 = vrot.lane.b32.xlu1 %v376_v24, %s6821_s27 }
 0x225   :  { %650 = vrot.lane.b32.xlu2 %v5051_v46, %s4640_s4 }
 0x226   :  { %1162 = vrot.lane.b32.xlu0 %v376_v24, %s6819_s26 }
 0x229   :  { %1160 = vrot.lane.b32.xlu1 %v373_v26, %s6819_s26 }
 0x22b   :  { %v444_v48 = vpop.permute.xlu2 %443 }
 0x22d   :  { %1148 = vrot.lane.b32.xlu2 %v5014_v32, %s6815_s28 }
 0x22e   :  { %897 = vrot.lane.b32.xlu0 %v5014_v32, %s6817_s5 }
 0x231   :  { %899 = vrot.lane.b32.xlu1 %v5016_v33, %s6817_s5 }
 0x233   :  { %v446_v49 = vpop.permute.xlu2 %445 }
 0x235   :  { %901 = vrot.lane.b32.xlu2 %v5024_v37, %s6817_s5 }
 0x236   :  { %1150 = vrot.lane.b32.xlu0 %v5016_v33, %s6815_s28 }
 0x239   :  { %1152 = vrot.lane.b32.xlu1 %v5024_v37, %s6815_s28 }
 0x23d   :  { %1154 = vrot.lane.b32.xlu2 %v5029_v39, %s6815_s28 }
 0x23e   :  { %903 = vrot.lane.b32.xlu0 %v5029_v39, %s6817_s5 }
 0x241   :  { %905 = vrot.lane.b32.xlu1 %v5034_v41, %s6817_s5 }
 0x245   :  { %907 = vrot.lane.b32.xlu2 %v5051_v46, %s6817_s5 }
 0x246   :  { %1156 = vrot.lane.b32.xlu0 %v5034_v41, %s6815_s28 }
 0x247   :  { %v657_v51 = vpop.permute.xlu2 %656 }
 0x249   :  { %1158 = vrot.lane.b32.xlu1 %v5051_v46, %s6815_s28 }
 0x24b   :  { %v661_v15 = vpop.permute.xlu0 %660 }
 0x24d   :  { %4228 = vrot.lane.b32.xlu2 %v5038_v45, %s4640_s4 }
 0x24e   :  { %4243 = vrot.lane.b32.xlu0 %v5038_v45, %s6817_s5 }
 0x24f   :  { %v438_v50 = vpop.permute.xlu2 %437 }
 0x251   :  { %4233 = vrot.lane.b32.xlu1 %v5018_v34, %s4640_s4 }
 0x253   :  { %v448_v52 = vpop.permute.xlu0 %447  ;;  %v663_v53 = vpop.permute.xlu1 %662 }
 0x254   :  { %3923 = vmatpush.xpose.msk.msrb.mxu3 %vm449_vm7, %v448_v52  ;;  %3941 = vmatpush.xpose.msk.msrb.mxu1 %vm449_vm7, %v663_v53 }
 0x255   :  { %4238 = vrot.lane.b32.xlu2 %v5006_v23, %s4640_s4 }
 0x257   :  { %v643_v54 = vpop.permute.xlu2 %642 }
 0x258   :  { %3924 = vmatpush.xpose.msk.msrb.mxu3 %vm449_vm7, %v446_v49  ;;  %3942 = vmatpush.xpose.msk.msrb.mxu1 %vm449_vm7, %v661_v15 }
 0x25b   :  { %v659_v38 = vpop.permute.xlu1 %658 }
 0x25c   :  { %3925 = vmatpush.xpose.msk.msrb.mxu3 %vm449_vm7, %v444_v48  ;;  %3943 = vmatpush.xpose.msk.msrb.mxu1 %vm449_vm7, %v659_v38  ;;  %v137_v48 = vld [vmem:[%s6796_s3] sm:$0xff] }
 0x25f   :  { %v442_v55 = vpop.permute.xlu0 %441  ;;  %v1169_v57 = vpop.permute.xlu2 %1168 }
 0x260   :  { %3926 = vmatpush.xpose.msk.msrb.mxu3 %vm449_vm7, %v442_v55  ;;  %3944 = vmatpush.xpose.msk.msrb.mxu1 %vm449_vm7, %v657_v51 }
 0x263   :  { %v440_v58 = vpop.permute.xlu1 %439 }
 0x264   :  { %3927 = vmatpush.xpose.msk.msrb.mxu3 %vm449_vm7, %v440_v58 }
 0x267   :  { %v655_v59 = vpop.permute.xlu0 %654  ;;  %v1167_v60 = vpop.permute.xlu2 %1166 }
 0x268   :  { %3945 = vmatpush.xpose.msk.msrb.mxu1 %vm449_vm7, %v655_v59  ;;  %3928 = vmatpush.xpose.msk.msrb.mxu3 %vm449_vm7, %v438_v50  ;;  %v139_v59 = vld [vmem:[%s6796_s3 + $0x10] sm:$0xff] }
 0x26b   :  { %v653_v62 = vpop.permute.xlu1 %652  ;;  %3929 = vmatmul.msk.f32.vlgmr.msrb.gmra.mxu3 %vm449_vm7, %v5014_v32 }
 0x26c   :  { %3946 = vmatpush.xpose.msk.msrb.mxu1 %vm449_vm7, %v653_v62 }
 0x26f   :  { %v641_v1 = vpop.permute.xlu0 %640  ;;  %v920_v2 = vpop.permute.xlu2 %919 }
 0x270   :  { %3947 = vmatmul.msk.f32.vlgmr.msrb.gmra.mxu1 %vm449_vm7, %v641_v1  ;;  %3959 = vmatpush.xpose.msk.msra.mxu3 %vm449_vm7, %v920_v2 }
 0x273   :  { %v645_v3 = vpop.permute.xlu1 %644  ;;  %3930 = vmatmul.msk.f32.gmra.mxu3 %vm449_vm7, %v5016_v33 }
 0x277   :  { %v647_v56 = vpop.permute.xlu0 %646  ;;  %v910_v4 = vpop.permute.xlu2 %909 }
 0x278   :  { %3948 = vmatmul.msk.f32.gmra.mxu1 %vm449_vm7, %v643_v54  ;;  %v138_v54 = vld [vmem:[%s6796_s3 + $0x8] sm:$0xff] }
 0x27b   :  { %v649_v5 = vpop.permute.xlu1 %648  ;;  %3931 = vmatmul.msk.f32.gmra.mxu3 %vm449_vm7, %v5024_v37 }
 0x27f   :  { %v651_v63 = vpop.permute.xlu2 %650 }
 0x280   :  { %v918_v6 = vpop.permute.xlu0 %917  ;;  %3949 = vmatmul.msk.f32.gmra.mxu1 %vm449_vm7, %v645_v3 }
 0x281   :  { %3960 = vmatpush.xpose.msk.msra.mxu3 %vm449_vm7, %v918_v6 }
 0x283   :  { %v1171_v47 = vpop.permute.xlu1 %1170  ;;  %3932 = vmatmul.msk.f32.gmra.mxu3 %vm449_vm7, %v5029_v39 }
 0x284   :  { %3977 = vmatpush.xpose.msk.msra.mxu1 %vm449_vm7, %v1171_v47 }
 0x287   :  { %v1149_v7 = vpop.permute.xlu2 %1148 }
 0x288   :  { %v916_v0 = vpop.permute.xlu0 %915  ;;  %3950 = vmatmul.msk.f32.gmra.mxu1 %vm449_vm7, %v647_v56 }
 0x289   :  { %3961 = vmatpush.xpose.msk.msra.mxu3 %vm449_vm7, %v916_v0  ;;  %3978 = vmatpush.xpose.msk.msra.mxu1 %vm449_vm7, %v1169_v57 }
 0x28b   :  { %v914_v10 = vpop.permute.xlu1 %913  ;;  %3933 = vmatmul.msk.f32.gmra.mxu3 %vm449_vm7, %v5034_v41 }
 0x28d   :  { %3962 = vmatpush.xpose.msk.msra.mxu3 %vm449_vm7, %v914_v10  ;;  %3979 = vmatpush.xpose.msk.msra.mxu1 %vm449_vm7, %v1167_v60  ;;  %v5186_v10 = vld [vmem:[%s6796_s3 + $0x20] sm:$0xff] }
 0x28f   :  { %v902_v9 = vpop.permute.xlu2 %901 }
 0x290   :  { %v1165_v11 = vpop.permute.xlu0 %1164  ;;  %3951 = vmatmul.msk.f32.gmra.mxu1 %vm449_vm7, %v649_v5 }
 0x291   :  { %3980 = vmatpush.xpose.msk.msra.mxu1 %vm449_vm7, %v1165_v11 }
 0x293   :  { %v912_v12 = vpop.permute.xlu1 %911  ;;  %3934 = vmatmul.msk.f32.gmra.mxu3 %vm449_vm7, %v5051_v46 }
 0x294   :  { %3963 = vmatpush.xpose.msk.msra.mxu3 %vm449_vm7, %v912_v12 }
 0x297   :  { %v1155_v13 = vpop.permute.xlu2 %1154 }
 0x298   :  { %v1163_v14 = vpop.permute.xlu0 %1162  ;;  %3952 = vmatmul.msk.f32.gmra.mxu1 %vm449_vm7, %v651_v63  ;;  %3964 = vmatpush.xpose.msk.msra.mxu3 %vm449_vm7, %v910_v4  ;;  %v140_v4 = vld [vmem:[%s6796_s3 + $0x18] sm:$0xff] }
 0x299   :  { %3981 = vmatpush.xpose.msk.msra.mxu1 %vm449_vm7, %v1163_v14 }
 0x29b   :  { %v1161_v16 = vpop.permute.xlu1 %1160 }
 0x29d   :  { %3982 = vmatpush.xpose.msk.msra.mxu1 %vm449_vm7, %v1161_v16 }
 0x29f   :  { %v908_v18 = vpop.permute.xlu2 %907 }
 0x2a0   :  { %v898_v19 = vpop.permute.xlu0 %897  ;;  %3983 = vmatmul.msk.f32.vlgmr.msra.gmra.mxu1 %vm449_vm7, %v1149_v7 }
 0x2a1   :  { %3965 = vmatmul.msk.f32.vlgmr.msra.gmra.mxu3 %vm449_vm7, %v898_v19  ;;  %v5203_v19 = vld [vmem:[%s6796_s3 + $0x28] sm:$0xff] }
 0x2a3   :  { %v900_v20 = vpop.permute.xlu1 %899 }
 0x2a7   :  { %v4229_v21 = vpop.permute.xlu2 %4228 }
 0x2a8   :  { %v1151_v8 = vpop.permute.xlu0 %1150  ;;  %v4230_v24 = vunpack.i.l.bf16 %v4229_v21  ;;  %v4231_v25 = vunpack.i.h.bf16 %v4229_v21 }
 0x2a9   :  { %3966 = vmatmul.msk.f32.gmra.mxu3 %vm449_vm7, %v900_v20  ;;  %3984 = vmatmul.msk.f32.gmra.mxu1 %vm449_vm7, %v1151_v8 }
 0x2aa   :  { %841 = vmatpush.msrb.mxu2 %v4230_v24 }
 0x2ab   :  { %v1153_v26 = vpop.permute.xlu1 %1152 }
 0x2ac   :  { %842 = vmatpush.msrb.mxu2 %v4231_v25 }
 0x2af   :  { %v4239_v41 = vpop.permute.xlu2 %4238 }
 0x2b0   :  { %v904_v27 = vpop.permute.xlu0 %903  ;;  %v4240_v44 = vunpack.i.l.bf16 %v4239_v41  ;;  %v4241_v46 = vunpack.i.h.bf16 %v4239_v41 }
 0x2b1   :  { %3967 = vmatmul.msk.f32.gmra.mxu3 %vm449_vm7, %v902_v9  ;;  %3985 = vmatmul.msk.f32.gmra.mxu1 %vm449_vm7, %v1153_v26 }
 0x2b3   :  { %v906_v28 = vpop.permute.xlu1 %905 }
 0x2b8   :  { %v1157_v30 = vpop.permute.xlu0 %1156 }
 0x2b9   :  { %3968 = vmatmul.msk.f32.gmra.mxu3 %vm449_vm7, %v904_v27  ;;  %3986 = vmatmul.msk.f32.gmra.mxu1 %vm449_vm7, %v1155_v13 }
 0x2bb   :  { %v1159_v32 = vpop.permute.xlu1 %1158 }
 0x2c0   :  { %v4244_v33 = vpop.permute.xlu0 %4243 }
 0x2c1   :  { %v4245_v36 = vunpack.i.l.bf16 %v4244_v33  ;;  %3969 = vmatmul.msk.f32.gmra.mxu3 %vm449_vm7, %v906_v28  ;;  %3987 = vmatmul.msk.f32.gmra.mxu1 %vm449_vm7, %v1157_v30  ;;  %v4246_v37 = vunpack.i.h.bf16 %v4244_v33 }
 0x2c3   :  { %1092 = vmatpush.msra.mxu0 %v4245_v36  ;;  %v4234_v39 = vpop.permute.xlu1 %4233 }
 0x2c4   :  { %v4235_v40 = vunpack.i.l.bf16 %v4234_v39  ;;  %v4236_v42 = vunpack.i.h.bf16 %v4234_v39 }
 0x2c5   :  { %1093 = vmatpush.msra.mxu0 %v4246_v37 }
 0x2c6   :  { %843 = vmatpush.msrb.mxu2 %v4235_v40 }
 0x2c8   :  { %844 = vmatpush.msrb.mxu2 %v4236_v42 }
 0x2c9   :  { %3970 = vmatmul.msk.f32.gmra.mxu3 %vm449_vm7, %v908_v18  ;;  %3988 = vmatmul.msk.f32.gmra.mxu1 %vm449_vm7, %v1159_v32 }
 0x2ca   :  { %845 = vmatpush.msrb.mxu2 %v4240_v44 }
 0x2cc   :  { %846 = vmatpush.msrb.mxu2 %v4241_v46 }
 0x2ed   :  { %v705_v49 = vpop.f32.mrf.mxu1 }
 0x2ee   :  { %v5146_v51 = vadd.f32 %v705_v49, %v137_v48  ;;  %v497_v15 = vpop.f32.mrf.mxu3 }
 0x2ef   :  { %v5148_v50 = vadd.f32 %v497_v15, %v137_v48 }
 0x2f0   :  { %v723_v52 = vsel %vm83_vm0, %v5146_v51, -inf }
 0x2f1   :  { %724 = vmax.xlane.f32.xlu1 %v723_v52  ;;  %v515_v53 = vsel %vm83_vm0, %v5148_v50, -inf }
 0x2f2   :  { %516 = vmax.xlane.f32.xlu0 %v515_v53 }
 0x2f5   :  { %v708_v38 = vpop.f32.mrf.mxu1 }
 0x2f6   :  { %v5157_v55 = vadd.f32 %v708_v38, %v138_v54  ;;  %v500_v57 = vpop.f32.mrf.mxu3 }
 0x2f7   :  { %v5164_v60 = vadd.f32 %v500_v57, %v138_v54 }
 0x2f8   :  { %v726_v58 = vsel %vm83_vm0, %v5157_v55, -inf }
 0x2f9   :  { %727 = vmax.xlane.f32.xlu2 %v726_v58  ;;  %v518_v56 = vsel %vm83_vm0, %v5164_v60, -inf }
 0x2fd   :  { %v711_v62 = vpop.f32.mrf.mxu1 }
 0x2fe   :  { %v5166_v1 = vadd.f32 %v711_v62, %v139_v59  ;;  %v503_v2 = vpop.f32.mrf.mxu3 }
 0x2ff   :  { %v5175_v5 = vadd.f32 %v503_v2, %v139_v59 }
 0x300   :  { %v729_v3 = vsel %vm83_vm0, %v5166_v1, -inf }
 0x301   :  { %730 = vmax.xlane.f32.xlu0 %v729_v3  ;;  %519 = vmax.xlane.f32.xlu2 %v518_v56  ;;  %v521_v0 = vsel %vm83_vm0, %v5175_v5, -inf }
 0x305   :  { %v714_v63 = vpop.f32.mrf.mxu1 }
 0x306   :  { %v5177_v6 = vadd.f32 %v714_v63, %v140_v4  ;;  %v506_v47 = vpop.f32.mrf.mxu3 }
 0x307   :  { %v5188_v9 = vadd.f32 %v506_v47, %v140_v4 }
 0x308   :  { %v732_v7 = vsel %vm83_vm0, %v5177_v6, -inf }
 0x309   :  { %733 = vmax.xlane.f32.xlu1 %v732_v7  ;;  %522 = vmax.xlane.f32.xlu0 %v521_v0  ;;  %v524_v14 = vsel %vm83_vm0, %v5188_v9, -inf }
 0x30d   :  { %v717_v11 = vpop.f32.mrf.mxu1 }
 0x30e   :  { %v5191_v12 = vadd.f32 %v717_v11, %v5186_v10  ;;  %v509_v13 = vpop.f32.mrf.mxu3 }
 0x30f   :  { %v5198_v18 = vadd.f32 %v509_v13, %v5186_v10 }
 0x310   :  { %v735_v16 = vsel %vm83_vm0, %v5191_v12, -inf }
 0x311   :  { %525 = vmax.xlane.f32.xlu1 %v524_v14  ;;  %736 = vmax.xlane.f32.xlu2 %v735_v16  ;;  %v527_v24 = vsel %vm83_vm0, %v5198_v18, -inf }
 0x315   :  { %v720_v20 = vpop.f32.mrf.mxu1 }
 0x316   :  { %v512_v21 = vpop.f32.mrf.mxu3  ;;  %v5213_v26 = vadd.f32 %v720_v20, %v5203_v19 }
 0x317   :  { %v5206_v8 = vadd.f32 %v512_v21, %v5203_v19 }
 0x318   :  { %v738_v30 = vsel %vm83_vm0, %v5213_v26, -inf }
 0x319   :  { %528 = vmax.xlane.f32.xlu2 %v527_v24  ;;  %v530_v25 = vsel %vm83_vm0, %v5206_v8, -inf }
 0x31a   :  { %531 = vmax.xlane.f32.xlu0 %v530_v25 }
 0x31d   :  { %v1213_v27 = vpop.f32.mrf.mxu1 }
 0x31e   :  { %v5215_v28 = vadd.f32 %v1213_v27, %v137_v48 }
 0x320   :  { %v1231_v32 = vsel %vm83_vm0, %v5215_v28, -inf }
 0x321   :  { %739 = vmax.xlane.f32.xlu2 %v738_v30 }
 0x322   :  { %1232 = vmax.xlane.f32.xlu0 %v1231_v32 }
 0x324   :  { %v962_v33 = vpop.f32.mrf.mxu3 }
 0x325   :  { %v5221_v36 = vadd.f32 %v962_v33, %v137_v48 }
 0x326   :  { %v1216_v37 = vpop.f32.mrf.mxu1 }
 0x327   :  { %v5223_v39 = vadd.f32 %v1216_v37, %v138_v54  ;;  %v980_v40 = vsel %vm83_vm0, %v5221_v36, -inf }
 0x328   :  { %981 = vmax.xlane.f32.xlu1 %v980_v40 }
 0x329   :  { %v1234_v41 = vsel %vm83_vm0, %v5223_v39, -inf }
 0x32a   :  { %1235 = vmax.xlane.f32.xlu2 %v1234_v41 }
 0x32c   :  { %v965_v42 = vpop.f32.mrf.mxu3 }
 0x32d   :  { %v5229_v44 = vadd.f32 %v965_v42, %v138_v54 }
 0x32e   :  { %v1219_v46 = vpop.f32.mrf.mxu1 }
 0x32f   :  { %v5231_v49 = vadd.f32 %v1219_v46, %v139_v59  ;;  %v983_v48 = vsel %vm83_vm0, %v5229_v44, -inf }
 0x330   :  { %984 = vmax.xlane.f32.xlu0 %v983_v48 }
 0x331   :  { %v1237_v15 = vsel %vm83_vm0, %v5231_v49, -inf }
 0x332   :  { %1238 = vmax.xlane.f32.xlu1 %v1237_v15 }
 0x334   :  { %v968_v52 = vpop.f32.mrf.mxu3 }
 0x335   :  { %v5237_v53 = vadd.f32 %v968_v52, %v139_v59 }
 0x336   :  { %v1222_v38 = vpop.f32.mrf.mxu1 }
 0x337   :  { %v986_v57 = vsel %vm83_vm0, %v5237_v53, -inf  ;;  %v5241_v54 = vadd.f32 %v1222_v38, %v140_v4 }
 0x338   :  { %987 = vmax.xlane.f32.xlu0 %v986_v57 }
 0x339   :  { %v1240_v59 = vsel %vm83_vm0, %v5241_v54, -inf }
 0x33c   :  { %v971_v58 = vpop.f32.mrf.mxu3 }
 0x33d   :  { %v5243_v62 = vadd.f32 %v971_v58, %v140_v4 }
 0x33e   :  { %v1225_v2 = vpop.f32.mrf.mxu1 }
 0x33f   :  { %v5246_v3 = vadd.f32 %v1225_v2, %v5186_v10  ;;  %v989_v56 = vsel %vm83_vm0, %v5243_v62, -inf }
 0x340   :  { %990 = vmax.xlane.f32.xlu2 %v989_v56  ;;  %1241 = vmax.xlane.f32.xlu0 %v1240_v59 }
 0x341   :  { %v1243_v63 = vsel %vm83_vm0, %v5246_v3, -inf }
 0x342   :  { %1244 = vmax.xlane.f32.xlu1 %v1243_v63 }
 0x346   :  { %v1228_v32 = vpop.f32.mrf.mxu1 }
 0x347   :  { %v5275_v40 = vadd.f32 %v1228_v32, %v5203_v19 }
 0x349   :  { %v1246_v46 = vsel %vm83_vm0, %v5275_v40, -inf }
 0x354   :  { %4253 = vrot.lane.b32.xlu0 %v5018_v34, %s6817_s5 }
 0x358   :  { %4248 = vrot.lane.b32.xlu2 %v5038_v45, %s6815_s28  ;;  %v974_v45 = vpop.f32.mrf.mxu3 }
 0x359   :  { %v5269_v24 = vadd.f32 %v974_v45, %v5186_v10 }
 0x35b   :  { %v992_v30 = vsel %vm83_vm0, %v5269_v24, -inf }
 0x364   :  { %v725_v4 = vpop.xlane.xlu1 %724 }
 0x365   :  { %v741_v47 = vsub.f32 %v5146_v51, %v725_v4  ;;  %v517_v7 = vpop.xlane.xlu0 %516 }
 0x366   :  { %v533_v11 = vsub.f32 %v5148_v50, %v517_v7 }
 0x367   :  { %v747_v0 = vmul.f32 1.442695, %v741_v47 }
 0x368   :  { %v539_v13 = vmul.f32 1.442695, %v533_v11 }
 0x369   :  { %4349 = vpow2.f32 %v747_v0 }
 0x36a   :  { %4351 = vpow2.f32 %v539_v13 }
 0x36c   :  { %v728_v20 = vpop.xlane.xlu2 %727 }
 0x36d   :  { %v742_v41 = vsub.f32 %v5157_v55, %v728_v20 }
 0x36f   :  { %v5260_v14 = vpop.eup %4349  ;;  %v749_v52 = vmul.f32 1.442695, %v742_v41 }
 0x370   :  { %v759_v16 = vsel %vm83_vm0, %v5260_v14, 0.0  ;;  %v5264_v21 = vpop.eup %4351 }
 0x371   :  { %760 = vadd.xlane.f32.xlu1 %v759_v16  ;;  %v551_v51 = vsel %vm83_vm0, %v5264_v21, 0.0 }
 0x374   :  { %v520_v50 = vpop.xlane.xlu2 %519  ;;  %v731_v33 = vpop.xlane.xlu0 %730 }
 0x375   :  { %v534_v55 = vsub.f32 %v5164_v60, %v520_v50  ;;  %v743_v47 = vsub.f32 %v5166_v1, %v731_v33 }
 0x377   :  { %v541_v59 = vmul.f32 1.442695, %v534_v55  ;;  %v751_v16 = vmul.f32 1.442695, %v743_v47 }
 0x379   :  { %552 = vadd.xlane.f32.xlu1 %v551_v51 }
 0x37c   :  { %v734_v25 = vpop.xlane.xlu1 %733  ;;  %v523_v58 = vpop.xlane.xlu0 %522 }
 0x37d   :  { %v744_v27 = vsub.f32 %v5177_v6, %v734_v25  ;;  %v977_v6 = vpop.f32.mrf.mxu3  ;;  %v535_v1 = vsub.f32 %v5175_v5, %v523_v58 }
 0x37e   :  { %993 = vmax.xlane.f32.xlu0 %v992_v30  ;;  %v5286_v57 = vadd.f32 %v977_v6, %v5203_v19 }
 0x37f   :  { %v753_v37 = vmul.f32 1.442695, %v744_v27  ;;  %v543_v27 = vmul.f32 1.442695, %v535_v1 }
 0x380   :  { %v995_v2 = vsel %vm83_vm0, %v5286_v57, -inf }
 0x381   :  { %4353 = vpow2.f32 %v753_v37 }
 0x384   :  { %v737_v10 = vpop.xlane.xlu2 %736  ;;  %v526_v50 = vpop.xlane.xlu1 %525 }
 0x385   :  { %v745_v42 = vsub.f32 %v5191_v12, %v737_v10  ;;  %v536_v5 = vsub.f32 %v5188_v9, %v526_v50 }
 0x386   :  { %1247 = vmax.xlane.f32.xlu0 %v1246_v46 }
 0x387   :  { %v5281_v48 = vpop.eup %4353  ;;  %v755_v15 = vmul.f32 1.442695, %v745_v42 }
 0x388   :  { %v768_v38 = vsel %vm83_vm0, %v5281_v48, 0.0 }
 0x389   :  { %769 = vadd.xlane.f32.xlu2 %v768_v38  ;;  %4355 = vpow2.f32 %v755_v15  ;;  %v545_v15 = vmul.f32 1.442695, %v536_v5 }
 0x38a   :  { %4357 = vpow2.f32 %v749_v52 }
 0x38b   :  { %4359 = vpow2.f32 %v541_v59 }
 0x38c   :  { %v5289_v12 = vpop.xlane.xlu2 %528 }
 0x38d   :  { %v532_v63 = vpop.xlane.xlu0 %531  ;;  %v537_v55 = vsub.f32 %v5198_v18, %v5289_v12 }
 0x38e   :  { %996 = vmax.xlane.f32.xlu0 %v995_v2  ;;  %v538_v11 = vsub.f32 %v5206_v8, %v532_v63 }
 0x38f   :  { %v5293_v56 = vpop.eup %4355 }
 0x390   :  { %v771_v19 = vsel %vm83_vm0, %v5293_v56, 0.0  ;;  %v5297_v4 = vpop.eup %4357  ;;  %v549_v45 = vmul.f32 1.442695, %v538_v11 }
 0x391   :  { %772 = vadd.xlane.f32.xlu2 %v771_v19  ;;  %v762_v0 = vsel %vm83_vm0, %v5297_v4, 0.0  ;;  %v5304_v20 = vpop.eup %4359 }
 0x394   :  { %v740_v60 = vpop.xlane.xlu2 %739 }
 0x395   :  { %v746_v7 = vsub.f32 %v5213_v26, %v740_v60  ;;  %v1233_v51 = vpop.xlane.xlu0 %1232  ;;  %v554_v26 = vsel %vm83_vm0, %v5304_v20, 0.0  ;;  %v547_v60 = vmul.f32 1.442695, %v537_v55 }
 0x396   :  { %763 = vadd.xlane.f32.xlu0 %v762_v0  ;;  %v1249_v8 = vsub.f32 %v5215_v28, %v1233_v51 }
 0x397   :  { %v757_v13 = vmul.f32 1.442695, %v746_v7 }
 0x398   :  { %v1255_v33 = vmul.f32 1.442695, %v1249_v8 }
 0x399   :  { %4361 = vpow2.f32 %v757_v13 }
 0x39a   :  { %4363 = vpow2.f32 %v751_v16 }
 0x39b   :  { %4365 = vpow2.f32 %v549_v45  ;;  %v982_v41 = vpop.xlane.xlu1 %981 }
 0x39c   :  { %4367 = vpow2.f32 %v543_v27  ;;  %v998_v6 = vsub.f32 %v5221_v36, %v982_v41 }
 0x39d   :  { %4369 = vpow2.f32 %v1255_v33 }
 0x39e   :  { %555 = vadd.xlane.f32.xlu0 %v554_v26  ;;  %v1004_v38 = vmul.f32 1.442695, %v998_v6 }
 0x39f   :  { %v5309_v25 = vpop.eup %4361 }
 0x3a0   :  { %v774_v30 = vsel %vm83_vm0, %v5309_v25, 0.0  ;;  %v5314_v32 = vpop.eup %4363 }
 0x3a1   :  { %775 = vadd.xlane.f32.xlu1 %v774_v30  ;;  %v5318_v42 = vpop.eup %4365  ;;  %v765_v28 = vsel %vm83_vm0, %v5314_v32, 0.0 }
 0x3a2   :  { %v566_v52 = vsel %vm83_vm0, %v5318_v42, 0.0  ;;  %v5325_v9 = vpop.eup %4367 }
 0x3a3   :  { %v985_v37 = vpop.xlane.xlu0 %984  ;;  %v5332_v59 = vpop.eup %4369  ;;  %v557_v36 = vsel %vm83_vm0, %v5325_v9, 0.0 }
 0x3a4   :  { %v999_v10 = vsub.f32 %v5229_v44, %v985_v37  ;;  %v5327_v44 = vpop.xlane.xlu2 %1235  ;;  %v1267_v18 = vsel %vm83_vm0, %v5332_v59, 0.0 }
 0x3a5   :  { %v1239_v6 = vpop.xlane.xlu1 %1238 }
 0x3a6   :  { %v1006_v46 = vmul.f32 1.442695, %v999_v10  ;;  %766 = vadd.xlane.f32.xlu0 %v765_v28 }
 0x3a8   :  { %4371 = vpow2.f32 %v1006_v46 }
 0x3a9   :  { %567 = vadd.xlane.f32.xlu1 %v566_v52  ;;  %4373 = vpow2.f32 %v545_v15 }
 0x3aa   :  { %4375 = vpow2.f32 %v1004_v38  ;;  %v1251_v38 = vsub.f32 %v5231_v49, %v1239_v6 }
 0x3ab   :  { %v988_v58 = vpop.xlane.xlu0 %987 }
 0x3ac   :  { %v1000_v2 = vsub.f32 %v5237_v53, %v988_v58 }
 0x3ae   :  { %v5336_v63 = vpop.eup %4371  ;;  %v1008_v19 = vmul.f32 1.442695, %v1000_v2  ;;  %558 = vadd.xlane.f32.xlu0 %v557_v36  ;;  %v1259_v36 = vmul.f32 1.442695, %v1251_v38 }
 0x3af   :  { %v1019_v47 = vsel %vm83_vm0, %v5336_v63, 0.0  ;;  %v5342_v53 = vpop.eup %4373 }
 0x3b0   :  { %4377 = vpow2.f32 %v1008_v19  ;;  %1020 = vadd.xlane.f32.xlu2 %v1019_v47  ;;  %v5345_v11 = vpop.eup %4375  ;;  %v560_v13 = vsel %vm83_vm0, %v5342_v53, 0.0 }
 0x3b1   :  { %1268 = vadd.xlane.f32.xlu1 %v1267_v18  ;;  %4379 = vpow2.f32 %v547_v60  ;;  %v1016_v50 = vsel %vm83_vm0, %v5345_v11, 0.0 }
 0x3b3   :  { %v1242_v12 = vpop.xlane.xlu0 %1241  ;;  %v991_v7 = vpop.xlane.xlu2 %990 }
 0x3b4   :  { %v1252_v0 = vsub.f32 %v5241_v54, %v1242_v12  ;;  %v1001_v51 = vsub.f32 %v5243_v62, %v991_v7 }
 0x3b5   :  { %v1245_v15 = vpop.xlane.xlu1 %1244 }
 0x3b6   :  { %v5349_v16 = vpop.eup %4377  ;;  %v1261_v45 = vmul.f32 1.442695, %v1252_v0  ;;  %561 = vadd.xlane.f32.xlu0 %v560_v13  ;;  %v1010_v26 = vmul.f32 1.442695, %v1001_v51  ;;  %v1253_v7 = vsub.f32 %v5246_v3, %v1245_v15 }
 0x3b7   :  { %v1022_v1 = vsel %vm83_vm0, %v5349_v16, 0.0  ;;  %v5356_v54 = vpop.eup %4379 }
 0x3b8   :  { %4381 = vpow2.f32 %v1261_v45  ;;  %1023 = vadd.xlane.f32.xlu2 %v1022_v1  ;;  %v563_v30 = vsel %vm83_vm0, %v5356_v54, 0.0  ;;  %v1263_v0 = vmul.f32 1.442695, %v1253_v7 }
 0x3b9   :  { %1017 = vadd.xlane.f32.xlu1 %v1016_v50  ;;  %4383 = vpow2.f32 %v1010_v26 }
 0x3bb   :  { %v4249_v8 = vpop.permute.xlu2 %4248 }
 0x3bc   :  { %v4250_v27 = vunpack.i.l.bf16 %v4249_v8  ;;  %v4251_v62 = vunpack.i.h.bf16 %v4249_v8 }
 0x3be   :  { %v5360_v33 = vpop.eup %4381  ;;  %564 = vadd.xlane.f32.xlu0 %v563_v30  ;;  %1343 = vmatpush.msrb.mxu1 %v4250_v27 }
 0x3bf   :  { %4205 = vmatpush.msra.mxu2 %v4250_v27  ;;  %v1276_v37 = vsel %vm83_vm0, %v5360_v33, 0.0  ;;  %v5364_v5 = vpop.eup %4383 }
 0x3c0   :  { %1277 = vadd.xlane.f32.xlu2 %v1276_v37  ;;  %1344 = vmatpush.msrb.mxu1 %v4251_v62  ;;  %v1025_v28 = vsel %vm83_vm0, %v5364_v5, 0.0 }
 0x3c1   :  { %4206 = vmatpush.msra.mxu2 %v4251_v62 }
 0x3c6   :  { %v4254_v41 = vpop.permute.xlu0 %4253 }
 0x3c7   :  { %v4255_v10 = vunpack.i.l.bf16 %v4254_v41  ;;  %v4256_v46 = vunpack.i.h.bf16 %v4254_v41 }
 0x3c8   :  { %1026 = vadd.xlane.f32.xlu2 %v1025_v28 }
 0x3c9   :  { %1094 = vmatpush.msra.mxu0 %v4255_v10 }
 0x3cb   :  { %1095 = vmatpush.msra.mxu0 %v4256_v46 }
 0x3d2   :  { %4263 = vrot.lane.b32.xlu0 %v5006_v23, %s6817_s5  ;;  %4258 = vrot.lane.b32.xlu1 %v5018_v34, %s6815_s28  ;;  %v1250_v34 = vsub.f32 %v5223_v39, %v5327_v44 }
 0x3d4   :  { %v1257_v18 = vmul.f32 1.442695, %v1250_v34 }
 0x3da   :  { %4268 = vrot.lane.b32.xlu0 %v5006_v23, %s6815_s28 }
 0x3e4   :  { %v761_v52 = vpop.xlane.xlu1 %760 }
 0x3e5   :  { %4385 = vrcp.f32 %v761_v52 }
 0x3eb   :  { %v4386_v58 = vpop.eup %4385 }
 0x3ec   :  { %v553_v55 = vpop.xlane.xlu1 %552  ;;  %v783_v2 = vmul.f32 %v4386_v58, %v5260_v14 }
 0x3ed   :  { %4387 = vrcp.f32 %v553_v55 }
 0x3ee   :  { %3953 = vmatmul.msk.f32.vlgmr.msrb.gmra.mxu2 %vm83_vm0, %v783_v2  ;;  %4389 = vpow2.f32 %v1259_v36 }
 0x3ef   :  { %4391 = vpow2.f32 %v1257_v18 }
 0x3f1   :  { %v994_v19 = vpop.xlane.xlu0 %993 }
 0x3f2   :  { %v1002_v23 = vsub.f32 %v5269_v24, %v994_v19 }
 0x3f3   :  { %v4388_v47 = vpop.eup %4387 }
 0x3f4   :  { %v575_v60 = vmul.f32 %v4388_v47, %v5264_v21  ;;  %v1012_v49 = vmul.f32 1.442695, %v1002_v23  ;;  %v5382_v12 = vpop.eup %4389 }
 0x3f5   :  { %v1273_v44 = vsel %vm83_vm0, %v5382_v12, 0.0  ;;  %v5388_v21 = vpop.eup %4391 }
 0x3f6   :  { %3935 = vmatmul.msk.f32.vlgmr.msrb.gmra.mxu0 %vm83_vm0, %v575_v60  ;;  %4393 = vpow2.f32 %v1012_v49  ;;  %v1270_v3 = vsel %vm83_vm0, %v5388_v21, 0.0 }
 0x3f9   :  { %v1248_v14 = vpop.xlane.xlu0 %1247 }
 0x3fa   :  { %v1254_v39 = vsub.f32 %v5275_v40, %v1248_v14 }
 0x3fc   :  { %v1265_v24 = vmul.f32 1.442695, %v1254_v39  ;;  %1274 = vadd.xlane.f32.xlu1 %v1273_v44  ;;  %v5390_v13 = vpop.eup %4393  ;;  %v770_v15 = vpop.xlane.xlu2 %769 }
 0x3fd   :  { %v1028_v40 = vsel %vm83_vm0, %v5390_v13, 0.0 }
 0x3fe   :  { %4395 = vpow2.f32 %v1265_v24 }
 0x3ff   :  { %4397 = vpow2.f32 %v1263_v0 }
 0x401   :  { %v997_v45 = vpop.xlane.xlu0 %996 }
 0x402   :  { %v1003_v51 = vsub.f32 %v5286_v57, %v997_v45 }
 0x404   :  { %v5397_v1 = vpop.eup %4395  ;;  %1271 = vadd.xlane.f32.xlu0 %v1270_v3  ;;  %1029 = vadd.xlane.f32.xlu1 %v1028_v40  ;;  %v1014_v50 = vmul.f32 1.442695, %v1003_v51  ;;  %v773_v55 = vpop.xlane.xlu2 %772 }
 0x405   :  { %v1282_v26 = vsel %vm83_vm0, %v5397_v1, 0.0  ;;  %v5401_v8 = vpop.eup %4397 }
 0x406   :  { %1283 = vadd.xlane.f32.xlu2 %v1282_v26  ;;  %4399 = vpow2.f32 %v1014_v50  ;;  %v1279_v57 = vsel %vm83_vm0, %v5401_v8, 0.0 }
 0x409   :  { %v764_v27 = vpop.xlane.xlu0 %763 }
 0x40a   :  { %4401 = vrcp.f32 %v764_v27 }
 0x40c   :  { %1280 = vadd.xlane.f32.xlu0 %v1279_v57  ;;  %v5405_v30 = vpop.eup %4399 }
 0x40d   :  { %v1031_v10 = vsel %vm83_vm0, %v5405_v30, 0.0 }
 0x410   :  { %v4402_v62 = vpop.eup %4401 }
 0x411   :  { %v556_v37 = vpop.xlane.xlu0 %555  ;;  %v784_v41 = vmul.f32 %v4402_v62, %v5297_v4 }
 0x412   :  { %4403 = vrcp.f32 %v556_v37 }
 0x413   :  { %3954 = vmatmul.msk.f32.gmra.mxu2 %vm83_vm0, %v784_v41 }
 0x414   :  { %1032 = vadd.xlane.f32.xlu0 %v1031_v10  ;;  %v776_v52 = vpop.xlane.xlu1 %775 }
 0x418   :  { %v4404_v28 = vpop.eup %4403 }
 0x419   :  { %v767_v46 = vpop.xlane.xlu0 %766  ;;  %v576_v6 = vmul.f32 %v4404_v28, %v5304_v20 }
 0x41a   :  { %4405 = vrcp.f32 %v767_v46 }
 0x41b   :  { %3936 = vmatmul.msk.f32.gmra.mxu0 %vm83_vm0, %v576_v6  ;;  %4407 = vrcp.f32 %v770_v15 }
 0x41c   :  { %v568_v34 = vpop.xlane.xlu1 %567 }
 0x420   :  { %v4406_v38 = vpop.eup %4405 }
 0x421   :  { %v559_v58 = vpop.xlane.xlu0 %558  ;;  %v785_v4 = vmul.f32 %v4406_v38, %v5314_v32  ;;  %v4408_v2 = vpop.eup %4407 }
 0x422   :  { %4409 = vrcp.f32 %v559_v58  ;;  %v786_v23 = vmul.f32 %v4408_v2, %v5281_v48 }
 0x423   :  { %3955 = vmatmul.msk.f32.gmra.mxu2 %vm83_vm0, %v785_v4  ;;  %4411 = vrcp.f32 %v773_v55 }
 0x424   :  { %v1269_v14 = vpop.xlane.xlu1 %1268 }
 0x428   :  { %v4410_v36 = vpop.eup %4409 }
 0x429   :  { %v562_v19 = vpop.xlane.xlu0 %561  ;;  %v577_v20 = vmul.f32 %v4410_v36, %v5325_v9  ;;  %v4412_v47 = vpop.eup %4411 }
 0x42a   :  { %4413 = vrcp.f32 %v562_v19  ;;  %v787_v49 = vmul.f32 %v4412_v47, %v5293_v56  ;;  %v1021_v9 = vpop.xlane.xlu2 %1020 }
 0x42b   :  { %3937 = vmatmul.msk.f32.gmra.mxu0 %vm83_vm0, %v577_v20  ;;  %3956 = vmatmul.msk.f32.gmra.mxu2 %vm83_vm0, %v786_v23  ;;  %4415 = vrcp.f32 %v776_v52 }
 0x430   :  { %v4414_v32 = vpop.eup %4413 }
 0x431   :  { %v565_v60 = vpop.xlane.xlu0 %564  ;;  %v578_v18 = vmul.f32 %v4414_v32, %v5342_v53  ;;  %v4416_v48 = vpop.eup %4415 }
 0x432   :  { %4417 = vrcp.f32 %v565_v60  ;;  %v788_v44 = vmul.f32 %v4416_v48, %v5309_v25  ;;  %v1018_v53 = vpop.xlane.xlu1 %1017  ;;  %v1024_v24 = vpop.xlane.xlu2 %1023 }
 0x433   :  { %3938 = vmatmul.msk.f32.gmra.mxu0 %vm83_vm0, %v578_v18  ;;  %3957 = vmatmul.msk.f32.gmra.mxu2 %vm83_vm0, %v787_v49  ;;  %4419 = vrcp.f32 %v568_v34 }
 0x434   :  { %4421 = vrcp.f32 %v1018_v53 }
 0x435   :  { %4423 = vrcp.f32 %v1269_v14 }
 0x436   :  { %4425 = vrcp.f32 %v1021_v9 }
 0x437   :  { %4427 = vrcp.f32 %v1024_v24 }
 0x438   :  { %v4418_v7 = vpop.eup %4417 }
 0x439   :  { %v579_v39 = vmul.f32 %v4418_v7, %v5356_v54  ;;  %v4420_v56 = vpop.eup %4419 }
 0x43a   :  { %v580_v0 = vmul.f32 %v4420_v56, %v5318_v42  ;;  %v4422_v50 = vpop.eup %4421  ;;  %v1278_v42 = vpop.xlane.xlu2 %1277 }
 0x43b   :  { %3939 = vmatmul.msk.f32.gmra.mxu0 %vm83_vm0, %v579_v39  ;;  %3958 = vmatmul.msk.f32.gmra.mxu2 %vm83_vm0, %v788_v44  ;;  %v1040_v26 = vmul.f32 %v4422_v50, %v5345_v11  ;;  %v4424_v57 = vpop.eup %4423 }
 0x43c   :  { %v4426_v37 = vpop.eup %4425  ;;  %v1291_v10 = vmul.f32 %v4424_v57, %v5332_v59 }
 0x43d   :  { %v1041_v11 = vmul.f32 %v4426_v37, %v5336_v63  ;;  %v4428_v46 = vpop.eup %4427 }
 0x43e   :  { %v1042_v6 = vmul.f32 %v4428_v46, %v5349_v16  ;;  %v1405_v46 = vld [vmem:[%s6797_s8] sm:$0xff] }
 0x442   :  { %v1027_v28 = vpop.xlane.xlu2 %1026 }
 0x443   :  { %3940 = vmatmul.msk.f32.gmra.mxu0 %vm83_vm0, %v580_v0  ;;  %4429 = vrcp.f32 %v1027_v28  ;;  %v1406_v28 = vld [vmem:[%s6797_s8 + $0x8] sm:$0xff] }
 0x444   :  { %v4264_v45 = vpop.permute.xlu0 %4263  ;;  %v4259_v51 = vpop.permute.xlu1 %4258 }
 0x445   :  { %v4265_v3 = vunpack.i.l.bf16 %v4264_v45  ;;  %v4260_v40 = vunpack.i.l.bf16 %v4259_v51  ;;  %v4266_v54 = vunpack.i.h.bf16 %v4264_v45  ;;  %v4261_v25 = vunpack.i.h.bf16 %v4259_v51 }
 0x447   :  { %1096 = vmatpush.msra.mxu0 %v4265_v3  ;;  %1345 = vmatpush.msrb.mxu1 %v4260_v40 }
 0x448   :  { %4207 = vmatpush.msra.mxu2 %v4260_v40 }
 0x449   :  { %1097 = vmatpush.msra.mxu0 %v4266_v54  ;;  %1346 = vmatpush.msrb.mxu1 %v4261_v25  ;;  %v4430_v15 = vpop.eup %4429  ;;  %v1412_v54 = vld [vmem:[%s6797_s8 + $0x38] sm:$0xff] }
 0x44a   :  { %4208 = vmatpush.msra.mxu2 %v4261_v25  ;;  %v1043_v52 = vmul.f32 %v4430_v15, %v5364_v5  ;;  %v1411_v25 = vld [vmem:[%s6797_s8 + $0x30] sm:$0xff]  ;;  %1443 = vmatpush.msrb.mxu3 %v1412_v54 }
 0x44b   :  { %3971 = vmatmul.msk.f32.vlgmr.msra.gmra.mxu0 %vm83_vm0, %v1040_v26  ;;  %v1410_v26 = vld [vmem:[%s6797_s8 + $0x28] sm:$0xff] }
 0x44c   :  { %v4269_v27 = vpop.permute.xlu0 %4268  ;;  %1444 = vmatpush.msrb.mxu3 %v1411_v25 }
 0x44d   :  { %v4270_v62 = vunpack.i.l.bf16 %v4269_v27  ;;  %v4271_v41 = vunpack.i.h.bf16 %v4269_v27 }
 0x44e   :  { %1445 = vmatpush.msrb.mxu3 %v1410_v26 }
 0x44f   :  { %1347 = vmatpush.msrb.mxu1 %v4270_v62  ;;  %4209 = vmatpush.msra.mxu2 %v4270_v62 }
 0x451   :  { %1348 = vmatpush.msrb.mxu1 %v4271_v41  ;;  %4210 = vmatpush.msra.mxu2 %v4271_v41 }
 0x452   :  { %3989 = vmatmul.msk.f32.vlgmr.msrb.gmra.mxu1 %vm83_vm0, %v1291_v10  ;;  %v1408_v10 = vld [vmem:[%s6797_s8 + $0x18] sm:$0xff] }
 0x453   :  { %3972 = vmatmul.msk.f32.gmra.mxu0 %vm83_vm0, %v1041_v11  ;;  %v1407_v11 = vld [vmem:[%s6797_s8 + $0x10] sm:$0xff] }
 0x45b   :  { %3973 = vmatmul.msk.f32.gmra.mxu0 %vm83_vm0, %v1042_v6 }
 0x463   :  { %3974 = vmatmul.msk.f32.gmra.mxu0 %vm83_vm0, %v1043_v52 }
 0x46f   :  { %v1275_v59 = vpop.xlane.xlu1 %1274 }
 0x470   :  { %4431 = vrcp.f32 %v1275_v59 }
 0x471   :  { %v848_v38 = vpop.f32.mrf.mxu2  ;;  %4433 = vrcp.f32 %v1278_v42  ;;  %v1409_v42 = vld [vmem:[%s6797_s8 + $0x20] sm:$0xff] }
 0x472   :  { %872 = vrot.lane.b32.xlu1 %v848_v38, %s6819_s26  ;;  %1446 = vmatpush.msrb.mxu3 %v1409_v42 }
 0x473   :  { %v616_v63 = vpop.f32.mrf.mxu0 }
 0x474   :  { %634 = vst.msk [vmem:[#allocation2] sm:$0xff] %vm449_vm7, %v616_v63  ;;  %1447 = vmatpush.msrb.mxu3 %v1408_v10 }
 0x476   :  { %v4432_v58 = vpop.eup %4431  ;;  %1448 = vmatpush.msrb.mxu3 %v1407_v11 }
 0x477   :  { %v1293_v4 = vmul.f32 %v4432_v58, %v5382_v12  ;;  %v1272_v16 = vpop.xlane.xlu0 %1271  ;;  %v1030_v55 = vpop.xlane.xlu1 %1029 }
 0x478   :  { %4435 = vrcp.f32 %v1272_v16  ;;  %v4434_v5 = vpop.eup %4433  ;;  %1449 = vmatpush.msrb.mxu3 %v1406_v28 }
 0x479   :  { %4437 = vrcp.f32 %v1030_v55  ;;  %3991 = vmatmul.msk.f32.vlgmr.msra.gmra.mxu2 %vm83_vm0, %v1293_v4  ;;  %v1294_v20 = vmul.f32 %v4434_v5, %v5360_v33  ;;  %v1284_v12 = vpop.xlane.xlu2 %1283 }
 0x47a   :  { %1450 = vmatpush.msrb.mxu3 %v1405_v46 }
 0x47e   :  { %v4436_v2 = vpop.eup %4435 }
 0x47f   :  { %v4438_v36 = vpop.eup %4437  ;;  %v1281_v34 = vpop.xlane.xlu0 %1280  ;;  %v1292_v19 = vmul.f32 %v4436_v2, %v5388_v21 }
 0x480   :  { %4439 = vrcp.f32 %v1281_v34  ;;  %v1044_v23 = vmul.f32 %v4438_v36, %v5390_v13 }
 0x481   :  { %3990 = vmatmul.msk.f32.gmra.mxu1 %vm83_vm0, %v1292_v19  ;;  %3992 = vmatmul.msk.f32.gmra.mxu2 %vm83_vm0, %v1294_v20  ;;  %4441 = vrcp.f32 %v1284_v12 }
 0x482   :  { %3975 = vmatmul.msk.f32.gmra.mxu0 %vm83_vm0, %v1044_v23 }
 0x486   :  { %v4440_v47 = vpop.eup %4439 }
 0x487   :  { %v1033_v32 = vpop.xlane.xlu0 %1032  ;;  %v1295_v60 = vmul.f32 %v4440_v47, %v5401_v8  ;;  %v4442_v21 = vpop.eup %4441 }
 0x488   :  { %4443 = vrcp.f32 %v1033_v32  ;;  %v1296_v13 = vmul.f32 %v4442_v21, %v5397_v1 }
 0x489   :  { %3993 = vmatmul.msk.f32.gmra.mxu2 %vm83_vm0, %v1295_v60 }
 0x48e   :  { %v4444_v33 = vpop.eup %4443 }
 0x48f   :  { %v1045_v18 = vmul.f32 %v4444_v33, %v5405_v30  ;;  %v4321_v33 = vld [vmem:[%s6798_s9] ss:$0 sm:$0xff] }
 0x491   :  { %3976 = vmatmul.msk.f32.gmra.mxu0 %vm83_vm0, %v1045_v18  ;;  %3994 = vmatmul.msk.f32.gmra.mxu2 %vm83_vm0, %v1296_v13  ;;  %v4322_v18 = vld [vmem:[%s6799_s10] ss:$0 sm:$0xff] }
 0x496   :  { %v851_v39 = vpop.f32.mrf.mxu2 }
 0x498   :  { %v619_v49 = vpop.f32.mrf.mxu0 }
 0x499   :  { %635 = vst.msk [vmem:[#allocation2 + $0x8] sm:$0xff] %vm449_vm7, %v619_v49 }
 0x4a6   :  { %v854_v53 = vpop.f32.mrf.mxu2 }
 0x4a8   :  { %v622_v14 = vpop.f32.mrf.mxu0 }
 0x4a9   :  { %636 = vst.msk [vmem:[#allocation2 + $0x10] sm:$0xff] %vm449_vm7, %v622_v14 }
 0x4ae   :  { %v857_v24 = vpop.f32.mrf.mxu2 }
 0x4b0   :  { %v625_v8 = vpop.f32.mrf.mxu0 }
 0x4b1   :  { %637 = vst.msk [vmem:[#allocation2 + $0x18] sm:$0xff] %vm449_vm7, %v625_v8 }
 0x4b6   :  { %v860_v45 = vpop.f32.mrf.mxu2 }
 0x4b8   :  { %v628_v48 = vpop.f32.mrf.mxu0 }
 0x4b9   :  { %638 = vst.msk [vmem:[#allocation2 + $0x20] sm:$0xff] %vm449_vm7, %v628_v48 }
 0x4be   :  { %v863_v51 = vpop.f32.mrf.mxu2 }
 0x4c0   :  { %v631_v9 = vpop.f32.mrf.mxu0 }
 0x4c1   :  { %639 = vst.msk [vmem:[#allocation2 + $0x28] sm:$0xff] %vm449_vm7, %v631_v9 }
 0x4c8   :  { %v1099_v1 = vpop.f32.mrf.mxu0 }
 0x4c9   :  { %1123 = vrot.lane.b32.xlu2 %v1099_v1, %s6821_s27 }
 0x4cf   :  { %v1350_v30 = vpop.f32.mrf.mxu1 }
 0x4d0   :  { %v1102_v7 = vpop.f32.mrf.mxu0  ;;  %1374 = vrot.lane.b32.xlu0 %v1350_v30, %s4639_s23 }
 0x4d1   :  { %1125 = vrot.lane.b32.xlu1 %v1102_v7, %s6821_s27 }
 0x4d8   :  { %v1105_v44 = vpop.f32.mrf.mxu0  ;;  %874 = vrot.lane.b32.xlu0 %v851_v39, %s6819_s26 }
 0x4d9   :  { %1127 = vrot.lane.b32.xlu1 %v1105_v44, %s6821_s27 }
 0x4e0   :  { %v1108_v56 = vpop.f32.mrf.mxu0  ;;  %876 = vrot.lane.b32.xlu0 %v854_v53, %s6819_s26 }
 0x4e1   :  { %1129 = vrot.lane.b32.xlu1 %v1108_v56, %s6821_s27 }
 0x4e4   :  { %v873_v0 = vpop.permute.xlu1 %872 }
 0x4e5   :  { %891 = vst.msk [vmem:[#allocation2] sm:$0xff] %vm890_vm8, %v873_v0 }
 0x4e8   :  { %878 = vrot.lane.b32.xlu0 %v857_v24, %s6819_s26 }
 0x4f0   :  { %880 = vrot.lane.b32.xlu0 %v860_v45, %s6819_s26 }
 0x4f8   :  { %882 = vrot.lane.b32.xlu0 %v863_v51, %s6819_s26 }
 0x4fc   :  { %v1356_v50 = vpop.f32.mrf.mxu2 }
 0x4fe   :  { %v1353_v3 = vpop.f32.mrf.mxu1 }
 0x4ff   :  { %v1111_v40 = vpop.f32.mrf.mxu0  ;;  %1376 = vrot.lane.b32.xlu2 %v1353_v3, %s4639_s23 }
 0x500   :  { %1131 = vrot.lane.b32.xlu1 %v1111_v40, %s6821_s27 }
 0x504   :  { %v1359_v27 = vpop.f32.mrf.mxu2 }
 0x507   :  { %1378 = vrot.lane.b32.xlu2 %v1356_v50, %s4639_s23 }
 0x50c   :  { %v1362_v62 = vpop.f32.mrf.mxu2 }
 0x50e   :  { %v1114_v57 = vpop.f32.mrf.mxu0 }
 0x50f   :  { %1133 = vrot.lane.b32.xlu1 %v1114_v57, %s6821_s27  ;;  %1380 = vrot.lane.b32.xlu2 %v1359_v27, %s4639_s23 }
 0x514   :  { %v1365_v37 = vpop.f32.mrf.mxu2 }
 0x517   :  { %1382 = vrot.lane.b32.xlu2 %v1362_v62, %s4639_s23 }
 0x51f   :  { %1384 = vrot.lane.b32.xlu2 %v1365_v37, %s4639_s23 }
 0x523   :  { %v1124_v41 = vpop.permute.xlu2 %1123 }
 0x524   :  { %1142 = vst.msk [vmem:[#allocation2] sm:$0xff] %vm1141_vm9, %v1124_v41 }
 0x542   :  { %v1375_v6 = vpop.permute.xlu0 %1374 }
 0x543   :  { %1393 = vst.msk [vmem:[#allocation2] sm:$0xff] %vm1392_vm10, %v1375_v6  ;;  %v1126_v15 = vpop.permute.xlu1 %1125 }
 0x54a   :  { %v875_v52 = vpop.permute.xlu0 %874  ;;  %v1399_v59 = vld [vmem:[#allocation2] sm:$0xff] }
 0x54b   :  { %892 = vst.msk [vmem:[#allocation2 + $0x8] sm:$0xff] %vm890_vm8, %v875_v52  ;;  %3995 = vmatmul.msk.f32.vlgmr.msrb.gmra.mxu3 %vm145_vm1, %v1399_v59  ;;  %v1128_v38 = vpop.permute.xlu1 %1127 }
 0x54c   :  { %1143 = vst.msk [vmem:[#allocation2 + $0x8] sm:$0xff] %vm1141_vm9, %v1126_v15 }
 0x552   :  { %v877_v63 = vpop.permute.xlu0 %876 }
 0x553   :  { %893 = vst.msk [vmem:[#allocation2 + $0x10] sm:$0xff] %vm890_vm8, %v877_v63  ;;  %v1130_v16 = vpop.permute.xlu1 %1129  ;;  %v1665_v63 = vld [vmem:[%s6802_s13 + $0x78] sm:$0xff] }
 0x554   :  { %1144 = vst.msk [vmem:[#allocation2 + $0x10] sm:$0xff] %vm1141_vm9, %v1128_v38  ;;  %v1664_v38 = vld [vmem:[%s6802_s13 + $0x70] sm:$0xff]  ;;  %1733 = vmatpush.msra.mxu1 %v1665_v63 }
 0x555   :  { %1698 = vmatpush.msrb.mxu0 %v1664_v38 }
 0x559   :  { %v1377_v58 = vpop.permute.xlu2 %1376 }
 0x55a   :  { %1394 = vst.msk [vmem:[#allocation2 + $0x8] sm:$0xff] %vm1392_vm10, %v1377_v58  ;;  %v879_v4 = vpop.permute.xlu0 %878  ;;  %v1663_v58 = vld [vmem:[%s6802_s13 + $0x68] sm:$0xff] }
 0x55b   :  { %894 = vst.msk [vmem:[#allocation2 + $0x18] sm:$0xff] %vm890_vm8, %v879_v4  ;;  %1734 = vmatpush.msra.mxu1 %v1663_v58  ;;  %v1660_v4 = vld [vmem:[%s6802_s13 + $0x50] sm:$0xff] }
 0x55c   :  { %1145 = vst.msk [vmem:[#allocation2 + $0x18] sm:$0xff] %vm1141_vm9, %v1130_v16  ;;  %v1661_v16 = vld [vmem:[%s6802_s13 + $0x58] sm:$0xff] }
 0x55d   :  { %1735 = vmatpush.msra.mxu1 %v1661_v16 }
 0x561   :  { %v1379_v55 = vpop.permute.xlu2 %1378  ;;  %v1400_v5 = vld [vmem:[#allocation2 + $0x8] sm:$0xff] }
 0x562   :  { %1395 = vst.msk [vmem:[#allocation2 + $0x10] sm:$0xff] %vm1392_vm10, %v1379_v55  ;;  %3996 = vmatmul.msk.f32.gmra.mxu3 %vm145_vm1, %v1400_v5  ;;  %v881_v2 = vpop.permute.xlu0 %880  ;;  %v1658_v55 = vld [vmem:[%s6802_s13 + $0x40] sm:$0xff]  ;;  %v1659_v5 = vld [vmem:[%s6802_s13 + $0x48] sm:$0xff] }
 0x563   :  { %895 = vst.msk [vmem:[#allocation2 + $0x20] sm:$0xff] %vm890_vm8, %v881_v2  ;;  %1736 = vmatpush.msra.mxu1 %v1659_v5  ;;  %v1656_v2 = vld [vmem:[%s6802_s13 + $0x30] sm:$0xff] }
 0x569   :  { %v1381_v36 = vpop.permute.xlu2 %1380  ;;  %v1401_v34 = vld [vmem:[#allocation2 + $0x10] sm:$0xff] }
 0x56a   :  { %1396 = vst.msk [vmem:[#allocation2 + $0x18] sm:$0xff] %vm1392_vm10, %v1381_v36  ;;  %v883_v19 = vpop.permute.xlu0 %882  ;;  %3997 = vmatmul.msk.f32.gmra.mxu3 %vm145_vm1, %v1401_v34  ;;  %v1657_v36 = vld [vmem:[%s6802_s13 + $0x38] sm:$0xff]  ;;  %v1654_v34 = vld [vmem:[%s6802_s13 + $0x20] sm:$0xff] }
 0x56b   :  { %896 = vst.msk [vmem:[#allocation2 + $0x28] sm:$0xff] %vm890_vm8, %v883_v19  ;;  %1737 = vmatpush.msra.mxu1 %v1657_v36  ;;  %v1655_v19 = vld [vmem:[%s6802_s13 + $0x28] sm:$0xff] }
 0x56d   :  { %1738 = vmatpush.msra.mxu1 %v1655_v19 }
 0x571   :  { %v1402_v20 = vld [vmem:[#allocation2 + $0x18] sm:$0xff]  ;;  %v1383_v12 = vpop.permute.xlu2 %1382 }
 0x572   :  { %v1132_v23 = vpop.permute.xlu1 %1131  ;;  %3998 = vmatmul.msk.f32.gmra.mxu3 %vm145_vm1, %v1402_v20  ;;  %v1652_v20 = vld [vmem:[%s6802_s13 + $0x10] sm:$0xff] }
 0x573   :  { %1146 = vst.msk [vmem:[#allocation2 + $0x20] sm:$0xff] %vm1141_vm9, %v1132_v23  ;;  %v1653_v23 = vld [vmem:[%s6802_s13 + $0x18] sm:$0xff] }
 0x574   :  { %1397 = vst.msk [vmem:[#allocation2 + $0x20] sm:$0xff] %vm1392_vm10, %v1383_v12  ;;  %1739 = vmatpush.msra.mxu1 %v1653_v23 }
 0x579   :  { %v1385_v60 = vpop.permute.xlu2 %1384 }
 0x57b   :  { %v1403_v47 = vld [vmem:[#allocation2 + $0x20] sm:$0xff] }
 0x57c   :  { %3999 = vmatmul.msk.f32.gmra.mxu3 %vm145_vm1, %v1403_v47  ;;  %v1650_v47 = vld [vmem:[%s6802_s13] sm:$0xff] }
 0x581   :  { %v1134_v32 = vpop.permute.xlu1 %1133 }
 0x582   :  { %1147 = vst.msk [vmem:[#allocation2 + $0x28] sm:$0xff] %vm1141_vm9, %v1134_v32  ;;  %v1651_v32 = vld [vmem:[%s6802_s13 + $0x8] sm:$0xff] }
 0x583   :  { %1398 = vst.msk [vmem:[#allocation2 + $0x28] sm:$0xff] %vm1392_vm10, %v1385_v60  ;;  %1740 = vmatpush.msra.mxu1 %v1651_v32 }
 0x58a   :  { %v1404_v21 = vld [vmem:[#allocation2 + $0x28] sm:$0xff] }
 0x58b   :  { %4000 = vmatmul.msk.f32.gmra.mxu3 %vm145_vm1, %v1404_v21 }
 0x5ce   :  { %v1452_v13 = vpop.f32.mrf.mxu3 }
 0x5cf   :  { %v1453_v49 = vadd.f32 %v4321_v33, %v1452_v13 }
 0x5d1   :  { %v1474_v14 = vmul.f32 %v4322_v18, %v1453_v49 }
 0x5d3   :  { %v5532_v8 = vadd.f32 %v1474_v14, %v4822_v31 }
 0x5d5   :  { %v1488_v48 = vsel %vm145_vm1, %v5532_v8, 0.0  ;;  %v1512_v9 = vmul.f32 %v5532_v8, %v5532_v8 }
 0x5d6   :  { %1489 = vadd.xlane.f32.xlu0 %v1488_v48 }
 0x5d7   :  { %v1518_v1 = vsel %vm145_vm1, %v1512_v9, 0.0 }
 0x5d8   :  { %1519 = vadd.xlane.f32.xlu1 %v1518_v1 }
 0x5e5   :  { %v1455_v30 = vpop.f32.mrf.mxu3 }
 0x5e6   :  { %v1456_v7 = vadd.f32 %v4321_v33, %v1455_v30 }
 0x5e8   :  { %v1475_v39 = vmul.f32 %v4322_v18, %v1456_v7  ;;  %v5632_v7 = vld [vmem:[%s6800_s11] ss:$0 sm:$0xff] }
 0x5ea   :  { %v5540_v44 = vadd.f32 %v1475_v39, %v4829_v35 }
 0x5ec   :  { %v1491_v31 = vsel %vm145_vm1, %v5540_v44, 0.0  ;;  %v1513_v53 = vmul.f32 %v5540_v44, %v5540_v44 }
 0x5ed   :  { %v1458_v56 = vpop.f32.mrf.mxu3  ;;  %1492 = vadd.xlane.f32.xlu2 %v1491_v31 }
 0x5ee   :  { %v1459_v24 = vadd.f32 %v4321_v33, %v1458_v56  ;;  %v1521_v0 = vsel %vm145_vm1, %v1513_v53, 0.0 }
 0x5ef   :  { %1522 = vadd.xlane.f32.xlu0 %v1521_v0 }
 0x5f0   :  { %v1476_v45 = vmul.f32 %v4322_v18, %v1459_v24 }
 0x5f2   :  { %v5548_v51 = vadd.f32 %v1476_v45, %v4843_v43 }
 0x5f4   :  { %v1494_v35 = vsel %vm145_vm1, %v5548_v51, 0.0  ;;  %v1514_v3 = vmul.f32 %v5548_v51, %v5548_v51 }
 0x5f5   :  { %1495 = vadd.xlane.f32.xlu1 %v1494_v35  ;;  %v1461_v40 = vpop.f32.mrf.mxu3 }
 0x5f6   :  { %v1462_v50 = vadd.f32 %v4321_v33, %v1461_v40  ;;  %v1524_v54 = vsel %vm145_vm1, %v1514_v3, 0.0  ;;  %v5641_v40 = vld [vmem:[%s6801_s12] ss:$0 sm:$0xff] }
 0x5f7   :  { %1525 = vadd.xlane.f32.xlu2 %v1524_v54 }
 0x5f8   :  { %v1477_v25 = vmul.f32 %v4322_v18, %v1462_v50 }
 0x5fa   :  { %v5556_v26 = vadd.f32 %v1477_v25, %v4795_v17 }
 0x5fc   :  { %v1497_v43 = vsel %vm145_vm1, %v5556_v26, 0.0  ;;  %v1515_v42 = vmul.f32 %v5556_v26, %v5556_v26 }
 0x5fd   :  { %1498 = vadd.xlane.f32.xlu0 %v1497_v43 }
 0x5fe   :  { %v1527_v27 = vsel %vm145_vm1, %v1515_v42, 0.0 }
 0x5ff   :  { %1528 = vadd.xlane.f32.xlu1 %v1527_v27  ;;  %v1464_v57 = vpop.f32.mrf.mxu3 }
 0x600   :  { %v1465_v62 = vadd.f32 %v4321_v33, %v1464_v57 }
 0x602   :  { %v1478_v37 = vmul.f32 %v4322_v18, %v1465_v62 }
 0x604   :  { %v5564_v41 = vadd.f32 %v1478_v37, %v4804_v22 }
 0x606   :  { %v1500_v17 = vsel %vm145_vm1, %v5564_v41, 0.0  ;;  %v1516_v10 = vmul.f32 %v5564_v41, %v5564_v41 }
 0x607   :  { %1501 = vadd.xlane.f32.xlu2 %v1500_v17 }
 0x608   :  { %v1530_v11 = vsel %vm145_vm1, %v1516_v10, 0.0 }
 0x609   :  { %1531 = vadd.xlane.f32.xlu0 %v1530_v11 }
 0x60e   :  { %v1467_v28 = vpop.f32.mrf.mxu3 }
 0x60f   :  { %v1468_v46 = vadd.f32 %v4321_v33, %v1467_v28 }
 0x611   :  { %v1479_v6 = vmul.f32 %v4322_v18, %v1468_v46 }
 0x613   :  { %v5572_v15 = vadd.f32 %v1479_v6, %v4817_v29  ;;  %v1662_v29 = vld [vmem:[%s6802_s13 + $0x60] sm:$0xff] }
 0x614   :  { %1699 = vmatpush.msrb.mxu0 %v1662_v29 }
 0x615   :  { %v1503_v22 = vsel %vm145_vm1, %v5572_v15, 0.0  ;;  %v1517_v52 = vmul.f32 %v5572_v15, %v5572_v15 }
 0x616   :  { %1504 = vadd.xlane.f32.xlu1 %v1503_v22  ;;  %1700 = vmatpush.msrb.mxu0 %v1660_v4 }
 0x617   :  { %v1533_v59 = vsel %vm145_vm1, %v1517_v52, 0.0 }
 0x618   :  { %1534 = vadd.xlane.f32.xlu2 %v1533_v59  ;;  %1701 = vmatpush.msrb.mxu0 %v1658_v55 }
 0x61a   :  { %1702 = vmatpush.msrb.mxu0 %v1656_v2 }
 0x61c   :  { %1703 = vmatpush.msrb.mxu0 %v1654_v34 }
 0x61e   :  { %1704 = vmatpush.msrb.mxu0 %v1652_v20 }
 0x620   :  { %1705 = vmatpush.msrb.mxu0 %v1650_v47 }
 0x649   :  { %v1490_v12 = vpop.xlane.xlu0 %1489 }
 0x64a   :  { %v1506_v60 = vmul.f32 %v1490_v12, %v4870_v61 }
 0x64b   :  { %v1520_v21 = vpop.xlane.xlu1 %1519 }
 0x64c   :  { %v1542_v33 = vmul.f32 %v1506_v60, %v1506_v60  ;;  %v1536_v18 = vmul.f32 %v1520_v21, %v4870_v61  ;;  %v1554_v35 = vsub.f32 %v5532_v8, %v1506_v60 }
 0x64e   :  { %v1548_v13 = vsub.f32 %v1536_v18, %v1542_v33 }
 0x650   :  { %v1560_v49 = vadd.f32 1e-06, %v1548_v13 }
 0x652   :  { %4445 = vrsqrt.f32 %v1560_v49  ;;  %vm1572_vm12 = vweird.f32 %v1560_v49 }
 0x658   :  { %v4446_v14 = vpop.eup %4445 }
 0x659   :  { %v1567_v48 = vmul.f32 %v4446_v14, %v1560_v49  ;;  %vm1573_vm11 = vweird.f32 %v4446_v14 }
 0x65a   :  { %vm1574_vm13 = vmor %vm1572_vm12, %vm1573_vm11 }
 0x65b   :  { %v1568_v9 = vmul.f32 %v4446_v14, %v1567_v48 }
 0x65d   :  { %v1569_v1 = vmul.f32 0.5, %v1568_v9 }
 0x65f   :  { %v1570_v30 = vsub.f32 1.5, %v1569_v1 }
 0x660   :  { %v1493_v39 = vpop.xlane.xlu2 %1492 }
 0x661   :  { %v1571_v31 = vmul.f32 %v4446_v14, %v1570_v30  ;;  %v1507_v53 = vmul.f32 %v1493_v39, %v4870_v61 }
 0x662   :  { %v1523_v56 = vpop.xlane.xlu0 %1522 }
 0x663   :  { %v1575_v24 = vsel %vm1574_vm13, %v4446_v14, %v1571_v31  ;;  %v1543_v0 = vmul.f32 %v1507_v53, %v1507_v53  ;;  %v1537_v45 = vmul.f32 %v1523_v56, %v4870_v61  ;;  %v1555_v19 = vsub.f32 %v5540_v44, %v1507_v53 }
 0x664   :  { %v1629_v3 = vmul.f32 %v5632_v7, %v1575_v24 }
 0x665   :  { %v1549_v50 = vsub.f32 %v1537_v45, %v1543_v0 }
 0x666   :  { %v1635_v54 = vmul.f32 %v1629_v3, %v1554_v35 }
 0x667   :  { %v1561_v25 = vadd.f32 1e-06, %v1549_v50 }
 0x668   :  { %v1496_v43 = vpop.xlane.xlu1 %1495  ;;  %v1644_v42 = vadd.f32 %v5641_v40, %v1635_v54 }
 0x669   :  { %4447 = vrsqrt.f32 %v1561_v25  ;;  %v1508_v27 = vmul.f32 %v1496_v43, %v4870_v61  ;;  %vm1582_vm15 = vweird.f32 %v1561_v25  ;;  %v1883_v43 = vld [vmem:[%s6803_s15 + $0x78] sm:$0xff] }
 0x66a   :  { %4001 = vmatmul.msk.f32.vlgmr.msrb.gmra.mxu0 %vm145_vm1, %v1644_v42  ;;  %4007 = vmatmul.msk.f32.vlgmr.msra.gmra.mxu1 %vm145_vm1, %v1644_v42  ;;  %v1526_v57 = vpop.xlane.xlu2 %1525  ;;  %v1899_v42 = vld [vmem:[%s6803_s15 + $0xf8] sm:$0xff] }
 0x66b   :  { %v1544_v62 = vmul.f32 %v1508_v27, %v1508_v27  ;;  %v1538_v37 = vmul.f32 %v1526_v57, %v4870_v61  ;;  %v1556_v39 = vsub.f32 %v5548_v51, %v1508_v27  ;;  %v1882_v27 = vld [vmem:[%s6803_s15 + $0x70] sm:$0xff]  ;;  %1904 = vmatpush.msrb.mxu2 %v1883_v43  ;;  %1939 = vmatpush.msra.mxu3 %v1899_v42  ;;  %v1869_v43 = vld [vmem:[%s6803_s15 + $0x8] sm:$0xff] }
 0x66c   :  { %v1885_v42 = vld [vmem:[%s6803_s15 + $0x88] sm:$0xff] }
 0x66d   :  { %v1550_v17 = vsub.f32 %v1538_v37, %v1544_v62  ;;  %1905 = vmatpush.msrb.mxu2 %v1882_v27  ;;  %v1868_v27 = vld [vmem:[%s6803_s15] sm:$0xff] }
 0x66f   :  { %v4448_v10 = vpop.eup %4447  ;;  %v1562_v11 = vadd.f32 1e-06, %v1550_v17  ;;  %v1898_v17 = vld [vmem:[%s6803_s15 + $0xf0] sm:$0xff] }
 0x670   :  { %v1577_v28 = vmul.f32 %v4448_v10, %v1561_v25  ;;  %v1499_v46 = vpop.xlane.xlu0 %1498  ;;  %vm1583_vm14 = vweird.f32 %v4448_v10  ;;  %1940 = vmatpush.msra.mxu3 %v1898_v17 }
 0x671   :  { %4449 = vrsqrt.f32 %v1562_v11  ;;  %v5649_v6 = vmul.f32 %v1499_v46, %v4870_v61  ;;  %vm1584_vm2 = vmor %vm1582_vm15, %vm1583_vm14  ;;  %vm1592_vm4 = vweird.f32 %v1562_v11  ;;  %v1881_v46 = vld [vmem:[%s6803_s15 + $0x68] sm:$0xff] }
 0x672   :  { %v1578_v22 = vmul.f32 %v4448_v10, %v1577_v28  ;;  %v1529_v52 = vpop.xlane.xlu1 %1528  ;;  %1906 = vmatpush.msrb.mxu2 %v1881_v46 }
 0x673   :  { %v1545_v59 = vmul.f32 %v5649_v6, %v5649_v6  ;;  %v1539_v38 = vmul.f32 %v1529_v52, %v4870_v61  ;;  %v1557_v57 = vsub.f32 %v5556_v26, %v5649_v6  ;;  %v1897_v6 = vld [vmem:[%s6803_s15 + $0xe8] sm:$0xff] }
 0x674   :  { %v1579_v63 = vmul.f32 0.5, %v1578_v22  ;;  %1941 = vmatpush.msra.mxu3 %v1897_v6 }
 0x675   :  { %v1551_v29 = vsub.f32 %v1539_v38, %v1545_v59 }
 0x676   :  { %v1580_v58 = vsub.f32 1.5, %v1579_v63 }
 0x677   :  { %v4450_v4 = vpop.eup %4449  ;;  %v1563_v16 = vadd.f32 1e-06, %v1551_v29 }
 0x678   :  { %v1581_v55 = vmul.f32 %v4448_v10, %v1580_v58  ;;  %v1587_v5 = vmul.f32 %v4450_v4, %v1562_v11  ;;  %vm1593_vm3 = vweird.f32 %v4450_v4 }
 0x679   :  { %4451 = vrsqrt.f32 %v1563_v16  ;;  %vm1594_vm5 = vmor %vm1592_vm4, %vm1593_vm3  ;;  %vm1602_vm11 = vweird.f32 %v1563_v16 }
 0x67a   :  { %v1588_v2 = vmul.f32 %v4450_v4, %v1587_v5  ;;  %v1502_v36 = vpop.xlane.xlu2 %1501  ;;  %v1585_v34 = vsel %vm1584_vm2, %v4448_v10, %v1581_v55 }
 0x67b   :  { %v5656_v20 = vmul.f32 %v1502_v36, %v4870_v61  ;;  %v1630_v23 = vmul.f32 %v5632_v7, %v1585_v34 }
 0x67c   :  { %v1589_v12 = vmul.f32 0.5, %v1588_v2  ;;  %v1532_v47 = vpop.xlane.xlu0 %1531 }
 0x67d   :  { %v1546_v32 = vmul.f32 %v5656_v20, %v5656_v20  ;;  %v1540_v60 = vmul.f32 %v1532_v47, %v4870_v61  ;;  %v1636_v21 = vmul.f32 %v1630_v23, %v1555_v19 }
 0x67e   :  { %v1590_v33 = vsub.f32 1.5, %v1589_v12 }
 0x67f   :  { %v4452_v18 = vpop.eup %4451  ;;  %v1552_v13 = vsub.f32 %v1540_v60, %v1546_v32  ;;  %v1645_v49 = vadd.f32 %v5641_v40, %v1636_v21 }
 0x680   :  { %v1597_v14 = vmul.f32 %v4452_v18, %v1563_v16  ;;  %v1591_v48 = vmul.f32 %v4450_v4, %v1590_v33  ;;  %vm1603_vm6 = vweird.f32 %v4452_v18  ;;  %v1558_v16 = vsub.f32 %v5564_v41, %v5656_v20 }
 0x681   :  { %v1564_v9 = vadd.f32 1e-06, %v1552_v13  ;;  %4002 = vmatmul.msk.f32.gmra.mxu0 %vm145_vm1, %v1645_v49  ;;  %4008 = vmatmul.msk.f32.gmra.mxu1 %vm145_vm1, %v1645_v49  ;;  %vm1604_vm12 = vmor %vm1602_vm11, %vm1603_vm6  ;;  %v1896_v13 = vld [vmem:[%s6803_s15 + $0xe0] sm:$0xff]  ;;  %v1878_v49 = vld [vmem:[%s6803_s15 + $0x50] sm:$0xff] }
 0x682   :  { %v1598_v1 = vmul.f32 %v4452_v18, %v1597_v14  ;;  %v1595_v30 = vsel %vm1594_vm5, %v4450_v4, %v1591_v48  ;;  %1942 = vmatpush.msra.mxu3 %v1896_v13  ;;  %v1894_v14 = vld [vmem:[%s6803_s15 + $0xd0] sm:$0xff]  ;;  %v1877_v48 = vld [vmem:[%s6803_s15 + $0x48] sm:$0xff] }
 0x683   :  { %4453 = vrsqrt.f32 %v1564_v9  ;;  %v1631_v31 = vmul.f32 %v5632_v7, %v1595_v30  ;;  %vm1612_vm14 = vweird.f32 %v1564_v9  ;;  %v1892_v30 = vld [vmem:[%s6803_s15 + $0xc0] sm:$0xff] }
 0x684   :  { %v1599_v53 = vmul.f32 0.5, %v1598_v1  ;;  %v1876_v1 = vld [vmem:[%s6803_s15 + $0x40] sm:$0xff] }
 0x685   :  { %v1637_v56 = vmul.f32 %v1631_v31, %v1556_v39  ;;  %v1875_v39 = vld [vmem:[%s6803_s15 + $0x38] sm:$0xff] }
 0x686   :  { %v1600_v24 = vsub.f32 1.5, %v1599_v53  ;;  %v1891_v31 = vld [vmem:[%s6803_s15 + $0xb8] sm:$0xff]  ;;  %v1874_v53 = vld [vmem:[%s6803_s15 + $0x30] sm:$0xff] }
 0x687   :  { %v1646_v0 = vadd.f32 %v5641_v40, %v1637_v56  ;;  %v1890_v56 = vld [vmem:[%s6803_s15 + $0xb0] sm:$0xff] }
 0x688   :  { %v1601_v45 = vmul.f32 %v4452_v18, %v1600_v24  ;;  %v1873_v24 = vld [vmem:[%s6803_s15 + $0x28] sm:$0xff] }
 0x689   :  { %v4454_v35 = vpop.eup %4453  ;;  %v1505_v3 = vpop.xlane.xlu1 %1504  ;;  %4003 = vmatmul.msk.f32.gmra.mxu0 %vm145_vm1, %v1646_v0  ;;  %4009 = vmatmul.msk.f32.gmra.mxu1 %vm145_vm1, %v1646_v0  ;;  %v1889_v0 = vld [vmem:[%s6803_s15 + $0xa8] sm:$0xff] }
 0x68a   :  { %v1607_v50 = vmul.f32 %v4454_v35, %v1564_v9  ;;  %v1511_v54 = vmul.f32 %v1505_v3, %v4870_v61  ;;  %v1605_v25 = vsel %vm1604_vm12, %v4452_v18, %v1601_v45  ;;  %vm1613_vm13 = vweird.f32 %v4454_v35  ;;  %v1880_v18 = vld [vmem:[%s6803_s15 + $0x60] sm:$0xff]  ;;  %v1893_v9 = vld [vmem:[%s6803_s15 + $0xc8] sm:$0xff]  ;;  %v1871_v3 = vld [vmem:[%s6803_s15 + $0x18] sm:$0xff] }
 0x68b   :  { %v1535_v62 = vpop.xlane.xlu2 %1534  ;;  %v1632_v37 = vmul.f32 %v5632_v7, %v1605_v25  ;;  %vm1614_vm15 = vmor %vm1612_vm14, %vm1613_vm13  ;;  %1907 = vmatpush.msrb.mxu2 %v1880_v18  ;;  %v1872_v45 = vld [vmem:[%s6803_s15 + $0x20] sm:$0xff]  ;;  %v1886_v25 = vld [vmem:[%s6803_s15 + $0x90] sm:$0xff] }
 0x68c   :  { %v1608_v10 = vmul.f32 %v4454_v35, %v1607_v50  ;;  %v1547_v11 = vmul.f32 %v1511_v54, %v1511_v54  ;;  %v1541_v28 = vmul.f32 %v1535_v62, %v4870_v61  ;;  %v1559_v20 = vsub.f32 %v5572_v15, %v1511_v54  ;;  %v1887_v50 = vld [vmem:[%s6803_s15 + $0x98] sm:$0xff]  ;;  %v1870_v54 = vld [vmem:[%s6803_s15 + $0x10] sm:$0xff]  ;;  %v1666_v62 = vld [vmem:[%s6805_s14] sm:$0x3] }
 0x68d   :  { %v1638_v22 = vmul.f32 %v1632_v37, %v1557_v57  ;;  %v1884_v57 = vld [vmem:[%s6803_s15 + $0x80] sm:$0xff]  ;;  %v5788_v37 = vperm.slane %v1666_v62, 0  ;;  %v5790_v17 = vperm.slane %v1666_v62, 1 }
 0x68e   :  { %v1609_v52 = vmul.f32 0.5, %v1608_v10  ;;  %v1553_v59 = vsub.f32 %v1541_v28, %v1547_v11 }
 0x68f   :  { %v1647_v38 = vadd.f32 %v5641_v40, %v1638_v22 }
 0x690   :  { %v1610_v63 = vsub.f32 1.5, %v1609_v52  ;;  %v1565_v29 = vadd.f32 1e-06, %v1553_v59 }
 0x691   :  { %4004 = vmatmul.msk.f32.gmra.mxu0 %vm145_vm1, %v1647_v38  ;;  %4010 = vmatmul.msk.f32.gmra.mxu1 %vm145_vm1, %v1647_v38 }
 0x692   :  { %v1611_v58 = vmul.f32 %v4454_v35, %v1610_v63  ;;  %4455 = vrsqrt.f32 %v1565_v29  ;;  %vm1622_vm3 = vweird.f32 %v1565_v29 }
 0x694   :  { %v1615_v4 = vsel %vm1614_vm15, %v4454_v35, %v1611_v58  ;;  %v1888_v35 = vld [vmem:[%s6803_s15 + $0xa0] sm:$0xff] }
 0x695   :  { %v1633_v55 = vmul.f32 %v5632_v7, %v1615_v4 }
 0x697   :  { %v1639_v5 = vmul.f32 %v1633_v55, %v1558_v16 }
 0x698   :  { %v4456_v2 = vpop.eup %4455 }
 0x699   :  { %v1617_v36 = vmul.f32 %v4456_v2, %v1565_v29  ;;  %v1648_v34 = vadd.f32 %v5641_v40, %v1639_v5  ;;  %vm1623_vm2 = vweird.f32 %v4456_v2 }
 0x69a   :  { %vm1624_vm4 = vmor %vm1622_vm3, %vm1623_vm2 }
 0x69b   :  { %v1618_v19 = vmul.f32 %v4456_v2, %v1617_v36  ;;  %4005 = vmatmul.msk.f32.gmra.mxu0 %vm145_vm1, %v1648_v34  ;;  %4011 = vmatmul.msk.f32.gmra.mxu1 %vm145_vm1, %v1648_v34 }
 0x69d   :  { %v1619_v23 = vmul.f32 0.5, %v1618_v19 }
 0x69f   :  { %v1620_v12 = vsub.f32 1.5, %v1619_v23 }
 0x6a1   :  { %v1621_v47 = vmul.f32 %v4456_v2, %v1620_v12 }
 0x6a3   :  { %v1625_v32 = vsel %vm1624_vm4, %v4456_v2, %v1621_v47 }
 0x6a4   :  { %v1634_v60 = vmul.f32 %v5632_v7, %v1625_v32  ;;  %v1879_v7 = vld [vmem:[%s6803_s15 + $0x58] sm:$0xff] }
 0x6a5   :  { %1908 = vmatpush.msrb.mxu2 %v1879_v7 }
 0x6a6   :  { %v1640_v21 = vmul.f32 %v1634_v60, %v1559_v20 }
 0x6a7   :  { %1909 = vmatpush.msrb.mxu2 %v1878_v49 }
 0x6a8   :  { %v1649_v33 = vadd.f32 %v5641_v40, %v1640_v21  ;;  %v1895_v40 = vld [vmem:[%s6803_s15 + $0xd8] sm:$0xff] }
 0x6a9   :  { %1943 = vmatpush.msra.mxu3 %v1895_v40  ;;  %1910 = vmatpush.msrb.mxu2 %v1877_v48 }
 0x6aa   :  { %4006 = vmatmul.msk.f32.gmra.mxu0 %vm145_vm1, %v1649_v33  ;;  %4012 = vmatmul.msk.f32.gmra.mxu1 %vm145_vm1, %v1649_v33 }
 0x6ab   :  { %1944 = vmatpush.msra.mxu3 %v1894_v14  ;;  %1911 = vmatpush.msrb.mxu2 %v1876_v1 }
 0x6ad   :  { %1945 = vmatpush.msra.mxu3 %v1893_v9  ;;  %1912 = vmatpush.msrb.mxu2 %v1875_v39 }
 0x6af   :  { %1946 = vmatpush.msra.mxu3 %v1892_v30  ;;  %1913 = vmatpush.msrb.mxu2 %v1874_v53 }
 0x6b1   :  { %1947 = vmatpush.msra.mxu3 %v1891_v31  ;;  %1914 = vmatpush.msrb.mxu2 %v1873_v24 }
 0x6b3   :  { %1948 = vmatpush.msra.mxu3 %v1890_v56  ;;  %1915 = vmatpush.msrb.mxu2 %v1872_v45 }
 0x6b5   :  { %1949 = vmatpush.msra.mxu3 %v1889_v0  ;;  %1916 = vmatpush.msrb.mxu2 %v1871_v3 }
 0x6b7   :  { %1950 = vmatpush.msra.mxu3 %v1888_v35  ;;  %1917 = vmatpush.msrb.mxu2 %v1870_v54 }
 0x6b9   :  { %1951 = vmatpush.msra.mxu3 %v1887_v50  ;;  %1918 = vmatpush.msrb.mxu2 %v1869_v43 }
 0x6bb   :  { %1952 = vmatpush.msra.mxu3 %v1886_v25  ;;  %1919 = vmatpush.msrb.mxu2 %v1868_v27 }
 0x6bd   :  { %1953 = vmatpush.msra.mxu3 %v1885_v42 }
 0x6bf   :  { %1954 = vmatpush.msra.mxu3 %v1884_v57 }
 0x6e7   :  { %v1707_v10 = vpop.f32.mrf.mxu0  ;;  %v1742_v11 = vpop.f32.mrf.mxu1 }
 0x6e8   :  { %v1708_v28 = vadd.f32 %v1707_v10, %v5788_v37  ;;  %v1743_v46 = vadd.f32 %v1742_v11, %v5790_v17 }
 0x6ea   :  { %v1760_v6 = vmul.f32 %v1708_v28, %v1708_v28  ;;  %v1761_v22 = vmul.f32 %v1743_v46, %v1743_v46 }
 0x6ec   :  { %v1772_v52 = vmul.f32 %v1760_v6, %v1708_v28  ;;  %v1773_v59 = vmul.f32 %v1761_v22, %v1743_v46 }
 0x6ee   :  { %v1784_v38 = vmul.f32 0.044715, %v1772_v52  ;;  %v1785_v63 = vmul.f32 0.044715, %v1773_v59 }
 0x6f0   :  { %v1796_v29 = vadd.f32 %v1784_v38, %v1708_v28  ;;  %v1797_v58 = vadd.f32 %v1785_v63, %v1743_v46 }
 0x6f2   :  { %v1808_v4 = vmul.f32 0.7978846, %v1796_v29  ;;  %v1809_v16 = vmul.f32 0.7978846, %v1797_v58 }
 0x6f4   :  { %4457 = vtanh.f32 %v1808_v4 }
 0x6f5   :  { %4459 = vtanh.f32 %v1809_v16 }
 0x6fa   :  { %v4458_v55 = vpop.eup %4457 }
 0x6fb   :  { %v4460_v5 = vpop.eup %4459  ;;  %v1832_v2 = vadd.f32 1.0, %v4458_v55 }
 0x6fc   :  { %v1833_v36 = vadd.f32 1.0, %v4460_v5 }
 0x6fd   :  { %v1844_v34 = vmul.f32 0.5, %v1832_v2 }
 0x6fe   :  { %v1710_v19 = vpop.f32.mrf.mxu0  ;;  %v1745_v23 = vpop.f32.mrf.mxu1  ;;  %v1845_v12 = vmul.f32 0.5, %v1833_v36 }
 0x6ff   :  { %v1711_v47 = vadd.f32 %v1710_v19, %v5788_v37  ;;  %v1746_v32 = vadd.f32 %v1745_v23, %v5790_v17  ;;  %v1856_v20 = vmul.f32 %v1844_v34, %v1708_v28 }
 0x700   :  { %v1857_v60 = vmul.f32 %v1845_v12, %v1743_v46 }
 0x701   :  { %v1762_v21 = vmul.f32 %v1711_v47, %v1711_v47  ;;  %v1763_v33 = vmul.f32 %v1746_v32, %v1746_v32  ;;  %1920 = vmatmul.f32.vlgmr.msrb.gmra.mxu2 %v1856_v20 }
 0x702   :  { %1955 = vmatmul.f32.vlgmr.msra.gmra.mxu3 %v1857_v60 }
 0x703   :  { %v1774_v18 = vmul.f32 %v1762_v21, %v1711_v47  ;;  %v1775_v13 = vmul.f32 %v1763_v33, %v1746_v32 }
 0x705   :  { %v1786_v7 = vmul.f32 0.044715, %v1774_v18  ;;  %v1787_v40 = vmul.f32 0.044715, %v1775_v13 }
 0x706   :  { %v1713_v49 = vpop.f32.mrf.mxu0  ;;  %v1748_v14 = vpop.f32.mrf.mxu1 }
 0x707   :  { %v1714_v48 = vadd.f32 %v1713_v49, %v5788_v37  ;;  %v1749_v9 = vadd.f32 %v1748_v14, %v5790_v17  ;;  %v1798_v1 = vadd.f32 %v1786_v7, %v1711_v47  ;;  %v1799_v30 = vadd.f32 %v1787_v40, %v1746_v32 }
 0x709   :  { %v1764_v39 = vmul.f32 %v1714_v48, %v1714_v48  ;;  %v1765_v31 = vmul.f32 %v1749_v9, %v1749_v9  ;;  %v1810_v53 = vmul.f32 0.7978846, %v1798_v1  ;;  %v1811_v56 = vmul.f32 0.7978846, %v1799_v30 }
 0x70b   :  { %4461 = vtanh.f32 %v1810_v53  ;;  %v1776_v24 = vmul.f32 %v1764_v39, %v1714_v48  ;;  %v1777_v0 = vmul.f32 %v1765_v31, %v1749_v9 }
 0x70c   :  { %4463 = vtanh.f32 %v1811_v56 }
 0x70d   :  { %v1788_v45 = vmul.f32 0.044715, %v1776_v24  ;;  %v1789_v35 = vmul.f32 0.044715, %v1777_v0 }
 0x70e   :  { %v1716_v3 = vpop.f32.mrf.mxu0  ;;  %v1751_v50 = vpop.f32.mrf.mxu1 }
 0x70f   :  { %v1717_v54 = vadd.f32 %v1716_v3, %v5788_v37  ;;  %v5800_v25 = vadd.f32 %v1751_v50, %v5790_v17  ;;  %v1800_v43 = vadd.f32 %v1788_v45, %v1714_v48  ;;  %v1801_v42 = vadd.f32 %v1789_v35, %v1749_v9 }
 0x711   :  { %v4462_v27 = vpop.eup %4461  ;;  %v1766_v57 = vmul.f32 %v1717_v54, %v1717_v54  ;;  %v1767_v62 = vmul.f32 %v5800_v25, %v5800_v25  ;;  %v1812_v10 = vmul.f32 0.7978846, %v1800_v43  ;;  %v1813_v11 = vmul.f32 0.7978846, %v1801_v42 }
 0x712   :  { %v4464_v28 = vpop.eup %4463  ;;  %v1834_v46 = vadd.f32 1.0, %v4462_v27 }
 0x713   :  { %v1779_v6 = vmul.f32 %v1767_v62, %v5800_v25  ;;  %v1835_v22 = vadd.f32 1.0, %v4464_v28  ;;  %4465 = vtanh.f32 %v1812_v10  ;;  %v1778_v52 = vmul.f32 %v1766_v57, %v1717_v54 }
 0x714   :  { %v1846_v59 = vmul.f32 0.5, %v1834_v46  ;;  %4467 = vtanh.f32 %v1813_v11 }
 0x715   :  { %v1791_v38 = vmul.f32 0.044715, %v1779_v6  ;;  %v1847_v63 = vmul.f32 0.5, %v1835_v22  ;;  %v1790_v29 = vmul.f32 0.044715, %v1778_v52 }
 0x716   :  { %v1858_v58 = vmul.f32 %v1846_v59, %v1711_v47 }
 0x717   :  { %v1859_v4 = vmul.f32 %v1847_v63, %v1746_v32  ;;  %v1802_v16 = vadd.f32 %v1790_v29, %v1717_v54  ;;  %v1803_v55 = vadd.f32 %v1791_v38, %v5800_v25 }
 0x718   :  { %v1719_v5 = vpop.f32.mrf.mxu0  ;;  %v1754_v2 = vpop.f32.mrf.mxu1  ;;  %1923 = vmatmul.f32.gmra.mxu2 %v1858_v58 }
 0x719   :  { %v4466_v36 = vpop.eup %4465  ;;  %v1720_v34 = vadd.f32 %v1719_v5, %v5788_v37  ;;  %v1755_v19 = vadd.f32 %v1754_v2, %v5790_v17  ;;  %1958 = vmatmul.f32.gmra.mxu3 %v1859_v4  ;;  %v1814_v23 = vmul.f32 0.7978846, %v1802_v16  ;;  %v1815_v12 = vmul.f32 0.7978846, %v1803_v55 }
 0x71a   :  { %v4468_v20 = vpop.eup %4467  ;;  %v1836_v60 = vadd.f32 1.0, %v4466_v36 }
 0x71b   :  { %v1768_v21 = vmul.f32 %v1720_v34, %v1720_v34  ;;  %v1769_v33 = vmul.f32 %v1755_v19, %v1755_v19  ;;  %v1837_v47 = vadd.f32 1.0, %v4468_v20  ;;  %4469 = vtanh.f32 %v1814_v23 }
 0x71c   :  { %v1848_v32 = vmul.f32 0.5, %v1836_v60  ;;  %4471 = vtanh.f32 %v1815_v12  ;;  %v4327_v60 = vld [vmem:[%s6806_s17] ss:$0 sm:$0xff] }
 0x71d   :  { %v1781_v18 = vmul.f32 %v1769_v33, %v1755_v19  ;;  %v1849_v13 = vmul.f32 0.5, %v1837_v47  ;;  %v1780_v7 = vmul.f32 %v1768_v21, %v1720_v34 }
 0x71e   :  { %v1860_v40 = vmul.f32 %v1848_v32, %v1714_v48 }
 0x71f   :  { %v1793_v49 = vmul.f32 0.044715, %v1781_v18  ;;  %v1861_v14 = vmul.f32 %v1849_v13, %v1749_v9  ;;  %v1792_v1 = vmul.f32 0.044715, %v1780_v7 }
 0x720   :  { %1926 = vmatmul.f32.gmra.mxu2 %v1860_v40 }
 0x721   :  { %v4470_v30 = vpop.eup %4469  ;;  %1961 = vmatmul.f32.gmra.mxu3 %v1861_v14  ;;  %v1804_v39 = vadd.f32 %v1792_v1, %v1720_v34  ;;  %v1805_v31 = vadd.f32 %v1793_v49, %v1755_v19 }
 0x722   :  { %v4472_v53 = vpop.eup %4471  ;;  %v1838_v56 = vadd.f32 1.0, %v4470_v30 }
 0x723   :  { %v1839_v24 = vadd.f32 1.0, %v4472_v53  ;;  %v1816_v0 = vmul.f32 0.7978846, %v1804_v39  ;;  %v1817_v45 = vmul.f32 0.7978846, %v1805_v31 }
 0x724   :  { %v1850_v35 = vmul.f32 0.5, %v1838_v56 }
 0x725   :  { %v1851_v3 = vmul.f32 0.5, %v1839_v24  ;;  %4473 = vtanh.f32 %v1816_v0 }
 0x726   :  { %v1862_v50 = vmul.f32 %v1850_v35, %v1717_v54  ;;  %4475 = vtanh.f32 %v1817_v45 }
 0x727   :  { %v1722_v43 = vpop.f32.mrf.mxu0  ;;  %v1757_v48 = vpop.f32.mrf.mxu1  ;;  %v1863_v9 = vmul.f32 %v1851_v3, %v5800_v25 }
 0x728   :  { %v1723_v42 = vadd.f32 %v1722_v43, %v5788_v37  ;;  %v1758_v27 = vadd.f32 %v1757_v48, %v5790_v17  ;;  %1929 = vmatmul.f32.gmra.mxu2 %v1862_v50 }
 0x729   :  { %1964 = vmatmul.f32.gmra.mxu3 %v1863_v9 }
 0x72a   :  { %v1770_v57 = vmul.f32 %v1723_v42, %v1723_v42  ;;  %v1771_v62 = vmul.f32 %v1758_v27, %v1758_v27 }
 0x72b   :  { %v4474_v10 = vpop.eup %4473 }
 0x72c   :  { %v4476_v11 = vpop.eup %4475  ;;  %v1782_v28 = vmul.f32 %v1770_v57, %v1723_v42  ;;  %v1783_v46 = vmul.f32 %v1771_v62, %v1758_v27  ;;  %v1840_v6 = vadd.f32 1.0, %v4474_v10 }
 0x72d   :  { %v1841_v22 = vadd.f32 1.0, %v4476_v11 }
 0x72e   :  { %v1795_v54 = vmul.f32 0.044715, %v1783_v46  ;;  %v1852_v52 = vmul.f32 0.5, %v1840_v6  ;;  %v1794_v59 = vmul.f32 0.044715, %v1782_v28 }
 0x72f   :  { %v1853_v38 = vmul.f32 0.5, %v1841_v22 }
 0x730   :  { %v1864_v63 = vmul.f32 %v1852_v52, %v1720_v34  ;;  %v1806_v25 = vadd.f32 %v1794_v59, %v1723_v42  ;;  %v1807_v29 = vadd.f32 %v1795_v54, %v1758_v27  ;;  %v4326_v34 = vld [vmem:[%s6804_s16] ss:$0 sm:$0xff] }
 0x731   :  { %v1865_v37 = vmul.f32 %v1853_v38, %v1755_v19 }
 0x732   :  { %1932 = vmatmul.f32.gmra.mxu2 %v1864_v63  ;;  %v1818_v17 = vmul.f32 0.7978846, %v1806_v25  ;;  %v1819_v58 = vmul.f32 0.7978846, %v1807_v29 }
 0x733   :  { %1967 = vmatmul.f32.gmra.mxu3 %v1865_v37 }
 0x734   :  { %4477 = vtanh.f32 %v1818_v17 }
 0x735   :  { %4479 = vtanh.f32 %v1819_v58 }
 0x73a   :  { %v4478_v4 = vpop.eup %4477 }
 0x73b   :  { %v4480_v16 = vpop.eup %4479  ;;  %v1842_v55 = vadd.f32 1.0, %v4478_v4 }
 0x73c   :  { %v1843_v5 = vadd.f32 1.0, %v4480_v16 }
 0x73d   :  { %v1854_v2 = vmul.f32 0.5, %v1842_v55  ;;  %v4029_v55 = vld [vmem:[%s6794_s6 + $0xf0] sm:$0xff] }
 0x73e   :  { %v1855_v36 = vmul.f32 0.5, %v1843_v5  ;;  %v4030_v5 = vld [vmem:[%s6794_s6 + $0xf8] sm:$0xff]  ;;  %2206 = vmatpush.msra.mxu0 %v4029_v55 }
 0x73f   :  { %v1866_v23 = vmul.f32 %v1854_v2, %v1723_v42  ;;  %2241 = vmatpush.msrb.mxu1 %v4030_v5  ;;  %v4028_v2 = vld [vmem:[%s6794_s6 + $0xe8] sm:$0xff] }
 0x740   :  { %v1867_v12 = vmul.f32 %v1855_v36, %v1758_v27  ;;  %v4025_v36 = vld [vmem:[%s6794_s6 + $0xd0] sm:$0xff] }
 0x741   :  { %1935 = vmatmul.f32.gmra.mxu2 %v1866_v23  ;;  %2242 = vmatpush.msrb.mxu1 %v4028_v2  ;;  %v4026_v23 = vld [vmem:[%s6794_s6 + $0xd8] sm:$0xff] }
 0x742   :  { %1970 = vmatmul.f32.gmra.mxu3 %v1867_v12  ;;  %v4023_v12 = vld [vmem:[%s6794_s6 + $0xc0] sm:$0xff] }
 0x743   :  { %2243 = vmatpush.msrb.mxu1 %v4026_v23 }
 0x784   :  { %v1921_v19 = vpop.f32.mrf.mxu2 }
 0x785   :  { %v1922_v20 = vadd.f32 %v4326_v34, %v1921_v19  ;;  %v1956_v21 = vpop.f32.mrf.mxu3  ;;  %v4021_v19 = vld [vmem:[%s6794_s6 + $0xb0] sm:$0xff] }
 0x787   :  { %v1957_v33 = vadd.f32 %v1956_v21, %v1922_v20  ;;  %v4022_v20 = vld [vmem:[%s6794_s6 + $0xb8] sm:$0xff]  ;;  %v4020_v21 = vld [vmem:[%s6794_s6 + $0xa8] sm:$0xff] }
 0x789   :  { %v1978_v47 = vmul.f32 %v4327_v60, %v1957_v33  ;;  %v4017_v33 = vld [vmem:[%s6794_s6 + $0x90] sm:$0xff] }
 0x78b   :  { %v5818_v32 = vadd.f32 %v1978_v47, %v5532_v8  ;;  %v4018_v47 = vld [vmem:[%s6794_s6 + $0x98] sm:$0xff] }
 0x78d   :  { %v1994_v18 = vsel %vm145_vm1, %v5818_v32, 0.0  ;;  %v2018_v13 = vmul.f32 %v5818_v32, %v5818_v32 }
 0x78e   :  { %1995 = vadd.xlane.f32.xlu0 %v1994_v18 }
 0x78f   :  { %v2024_v7 = vsel %vm145_vm1, %v2018_v13, 0.0  ;;  %v4015_v13 = vld [vmem:[%s6794_s6 + $0x80] sm:$0xff] }
 0x790   :  { %2025 = vadd.xlane.f32.xlu1 %v2024_v7  ;;  %v4016_v7 = vld [vmem:[%s6794_s6 + $0x88] sm:$0xff] }
 0x79b   :  { %v1924_v40 = vpop.f32.mrf.mxu2 }
 0x79c   :  { %v1925_v49 = vadd.f32 %v4326_v34, %v1924_v40  ;;  %v1959_v14 = vpop.f32.mrf.mxu3 }
 0x79e   :  { %v1960_v1 = vadd.f32 %v1959_v14, %v1925_v49 }
 0x7a0   :  { %v1979_v30 = vmul.f32 %v4327_v60, %v1960_v1 }
 0x7a2   :  { %v5826_v39 = vadd.f32 %v1979_v30, %v5540_v44 }
 0x7a3   :  { %v1927_v8 = vpop.f32.mrf.mxu2 }
 0x7a4   :  { %v1928_v31 = vadd.f32 %v4326_v34, %v1927_v8  ;;  %v1962_v53 = vpop.f32.mrf.mxu3  ;;  %v1997_v56 = vsel %vm145_vm1, %v5826_v39, 0.0  ;;  %v2019_v24 = vmul.f32 %v5826_v39, %v5826_v39 }
 0x7a5   :  { %1998 = vadd.xlane.f32.xlu2 %v1997_v56 }
 0x7a6   :  { %v1963_v0 = vadd.f32 %v1962_v53, %v1928_v31  ;;  %v2027_v45 = vsel %vm145_vm1, %v2019_v24, 0.0 }
 0x7a7   :  { %2028 = vadd.xlane.f32.xlu0 %v2027_v45  ;;  %v5918_v45 = vld [vmem:[%s6831_s2 + $0x1] ss:$0 sm:$0xff] }
 0x7a8   :  { %v1980_v35 = vmul.f32 %v4327_v60, %v1963_v0 }
 0x7aa   :  { %v5834_v3 = vadd.f32 %v1980_v35, %v5548_v51 }
 0x7ab   :  { %v1930_v44 = vpop.f32.mrf.mxu2 }
 0x7ac   :  { %v1931_v50 = vadd.f32 %v4326_v34, %v1930_v44  ;;  %v2000_v43 = vsel %vm145_vm1, %v5834_v3, 0.0  ;;  %v2020_v48 = vmul.f32 %v5834_v3, %v5834_v3  ;;  %v1965_v9 = vpop.f32.mrf.mxu3 }
 0x7ad   :  { %2001 = vadd.xlane.f32.xlu1 %v2000_v43 }
 0x7ae   :  { %v1966_v42 = vadd.f32 %v1965_v9, %v1931_v50  ;;  %v2030_v27 = vsel %vm145_vm1, %v2020_v48, 0.0 }
 0x7af   :  { %2031 = vadd.xlane.f32.xlu2 %v2030_v27  ;;  %v5925_v27 = vld [vmem:[%s6832_s0 + $0x1] ss:$0 sm:$0xff] }
 0x7b0   :  { %v1981_v57 = vmul.f32 %v4327_v60, %v1966_v42 }
 0x7b2   :  { %v5842_v62 = vadd.f32 %v1981_v57, %v5556_v26 }
 0x7b4   :  { %v2003_v51 = vsel %vm145_vm1, %v5842_v62, 0.0  ;;  %v2021_v10 = vmul.f32 %v5842_v62, %v5842_v62 }
 0x7b5   :  { %v1933_v11 = vpop.f32.mrf.mxu2  ;;  %2004 = vadd.xlane.f32.xlu0 %v2003_v51 }
 0x7b6   :  { %v1934_v28 = vadd.f32 %v4326_v34, %v1933_v11  ;;  %v2033_v46 = vsel %vm145_vm1, %v2021_v10, 0.0  ;;  %v1968_v6 = vpop.f32.mrf.mxu3 }
 0x7b7   :  { %2034 = vadd.xlane.f32.xlu1 %v2033_v46 }
 0x7b8   :  { %v1969_v22 = vadd.f32 %v1968_v6, %v1934_v28 }
 0x7ba   :  { %v1982_v54 = vmul.f32 %v4327_v60, %v1969_v22 }
 0x7bc   :  { %v5850_v52 = vadd.f32 %v1982_v54, %v5564_v41 }
 0x7be   :  { %v2006_v26 = vsel %vm145_vm1, %v5850_v52, 0.0  ;;  %v2022_v59 = vmul.f32 %v5850_v52, %v5850_v52 }
 0x7bf   :  { %2007 = vadd.xlane.f32.xlu2 %v2006_v26 }
 0x7c0   :  { %v2036_v38 = vsel %vm145_vm1, %v2022_v59, 0.0 }
 0x7c1   :  { %2037 = vadd.xlane.f32.xlu0 %v2036_v38 }
 0x7c4   :  { %v1936_v63 = vpop.f32.mrf.mxu2 }
 0x7c5   :  { %v1937_v25 = vadd.f32 %v4326_v34, %v1936_v63  ;;  %v1971_v29 = vpop.f32.mrf.mxu3  ;;  %v4024_v34 = vld [vmem:[%s6794_s6 + $0xc8] sm:$0xff] }
 0x7c6   :  { %2244 = vmatpush.msrb.mxu1 %v4024_v34 }
 0x7c7   :  { %v1972_v37 = vadd.f32 %v1971_v29, %v1937_v25 }
 0x7c8   :  { %2245 = vmatpush.msrb.mxu1 %v4022_v20 }
 0x7c9   :  { %v1983_v17 = vmul.f32 %v4327_v60, %v1972_v37  ;;  %v4019_v60 = vld [vmem:[%s6794_s6 + $0xa0] sm:$0xff] }
 0x7ca   :  { %2246 = vmatpush.msrb.mxu1 %v4020_v21 }
 0x7cb   :  { %v5858_v58 = vadd.f32 %v1983_v17, %v5572_v15  ;;  %v4027_v15 = vld [vmem:[%s6794_s6 + $0xe0] sm:$0xff] }
 0x7cc   :  { %2207 = vmatpush.msra.mxu0 %v4027_v15  ;;  %2247 = vmatpush.msrb.mxu1 %v4018_v47 }
 0x7cd   :  { %v2009_v41 = vsel %vm145_vm1, %v5858_v58, 0.0  ;;  %v2023_v4 = vmul.f32 %v5858_v58, %v5858_v58 }
 0x7ce   :  { %2010 = vadd.xlane.f32.xlu1 %v2009_v41  ;;  %2208 = vmatpush.msra.mxu0 %v4025_v36 }
 0x7cf   :  { %v2039_v16 = vsel %vm145_vm1, %v2023_v4, 0.0  ;;  %2248 = vmatpush.msrb.mxu1 %v4016_v7 }
 0x7d0   :  { %2040 = vadd.xlane.f32.xlu2 %v2039_v16  ;;  %2209 = vmatpush.msra.mxu0 %v4023_v12 }
 0x7d2   :  { %2210 = vmatpush.msra.mxu0 %v4021_v19 }
 0x7d4   :  { %2211 = vmatpush.msra.mxu0 %v4019_v60 }
 0x7d6   :  { %2212 = vmatpush.msra.mxu0 %v4017_v33 }
 0x7d8   :  { %2213 = vmatpush.msra.mxu0 %v4015_v13 }
 0x801   :  { %v1996_v18 = vpop.xlane.xlu0 %1995 }
 0x802   :  { %v2012_v40 = vmul.f32 %v1996_v18, %v4870_v61 }
 0x803   :  { %v2026_v49 = vpop.xlane.xlu1 %2025 }
 0x804   :  { %v2048_v14 = vmul.f32 %v2012_v40, %v2012_v40  ;;  %v2042_v1 = vmul.f32 %v2026_v49, %v4870_v61  ;;  %v2060_v57 = vsub.f32 %v5818_v32, %v2012_v40 }
 0x806   :  { %v2054_v30 = vsub.f32 %v2042_v1, %v2048_v14 }
 0x808   :  { %v2066_v8 = vadd.f32 1e-06, %v2054_v30 }
 0x80a   :  { %4481 = vrsqrt.f32 %v2066_v8  ;;  %vm2078_vm6 = vweird.f32 %v2066_v8 }
 0x810   :  { %v4482_v31 = vpop.eup %4481 }
 0x811   :  { %v2073_v53 = vmul.f32 %v4482_v31, %v2066_v8  ;;  %vm2079_vm5 = vweird.f32 %v4482_v31 }
 0x812   :  { %vm2080_vm11 = vmor %vm2078_vm6, %vm2079_vm5 }
 0x813   :  { %v2074_v56 = vmul.f32 %v4482_v31, %v2073_v53 }
 0x815   :  { %v2075_v24 = vmul.f32 0.5, %v2074_v56 }
 0x817   :  { %v2076_v0 = vsub.f32 1.5, %v2075_v24 }
 0x818   :  { %v1999_v35 = vpop.xlane.xlu2 %1998 }
 0x819   :  { %v2077_v44 = vmul.f32 %v4482_v31, %v2076_v0  ;;  %v2013_v50 = vmul.f32 %v1999_v35, %v4870_v61 }
 0x81a   :  { %v2029_v43 = vpop.xlane.xlu0 %2028 }
 0x81b   :  { %v2081_v48 = vsel %vm2080_vm11, %v4482_v31, %v2077_v44  ;;  %v2049_v9 = vmul.f32 %v2013_v50, %v2013_v50  ;;  %v2043_v42 = vmul.f32 %v2029_v43, %v4870_v61  ;;  %v2061_v21 = vsub.f32 %v5826_v39, %v2013_v50 }
 0x81c   :  { %v2135_v51 = vmul.f32 %v5918_v45, %v2081_v48 }
 0x81d   :  { %v2055_v10 = vsub.f32 %v2043_v42, %v2049_v9 }
 0x81e   :  { %v2141_v11 = vmul.f32 %v2135_v51, %v2060_v57 }
 0x81f   :  { %v2067_v28 = vadd.f32 1e-06, %v2055_v10 }
 0x820   :  { %v2150_v46 = vadd.f32 %v5925_v27, %v2141_v11  ;;  %v2002_v6 = vpop.xlane.xlu1 %2001 }
 0x821   :  { %4483 = vrsqrt.f32 %v2067_v28  ;;  %v2014_v22 = vmul.f32 %v2002_v6, %v4870_v61  ;;  %vm2088_vm13 = vweird.f32 %v2067_v28 }
 0x822   :  { %v2032_v54 = vpop.xlane.xlu2 %2031  ;;  %4032 = vmatmul.msk.f32.vlgmr.msra.gmra.mxu0 %vm145_vm1, %v2150_v46  ;;  %4038 = vmatmul.msk.f32.vlgmr.msrb.gmra.mxu1 %vm145_vm1, %v2150_v46 }
 0x823   :  { %v2050_v26 = vmul.f32 %v2014_v22, %v2014_v22  ;;  %v2044_v59 = vmul.f32 %v2032_v54, %v4870_v61  ;;  %v2062_v35 = vsub.f32 %v5834_v3, %v2014_v22 }
 0x825   :  { %v2056_v38 = vsub.f32 %v2044_v59, %v2050_v26 }
 0x827   :  { %v4484_v63 = vpop.eup %4483  ;;  %v2068_v25 = vadd.f32 1e-06, %v2056_v38 }
 0x828   :  { %v2083_v29 = vmul.f32 %v4484_v63, %v2067_v28  ;;  %v2005_v37 = vpop.xlane.xlu0 %2004  ;;  %vm2089_vm12 = vweird.f32 %v4484_v63 }
 0x829   :  { %4485 = vrsqrt.f32 %v2068_v25  ;;  %v5935_v17 = vmul.f32 %v2005_v37, %v4870_v61  ;;  %vm2090_vm14 = vmor %vm2088_vm13, %vm2089_vm12  ;;  %vm2098_vm2 = vweird.f32 %v2068_v25 }
 0x82a   :  { %v2084_v41 = vmul.f32 %v4484_v63, %v2083_v29  ;;  %v2035_v4 = vpop.xlane.xlu1 %2034 }
 0x82b   :  { %v2051_v16 = vmul.f32 %v5935_v17, %v5935_v17  ;;  %v2045_v55 = vmul.f32 %v2035_v4, %v4870_v61  ;;  %v2063_v46 = vsub.f32 %v5842_v62, %v5935_v17 }
 0x82c   :  { %v2085_v5 = vmul.f32 0.5, %v2084_v41 }
 0x82d   :  { %v2057_v15 = vsub.f32 %v2045_v55, %v2051_v16 }
 0x82e   :  { %v2086_v2 = vsub.f32 1.5, %v2085_v5 }
 0x82f   :  { %v4486_v36 = vpop.eup %4485  ;;  %v2069_v23 = vadd.f32 1e-06, %v2057_v15 }
 0x830   :  { %v2087_v12 = vmul.f32 %v4484_v63, %v2086_v2  ;;  %v2093_v34 = vmul.f32 %v4486_v36, %v2068_v25  ;;  %vm2099_vm15 = vweird.f32 %v4486_v36 }
 0x831   :  { %4487 = vrsqrt.f32 %v2069_v23  ;;  %vm2100_vm3 = vmor %vm2098_vm2, %vm2099_vm15  ;;  %vm2108_vm5 = vweird.f32 %v2069_v23 }
 0x832   :  { %v2091_v19 = vsel %vm2090_vm14, %v4484_v63, %v2087_v12  ;;  %v2094_v20 = vmul.f32 %v4486_v36, %v2093_v34  ;;  %v2008_v60 = vpop.xlane.xlu2 %2007 }
 0x833   :  { %v2016_v33 = vmul.f32 %v2008_v60, %v4870_v61  ;;  %v2136_v47 = vmul.f32 %v5918_v45, %v2091_v19 }
 0x834   :  { %v2095_v18 = vmul.f32 0.5, %v2094_v20  ;;  %v2038_v13 = vpop.xlane.xlu0 %2037 }
 0x835   :  { %v2052_v7 = vmul.f32 %v2016_v33, %v2016_v33  ;;  %v2046_v40 = vmul.f32 %v2038_v13, %v4870_v61  ;;  %v2142_v49 = vmul.f32 %v2136_v47, %v2061_v21  ;;  %v2064_v16 = vsub.f32 %v5850_v52, %v2016_v33 }
 0x836   :  { %v2096_v14 = vsub.f32 1.5, %v2095_v18 }
 0x837   :  { %v4488_v1 = vpop.eup %4487  ;;  %v2058_v30 = vsub.f32 %v2046_v40, %v2052_v7  ;;  %v2151_v8 = vadd.f32 %v5925_v27, %v2142_v49  ;;  %v4031_v7 = vld [vmem:[%s6795_s7 + $0x2] sm:$0x3]  ;;  %s6833_s7 = smov 32  }
 0x838   :  { %v2097_v31 = vmul.f32 %v4486_v36, %v2096_v14  ;;  %v2103_v53 = vmul.f32 %v4488_v1, %v2069_v23  ;;  %vm2109_vm4 = vweird.f32 %v4488_v1  ;;  %v2177_v40 = vperm.slane %v4031_v7, 1 }
 0x839   :  { %v2070_v56 = vadd.f32 1e-06, %v2058_v30  ;;  %4033 = vmatmul.msk.f32.gmra.mxu0 %vm145_vm1, %v2151_v8  ;;  %4039 = vmatmul.msk.f32.gmra.mxu1 %vm145_vm1, %v2151_v8  ;;  %vm2110_vm6 = vmor %vm2108_vm5, %vm2109_vm4 }
 0x83a   :  { %v2101_v24 = vsel %vm2100_vm3, %v4486_v36, %v2097_v31  ;;  %v2104_v0 = vmul.f32 %v4488_v1, %v2103_v53 }
 0x83b   :  { %4489 = vrsqrt.f32 %v2070_v56  ;;  %v2137_v44 = vmul.f32 %v5918_v45, %v2101_v24  ;;  %vm2118_vm12 = vweird.f32 %v2070_v56 }
 0x83c   :  { %v2105_v50 = vmul.f32 0.5, %v2104_v0 }
 0x83d   :  { %v2143_v43 = vmul.f32 %v2137_v44, %v2062_v35 }
 0x83e   :  { %v2106_v48 = vsub.f32 1.5, %v2105_v50 }
 0x83f   :  { %v2152_v9 = vadd.f32 %v5925_v27, %v2143_v43 }
 0x840   :  { %v2107_v42 = vmul.f32 %v4488_v1, %v2106_v48 }
 0x841   :  { %v4490_v57 = vpop.eup %4489  ;;  %v2011_v51 = vpop.xlane.xlu1 %2010  ;;  %4034 = vmatmul.msk.f32.gmra.mxu0 %vm145_vm1, %v2152_v9  ;;  %4040 = vmatmul.msk.f32.gmra.mxu1 %vm145_vm1, %v2152_v9 }
 0x842   :  { %v2111_v10 = vsel %vm2110_vm6, %v4488_v1, %v2107_v42  ;;  %v2113_v11 = vmul.f32 %v4490_v57, %v2070_v56  ;;  %v2017_v28 = vmul.f32 %v2011_v51, %v4870_v61  ;;  %vm2119_vm11 = vweird.f32 %v4490_v57 }
 0x843   :  { %v2041_v6 = vpop.xlane.xlu2 %2040  ;;  %v2138_v22 = vmul.f32 %v5918_v45, %v2111_v10  ;;  %vm2120_vm13 = vmor %vm2118_vm12, %vm2119_vm11 }
 0x844   :  { %v2114_v54 = vmul.f32 %v4490_v57, %v2113_v11  ;;  %v2053_v26 = vmul.f32 %v2017_v28, %v2017_v28  ;;  %v2047_v59 = vmul.f32 %v2041_v6, %v4870_v61  ;;  %v2065_v60 = vsub.f32 %v5858_v58, %v2017_v28 }
 0x845   :  { %v2144_v38 = vmul.f32 %v2138_v22, %v2063_v46 }
 0x846   :  { %v2115_v63 = vmul.f32 0.5, %v2114_v54  ;;  %v2059_v25 = vsub.f32 %v2047_v59, %v2053_v26 }
 0x847   :  { %v2153_v29 = vadd.f32 %v5925_v27, %v2144_v38 }
 0x848   :  { %v2116_v37 = vsub.f32 1.5, %v2115_v63  ;;  %v2071_v41 = vadd.f32 1e-06, %v2059_v25 }
 0x849   :  { %4035 = vmatmul.msk.f32.gmra.mxu0 %vm145_vm1, %v2153_v29  ;;  %4041 = vmatmul.msk.f32.gmra.mxu1 %vm145_vm1, %v2153_v29 }
 0x84a   :  { %v2117_v17 = vmul.f32 %v4490_v57, %v2116_v37  ;;  %4491 = vrsqrt.f32 %v2071_v41  ;;  %vm2128_vm15 = vweird.f32 %v2071_v41 }
 0x84c   :  { %v2121_v4 = vsel %vm2120_vm13, %v4490_v57, %v2117_v17 }
 0x84d   :  { %v2139_v55 = vmul.f32 %v5918_v45, %v2121_v4 }
 0x84f   :  { %v2145_v5 = vmul.f32 %v2139_v55, %v2064_v16 }
 0x850   :  { %v4492_v15 = vpop.eup %4491 }
 0x851   :  { %v2123_v2 = vmul.f32 %v4492_v15, %v2071_v41  ;;  %v2154_v36 = vadd.f32 %v5925_v27, %v2145_v5  ;;  %vm2129_vm14 = vweird.f32 %v4492_v15 }
 0x852   :  { %vm2130_vm2 = vmor %vm2128_vm15, %vm2129_vm14 }
 0x853   :  { %v2124_v23 = vmul.f32 %v4492_v15, %v2123_v2  ;;  %4036 = vmatmul.msk.f32.gmra.mxu0 %vm145_vm1, %v2154_v36  ;;  %4042 = vmatmul.msk.f32.gmra.mxu1 %vm145_vm1, %v2154_v36 }
 0x855   :  { %v2125_v12 = vmul.f32 0.5, %v2124_v23 }
 0x857   :  { %v2126_v34 = vsub.f32 1.5, %v2125_v12 }
 0x859   :  { %v2127_v19 = vmul.f32 %v4492_v15, %v2126_v34 }
 0x85b   :  { %v2131_v20 = vsel %vm2130_vm2, %v4492_v15, %v2127_v19 }
 0x85c   :  { %v2140_v21 = vmul.f32 %v5918_v45, %v2131_v20  ;;  %v2176_v45 = vperm.slane %v4031_v7, 0 }
 0x85e   :  { %v2146_v33 = vmul.f32 %v2140_v21, %v2065_v60 }
 0x860   :  { %v2155_v47 = vadd.f32 %v5925_v27, %v2146_v33 }
 0x862   :  { %4037 = vmatmul.msk.f32.gmra.mxu0 %vm145_vm1, %v2155_v47  ;;  %4043 = vmatmul.msk.f32.gmra.mxu1 %vm145_vm1, %v2155_v47 }
 0x89f   :  { %v2215_v18 = vpop.f32.mrf.mxu0  ;;  %v2250_v13 = vpop.f32.mrf.mxu1 }
 0x8a0   :  { %v2251_v1 = vadd.f32 %v2250_v13, %v2177_v40  ;;  %v2216_v6 = vadd.f32 %v2215_v18, %v2176_v45 }
 0x8a2   :  { %v5988_v22 = vmul.f32 0.25, %v2216_v6 }
 0x8b6   :  { %v2218_v49 = vpop.f32.mrf.mxu0  ;;  %v2253_v14 = vpop.f32.mrf.mxu1 }
 0x8b7   :  { %v2254_v30 = vadd.f32 %v2253_v14, %v2177_v40  ;;  %v2219_v42 = vadd.f32 %v2218_v49, %v2176_v45 }
 0x8b9   :  { %v5973_v8 = vpack.i.bf16 %v2251_v1, %v2254_v30  ;;  %v5994_v54 = vmul.f32 0.25, %v2219_v42 }
 0x8be   :  { %v2221_v31 = vpop.f32.mrf.mxu0  ;;  %v2256_v27 = vpop.f32.mrf.mxu1 }
 0x8bf   :  { %v2222_v53 = vadd.f32 %v2221_v31, %v2176_v45  ;;  %v2257_v0 = vadd.f32 %v2256_v27, %v2177_v40 }
 0x8c1   :  { %2284 = vrot.lane.b32.xlu0 %v2222_v53, %s4638_s25  ;;  %v5996_v26 = vmul.f32 0.25, %v2222_v53 }
 0x8c6   :  { %v2224_v56 = vpop.f32.mrf.mxu0  ;;  %v2259_v24 = vpop.f32.mrf.mxu1 }
 0x8c7   :  { %v2225_v35 = vadd.f32 %v2224_v56, %v2176_v45  ;;  %v2260_v44 = vadd.f32 %v2259_v24, %v2177_v40 }
 0x8c9   :  { %2286 = vrot.lane.b32.xlu2 %v2225_v35, %s4638_s25  ;;  %v5977_v50 = vpack.i.bf16 %v2257_v0, %v2260_v44  ;;  %v6003_v59 = vmul.f32 0.25, %v2225_v35 }
 0x8d0   :  { %v2227_v43 = vpop.f32.mrf.mxu0  ;;  %v2262_v9 = vpop.f32.mrf.mxu1 }
 0x8d1   :  { %v2228_v48 = vadd.f32 %v2227_v43, %v2176_v45  ;;  %v2263_v10 = vadd.f32 %v2262_v9, %v2177_v40 }
 0x8d3   :  { %2502 = vrot.lane.b32.xlu0 %v2228_v48, %s4639_s23  ;;  %2288 = vrot.lane.b32.xlu1 %v2228_v48, %s4638_s25  ;;  %v6005_v38 = vmul.f32 0.25, %v2228_v48 }
 0x8db   :  { %2282 = vrot.lane.b32.xlu1 %v2219_v42, %s4638_s25 }
 0x8df   :  { %v2230_v57 = vpop.f32.mrf.mxu0  ;;  %v2265_v51 = vpop.f32.mrf.mxu1 }
 0x8e0   :  { %v2231_v11 = vadd.f32 %v2230_v57, %v2176_v45  ;;  %v2266_v28 = vadd.f32 %v2265_v51, %v2177_v40 }
 0x8e2   :  { %2451 = vmatpush.msrb.mxu3 %v2266_v28  ;;  %2504 = vrot.lane.b32.xlu2 %v2231_v11, %s4639_s23  ;;  %v4272_v46 = vpack.i.bf16 %v2263_v10, %v2266_v28  ;;  %v6022_v63 = vmul.f32 0.25, %v2231_v11 }
 0x8e3   :  { %2290 = vrot.lane.b32.xlu0 %v2231_v11, %s4638_s25  ;;  %2500 = vrot.lane.b32.xlu1 %v2225_v35, %s4639_s23 }
 0x8e4   :  { %2452 = vmatpush.msrb.mxu3 %v2263_v10 }
 0x8e6   :  { %2453 = vmatpush.msrb.mxu3 %v2260_v44 }
 0x8e8   :  { %2454 = vmatpush.msrb.mxu3 %v2257_v0 }
 0x8ea   :  { %2455 = vmatpush.msrb.mxu3 %v2254_v30  ;;  %2280 = vrot.lane.b32.xlu2 %v2216_v6, %s4638_s25 }
 0x8eb   :  { %2498 = vrot.lane.b32.xlu0 %v2222_v53, %s4639_s23  ;;  %2494 = vrot.lane.b32.xlu1 %v2216_v6, %s4639_s23 }
 0x8ec   :  { %2456 = vmatpush.msrb.mxu3 %v2251_v1 }
 0x8f2   :  { %2496 = vrot.lane.b32.xlu2 %v2219_v42, %s4639_s23 }
 0x8f3   :  { %2482 = vrot.lane.b32.xlu0 %v5988_v22, %s4640_s4  ;;  %2756 = vrot.lane.b32.xlu1 %v2225_v35, %s6833_s7 }
 0x8fa   :  { %2484 = vrot.lane.b32.xlu2 %v5994_v54, %s4640_s4 }
 0x8fb   :  { %2486 = vrot.lane.b32.xlu0 %v5996_v26, %s4640_s4  ;;  %2760 = vrot.lane.b32.xlu1 %v2231_v11, %s6833_s7 }
 0x902   :  { %2758 = vrot.lane.b32.xlu2 %v2228_v48, %s6833_s7 }
 0x903   :  { %2488 = vrot.lane.b32.xlu0 %v6003_v59, %s4640_s4  ;;  %2490 = vrot.lane.b32.xlu1 %v6005_v38, %s4640_s4 }
 0x90a   :  { %2754 = vrot.lane.b32.xlu2 %v2222_v53, %s6833_s7 }
 0x90b   :  { %2752 = vrot.lane.b32.xlu0 %v2219_v42, %s6833_s7  ;;  %3010 = vrot.lane.b32.xlu1 %v2231_v11, %s6834_s22 }
 0x912   :  { %3008 = vrot.lane.b32.xlu2 %v2228_v48, %s6834_s22 }
 0x913   :  { %2750 = vrot.lane.b32.xlu0 %v2216_v6, %s6833_s7  ;;  %2738 = vrot.lane.b32.xlu1 %v5988_v22, %s6835_s24 }
 0x91a   :  { %3006 = vrot.lane.b32.xlu2 %v2225_v35, %s6834_s22 }
 0x91b   :  { %3004 = vrot.lane.b32.xlu0 %v2222_v53, %s6834_s22  ;;  %3002 = vrot.lane.b32.xlu1 %v2219_v42, %s6834_s22 }
 0x922   :  { %2492 = vrot.lane.b32.xlu2 %v6022_v63, %s4640_s4 }
 0x923   :  { %2740 = vrot.lane.b32.xlu0 %v5994_v54, %s6835_s24  ;;  %2988 = vrot.lane.b32.xlu1 %v5988_v22, %s6836_s1  ;;  %v2287_v25 = vpop.permute.xlu2 %2286 }
 0x92a   :  { %3000 = vrot.lane.b32.xlu2 %v2216_v6, %s6834_s22 }
 0x92b   :  { %2742 = vrot.lane.b32.xlu0 %v5996_v26, %s6835_s24  ;;  %2744 = vrot.lane.b32.xlu1 %v6003_v59, %s6835_s24 }
 0x932   :  { %2990 = vrot.lane.b32.xlu2 %v5994_v54, %s6836_s1 }
 0x933   :  { %2992 = vrot.lane.b32.xlu0 %v5996_v26, %s6836_s1  ;;  %4283 = vrot.lane.b32.xlu1 %v5973_v8, %s4640_s4  ;;  %v2285_v37 = vpop.permute.xlu0 %2284 }
 0x93a   :  { %2994 = vrot.lane.b32.xlu2 %v6003_v59, %s6836_s1 }
 0x93b   :  { %4273 = vrot.lane.b32.xlu0 %v4272_v46, %s4640_s4  ;;  %2996 = vrot.lane.b32.xlu1 %v6005_v38, %s6836_s1 }
 0x93c   :  { %v2505_v29 = vpop.permute.xlu2 %2504 }
 0x93d   :  { %4062 = vmatpush.xpose.msk.msrb.mxu0 %vm449_vm7, %v2505_v29 }
 0x942   :  { %4278 = vrot.lane.b32.xlu2 %v5977_v50, %s4640_s4 }
 0x943   :  { %2746 = vrot.lane.b32.xlu0 %v6005_v38, %s6835_s24 }
 0x944   :  { %v2281_v41 = vpop.permute.xlu2 %2280 }
 0x945   :  { %v2289_v17 = vpop.permute.xlu1 %2288  ;;  %v2503_v4 = vpop.permute.xlu0 %2502 }
 0x946   :  { %4063 = vmatpush.xpose.msk.msrb.mxu0 %vm449_vm7, %v2503_v4 }
 0x94a   :  { %4293 = vrot.lane.b32.xlu2 %v5977_v50, %s6835_s24 }
 0x94b   :  { %4288 = vrot.lane.b32.xlu0 %v4272_v46, %s6835_s24 }
 0x94c   :  { %v2497_v16 = vpop.permute.xlu2 %2496 }
 0x94d   :  { %v2283_v55 = vpop.permute.xlu1 %2282 }
 0x952   :  { %4298 = vrot.lane.b32.xlu2 %v4272_v46, %s6836_s1 }
 0x954   :  { %v2485_v5 = vpop.permute.xlu2 %2484 }
 0x955   :  { %v2291_v15 = vpop.permute.xlu0 %2290  ;;  %v2501_v2 = vpop.permute.xlu1 %2500 }
 0x956   :  { %4044 = vmatpush.xpose.msk.msra.mxu2 %vm449_vm7, %v2291_v15  ;;  %4064 = vmatpush.xpose.msk.msrb.mxu0 %vm449_vm7, %v2501_v2 }
 0x95a   :  { %4045 = vmatpush.xpose.msk.msra.mxu2 %vm449_vm7, %v2289_v17  ;;  %2748 = vrot.lane.b32.xlu2 %v6022_v63, %s6835_s24 }
 0x95c   :  { %v2759_v36 = vpop.permute.xlu2 %2758 }
 0x95d   :  { %v2499_v23 = vpop.permute.xlu0 %2498  ;;  %v2495_v12 = vpop.permute.xlu1 %2494 }
 0x95e   :  { %4046 = vmatpush.xpose.msk.msra.mxu2 %vm449_vm7, %v2287_v25  ;;  %4065 = vmatpush.xpose.msk.msrb.mxu0 %vm449_vm7, %v2499_v23 }
 0x962   :  { %4047 = vmatpush.xpose.msk.msra.mxu2 %vm449_vm7, %v2285_v37  ;;  %4066 = vmatpush.xpose.msk.msrb.mxu0 %vm449_vm7, %v2497_v16  ;;  %v4631_v16 = vld [vmem:[%s6796_s3] sm:$0xff] }
 0x964   :  { %v2755_v34 = vpop.permute.xlu2 %2754 }
 0x965   :  { %v2483_v19 = vpop.permute.xlu0 %2482  ;;  %v2757_v20 = vpop.permute.xlu1 %2756 }
 0x966   :  { %4048 = vmatpush.xpose.msk.msra.mxu2 %vm449_vm7, %v2283_v55  ;;  %4067 = vmatpush.xpose.msk.msrb.mxu0 %vm449_vm7, %v2495_v12 }
 0x969   :  { %4068 = vmatmul.msk.f32.vlgmr.msrb.gmra.mxu0 %vm449_vm7, %v2483_v19 }
 0x96a   :  { %4049 = vmatpush.xpose.msk.msra.mxu2 %vm449_vm7, %v2281_v41 }
 0x96c   :  { %v3009_v60 = vpop.permute.xlu2 %3008 }
 0x96d   :  { %4050 = vmatmul.msk.f32.vlgmr.msra.gmra.mxu2 %vm449_vm7, %v5988_v22  ;;  %v2487_v21 = vpop.permute.xlu0 %2486  ;;  %v2761_v33 = vpop.permute.xlu1 %2760 }
 0x96e   :  { %4080 = vmatpush.xpose.msk.msrb.mxu2 %vm449_vm7, %v2761_v33 }
 0x971   :  { %4069 = vmatmul.msk.f32.gmra.mxu0 %vm449_vm7, %v2485_v5 }
 0x972   :  { %4081 = vmatpush.xpose.msk.msrb.mxu2 %vm449_vm7, %v2759_v36 }
 0x974   :  { %v3007_v47 = vpop.permute.xlu2 %3006 }
 0x975   :  { %4051 = vmatmul.msk.f32.gmra.mxu2 %vm449_vm7, %v5994_v54  ;;  %v2489_v18 = vpop.permute.xlu0 %2488  ;;  %v2491_v13 = vpop.permute.xlu1 %2490 }
 0x976   :  { %4082 = vmatpush.xpose.msk.msrb.mxu2 %vm449_vm7, %v2757_v20 }
 0x979   :  { %4070 = vmatmul.msk.f32.gmra.mxu0 %vm449_vm7, %v2487_v21 }
 0x97a   :  { %4083 = vmatpush.xpose.msk.msrb.mxu2 %vm449_vm7, %v2755_v34  ;;  %v4632_v34 = vld [vmem:[%s6796_s3 + $0x8] sm:$0xff] }
 0x97c   :  { %v2493_v7 = vpop.permute.xlu2 %2492 }
 0x97d   :  { %4052 = vmatmul.msk.f32.gmra.mxu2 %vm449_vm7, %v5996_v26  ;;  %v2753_v40 = vpop.permute.xlu0 %2752  ;;  %v3011_v49 = vpop.permute.xlu1 %3010 }
 0x97e   :  { %4084 = vmatpush.xpose.msk.msrb.mxu2 %vm449_vm7, %v2753_v40  ;;  %4098 = vmatpush.xpose.msk.msra.mxu0 %vm449_vm7, %v3011_v49 }
 0x981   :  { %4071 = vmatmul.msk.f32.gmra.mxu0 %vm449_vm7, %v2489_v18  ;;  %v4633_v18 = vld [vmem:[%s6796_s3 + $0x10] sm:$0xff] }
 0x982   :  { %4099 = vmatpush.xpose.msk.msra.mxu0 %vm449_vm7, %v3009_v60 }
 0x984   :  { %v3001_v14 = vpop.permute.xlu2 %3000 }
 0x985   :  { %4053 = vmatmul.msk.f32.gmra.mxu2 %vm449_vm7, %v6003_v59  ;;  %v2751_v1 = vpop.permute.xlu0 %2750  ;;  %v2739_v30 = vpop.permute.xlu1 %2738 }
 0x986   :  { %4085 = vmatpush.xpose.msk.msrb.mxu2 %vm449_vm7, %v2751_v1  ;;  %4100 = vmatpush.xpose.msk.msra.mxu0 %vm449_vm7, %v3007_v47 }
 0x989   :  { %4072 = vmatmul.msk.f32.gmra.mxu0 %vm449_vm7, %v2491_v13 }
 0x98c   :  { %v2991_v31 = vpop.permute.xlu2 %2990 }
 0x98d   :  { %4054 = vmatmul.msk.f32.gmra.mxu2 %vm449_vm7, %v6005_v38  ;;  %v3005_v45 = vpop.permute.xlu0 %3004  ;;  %v3003_v27 = vpop.permute.xlu1 %3002 }
 0x98e   :  { %4101 = vmatpush.xpose.msk.msra.mxu0 %vm449_vm7, %v3005_v45 }
 0x991   :  { %4073 = vmatmul.msk.f32.gmra.mxu0 %vm449_vm7, %v2493_v7 }
 0x992   :  { %4102 = vmatpush.xpose.msk.msra.mxu0 %vm449_vm7, %v3003_v27 }
 0x994   :  { %v2995_v56 = vpop.permute.xlu2 %2994 }
 0x995   :  { %4055 = vmatmul.msk.f32.gmra.mxu2 %vm449_vm7, %v6022_v63  ;;  %v2741_v53 = vpop.permute.xlu0 %2740  ;;  %v2989_v24 = vpop.permute.xlu1 %2988 }
 0x996   :  { %4103 = vmatpush.xpose.msk.msra.mxu0 %vm449_vm7, %v3001_v14 }
 0x999   :  { %4104 = vmatmul.msk.f32.vlgmr.msra.gmra.mxu0 %vm449_vm7, %v2989_v24 }
 0x99c   :  { %v4279_v35 = vpop.permute.xlu2 %4278 }
 0x99d   :  { %4086 = vmatmul.msk.f32.vlgmr.msrb.gmra.mxu2 %vm449_vm7, %v2739_v30  ;;  %v2743_v0 = vpop.permute.xlu0 %2742  ;;  %v2745_v44 = vpop.permute.xlu1 %2744  ;;  %v4280_v10 = vunpack.i.l.bf16 %v4279_v35  ;;  %v4281_v11 = vunpack.i.h.bf16 %v4279_v35  ;;  %v4634_v30 = vld [vmem:[%s6796_s3 + $0x18] sm:$0xff] }
 0x9a1   :  { %4105 = vmatmul.msk.f32.gmra.mxu0 %vm449_vm7, %v2991_v31 }
 0x9a4   :  { %v4294_v48 = vpop.permute.xlu2 %4293 }
 0x9a5   :  { %4087 = vmatmul.msk.f32.gmra.mxu2 %vm449_vm7, %v2741_v53  ;;  %v2993_v43 = vpop.permute.xlu0 %2992  ;;  %v4284_v42 = vpop.permute.xlu1 %4283  ;;  %v4295_v37 = vunpack.i.l.bf16 %v4294_v48  ;;  %v4296_v41 = vunpack.i.h.bf16 %v4294_v48 }
 0x9a6   :  { %v4285_v46 = vunpack.i.l.bf16 %v4284_v42  ;;  %v4286_v22 = vunpack.i.h.bf16 %v4284_v42 }
 0x9a9   :  { %4106 = vmatmul.msk.f32.gmra.mxu0 %vm449_vm7, %v2993_v43 }
 0x9ac   :  { %v4299_v6 = vpop.permute.xlu2 %4298 }
 0x9ad   :  { %4088 = vmatmul.msk.f32.gmra.mxu2 %vm449_vm7, %v2743_v0  ;;  %v4274_v9 = vpop.permute.xlu0 %4273  ;;  %v2997_v54 = vpop.permute.xlu1 %2996  ;;  %v4300_v26 = vunpack.i.l.bf16 %v4299_v6  ;;  %v4301_v59 = vunpack.i.h.bf16 %v4299_v6  ;;  %v6156_v0 = vld [vmem:[%s6796_s3 + $0x20] sm:$0xff] }
 0x9ae   :  { %v4275_v57 = vunpack.i.l.bf16 %v4274_v9  ;;  %v4276_v51 = vunpack.i.h.bf16 %v4274_v9 }
 0x9b0   :  { %2683 = vmatpush.msra.mxu1 %v4275_v57  ;;  %v6171_v57 = vld [vmem:[%s6796_s3 + $0x28] sm:$0xff] }
 0x9b1   :  { %4107 = vmatmul.msk.f32.gmra.mxu0 %vm449_vm7, %v2995_v56 }
 0x9b2   :  { %2684 = vmatpush.msra.mxu1 %v4276_v51 }
 0x9b4   :  { %2685 = vmatpush.msra.mxu1 %v4280_v10  ;;  %v2749_v17 = vpop.permute.xlu2 %2748 }
 0x9b5   :  { %4089 = vmatmul.msk.f32.gmra.mxu2 %vm449_vm7, %v2745_v44  ;;  %v2747_v28 = vpop.permute.xlu0 %2746 }
 0x9b6   :  { %2686 = vmatpush.msra.mxu1 %v4281_v11 }
 0x9b8   :  { %2687 = vmatpush.msra.mxu1 %v4285_v46 }
 0x9b9   :  { %4108 = vmatmul.msk.f32.gmra.mxu0 %vm449_vm7, %v2997_v54 }
 0x9ba   :  { %2688 = vmatpush.msra.mxu1 %v4286_v22 }
 0x9bc   :  { %3183 = vmatpush.msrb.mxu1 %v4300_v26 }
 0x9bd   :  { %4090 = vmatmul.msk.f32.gmra.mxu2 %vm449_vm7, %v2747_v28  ;;  %v4289_v38 = vpop.permute.xlu0 %4288 }
 0x9be   :  { %3184 = vmatpush.msrb.mxu1 %v4301_v59  ;;  %v4290_v25 = vunpack.i.l.bf16 %v4289_v38  ;;  %v4291_v29 = vunpack.i.h.bf16 %v4289_v38 }
 0x9c0   :  { %2933 = vmatpush.msra.mxu3 %v4290_v25 }
 0x9c2   :  { %2934 = vmatpush.msra.mxu3 %v4291_v29 }
 0x9c4   :  { %2935 = vmatpush.msra.mxu3 %v4295_v37 }
 0x9c5   :  { %4091 = vmatmul.msk.f32.gmra.mxu2 %vm449_vm7, %v2749_v17 }
 0x9c6   :  { %2936 = vmatpush.msra.mxu3 %v4296_v41 }
 0x9e6   :  { %v2547_v4 = vpop.f32.mrf.mxu0 }
 0x9e7   :  { %v6112_v55 = vadd.f32 %v4631_v16, %v2547_v4 }
 0x9e9   :  { %v2565_v5 = vsel %vm83_vm0, %v6112_v55, -inf }
 0x9ea   :  { %2566 = vmax.xlane.f32.xlu0 %v2565_v5 }
 0x9ee   :  { %v2550_v15 = vpop.f32.mrf.mxu0 }
 0x9ef   :  { %v6123_v19 = vadd.f32 %v4632_v34, %v2550_v15 }
 0x9f0   :  { %v2339_v2 = vpop.f32.mrf.mxu2 }
 0x9f1   :  { %v6116_v36 = vadd.f32 %v4631_v16, %v2339_v2  ;;  %v2568_v33 = vsel %vm83_vm0, %v6123_v19, -inf }
 0x9f3   :  { %v2357_v23 = vsel %vm83_vm0, %v6116_v36, -inf }
 0x9f4   :  { %2358 = vmax.xlane.f32.xlu1 %v2357_v23 }
 0x9f6   :  { %v2553_v12 = vpop.f32.mrf.mxu0 }
 0x9f7   :  { %v6134_v13 = vadd.f32 %v4633_v18, %v2553_v12 }
 0x9f8   :  { %v2342_v20 = vpop.f32.mrf.mxu2 }
 0x9f9   :  { %v6125_v60 = vadd.f32 %v4632_v34, %v2342_v20  ;;  %v2571_v14 = vsel %vm83_vm0, %v6134_v13, -inf }
 0x9fb   :  { %v2360_v21 = vsel %vm83_vm0, %v6125_v60, -inf }
 0x9fc   :  { %2361 = vmax.xlane.f32.xlu2 %v2360_v21  ;;  %2569 = vmax.xlane.f32.xlu1 %v2568_v33 }
 0x9fe   :  { %v2556_v47 = vpop.f32.mrf.mxu0 }
 0x9ff   :  { %v6145_v45 = vadd.f32 %v4634_v30, %v2556_v47 }
 0xa00   :  { %v2345_v7 = vpop.f32.mrf.mxu2 }
 0xa01   :  { %v6136_v40 = vadd.f32 %v4633_v18, %v2345_v7  ;;  %v2574_v56 = vsel %vm83_vm0, %v6145_v45, -inf }
 0xa03   :  { %v2363_v49 = vsel %vm83_vm0, %v6136_v40, -inf }
 0xa04   :  { %2364 = vmax.xlane.f32.xlu0 %v2363_v49  ;;  %2572 = vmax.xlane.f32.xlu2 %v2571_v14 }
 0xa06   :  { %v2559_v1 = vpop.f32.mrf.mxu0 }
 0xa07   :  { %v6159_v35 = vadd.f32 %v6156_v0, %v2559_v1 }
 0xa08   :  { %v2348_v31 = vpop.f32.mrf.mxu2 }
 0xa09   :  { %v6147_v27 = vadd.f32 %v4634_v30, %v2348_v31  ;;  %v2577_v9 = vsel %vm83_vm0, %v6159_v35, -inf }
 0xa0b   :  { %v2366_v53 = vsel %vm83_vm0, %v6147_v27, -inf }
 0xa0c   :  { %2367 = vmax.xlane.f32.xlu1 %v2366_v53  ;;  %2575 = vmax.xlane.f32.xlu0 %v2574_v56 }
 0xa0e   :  { %v2562_v24 = vpop.f32.mrf.mxu0 }
 0xa0f   :  { %v6174_v51 = vadd.f32 %v6171_v57, %v2562_v24 }
 0xa10   :  { %v2351_v44 = vpop.f32.mrf.mxu2 }
 0xa11   :  { %v6162_v43 = vadd.f32 %v6156_v0, %v2351_v44  ;;  %v2580_v28 = vsel %vm83_vm0, %v6174_v51, -inf }
 0xa13   :  { %v2369_v48 = vsel %vm83_vm0, %v6162_v43, -inf }
 0xa14   :  { %2370 = vmax.xlane.f32.xlu2 %v2369_v48  ;;  %2578 = vmax.xlane.f32.xlu1 %v2577_v9 }
 0xa16   :  { %v3053_v42 = vpop.f32.mrf.mxu0 }
 0xa17   :  { %v6183_v22 = vadd.f32 %v4631_v16, %v3053_v42 }
 0xa18   :  { %v2354_v10 = vpop.f32.mrf.mxu2 }
 0xa19   :  { %v6177_v11 = vadd.f32 %v6171_v57, %v2354_v10  ;;  %v3071_v38 = vsel %vm83_vm0, %v6183_v22, -inf }
 0xa1b   :  { %v2372_v46 = vsel %vm83_vm0, %v6177_v11, -inf }
 0xa1c   :  { %2581 = vmax.xlane.f32.xlu2 %v2580_v28  ;;  %2373 = vmax.xlane.f32.xlu0 %v2372_v46 }
 0xa1e   :  { %v3056_v6 = vpop.f32.mrf.mxu0 }
 0xa1f   :  { %v6191_v29 = vadd.f32 %v4632_v34, %v3056_v6 }
 0xa20   :  { %v2803_v54 = vpop.f32.mrf.mxu2 }
 0xa21   :  { %v6185_v26 = vadd.f32 %v4631_v16, %v2803_v54  ;;  %v3074_v4 = vsel %vm83_vm0, %v6191_v29, -inf }
 0xa23   :  { %v2821_v59 = vsel %vm83_vm0, %v6185_v26, -inf }
 0xa24   :  { %2822 = vmax.xlane.f32.xlu1 %v2821_v59  ;;  %3072 = vmax.xlane.f32.xlu2 %v3071_v38 }
 0xa26   :  { %v3059_v25 = vpop.f32.mrf.mxu0 }
 0xa27   :  { %v6193_v37 = vadd.f32 %v4633_v18, %v3059_v25 }
 0xa28   :  { %v2806_v41 = vpop.f32.mrf.mxu2 }
 0xa29   :  { %v3077_v17 = vsel %vm83_vm0, %v6193_v37, -inf  ;;  %v6199_v16 = vadd.f32 %v4632_v34, %v2806_v41 }
 0xa2a   :  { %3078 = vmax.xlane.f32.xlu0 %v3077_v17 }
 0xa2b   :  { %v2824_v2 = vsel %vm83_vm0, %v6199_v16, -inf }
 0xa2c   :  { %3075 = vmax.xlane.f32.xlu1 %v3074_v4 }
 0xa2e   :  { %v3062_v12 = vpop.f32.mrf.mxu0 }
 0xa2f   :  { %v6207_v20 = vadd.f32 %v4634_v30, %v3062_v12 }
 0xa30   :  { %v2809_v5 = vpop.f32.mrf.mxu2 }
 0xa31   :  { %v6201_v15 = vadd.f32 %v4633_v18, %v2809_v5  ;;  %v3080_v21 = vsel %vm83_vm0, %v6207_v20, -inf }
 0xa33   :  { %v2827_v23 = vsel %vm83_vm0, %v6201_v15, -inf }
 0xa34   :  { %2825 = vmax.xlane.f32.xlu1 %v2824_v2  ;;  %2828 = vmax.xlane.f32.xlu0 %v2827_v23 }
 0xa38   :  { %v2812_v33 = vpop.f32.mrf.mxu2 }
 0xa39   :  { %v6211_v34 = vadd.f32 %v4634_v30, %v2812_v33 }
 0xa3b   :  { %v2830_v47 = vsel %vm83_vm0, %v6211_v34, -inf }
 0xa3c   :  { %3081 = vmax.xlane.f32.xlu0 %v3080_v21 }
 0xa44   :  { %2831 = vmax.xlane.f32.xlu0 %v2830_v47 }
 0xa5d   :  { %v2567_v18 = vpop.xlane.xlu0 %2566 }
 0xa5e   :  { %v2583_v7 = vsub.f32 %v6112_v55, %v2567_v18 }
 0xa60   :  { %v2589_v49 = vmul.f32 1.442695, %v2583_v7 }
 0xa62   :  { %4493 = vpow2.f32 %v2589_v49 }
 0xa67   :  { %v2359_v14 = vpop.xlane.xlu1 %2358 }
 0xa68   :  { %v6216_v1 = vpop.eup %4493  ;;  %v2375_v31 = vsub.f32 %v6116_v36, %v2359_v14 }
 0xa69   :  { %v2601_v53 = vsel %vm83_vm0, %v6216_v1, 0.0 }
 0xa6a   :  { %v2381_v56 = vmul.f32 1.442695, %v2375_v31  ;;  %2602 = vadd.xlane.f32.xlu2 %v2601_v53 }
 0xa6c   :  { %4495 = vpow2.f32 %v2381_v56 }
 0xa6f   :  { %v2362_v30 = vpop.xlane.xlu2 %2361  ;;  %v2570_v24 = vpop.xlane.xlu1 %2569 }
 0xa70   :  { %v2376_v44 = vsub.f32 %v6125_v60, %v2362_v30  ;;  %v2584_v48 = vsub.f32 %v6123_v19, %v2570_v24 }
 0xa72   :  { %v6223_v55 = vpop.eup %4495  ;;  %v2383_v9 = vmul.f32 1.442695, %v2376_v44  ;;  %v2591_v42 = vmul.f32 1.442695, %v2584_v48 }
 0xa73   :  { %v2393_v10 = vsel %vm83_vm0, %v6223_v55, 0.0 }
 0xa74   :  { %4497 = vpow2.f32 %v2383_v9  ;;  %2394 = vadd.xlane.f32.xlu0 %v2393_v10 }
 0xa75   :  { %4499 = vpow2.f32 %v2591_v42 }
 0xa77   :  { %v2573_v36 = vpop.xlane.xlu2 %2572  ;;  %v2365_v28 = vpop.xlane.xlu0 %2364 }
 0xa78   :  { %v2585_v46 = vsub.f32 %v6134_v13, %v2573_v36  ;;  %v2377_v6 = vsub.f32 %v6136_v40, %v2365_v28 }
 0xa7a   :  { %v6229_v54 = vpop.eup %4497  ;;  %v2593_v60 = vmul.f32 1.442695, %v2585_v46  ;;  %v2385_v19 = vmul.f32 1.442695, %v2377_v6 }
 0xa7b   :  { %v6231_v59 = vpop.eup %4499  ;;  %v2396_v38 = vsel %vm83_vm0, %v6229_v54, 0.0 }
 0xa7c   :  { %4501 = vpow2.f32 %v2593_v60  ;;  %2397 = vadd.xlane.f32.xlu1 %v2396_v38  ;;  %v2604_v25 = vsel %vm83_vm0, %v6231_v59, 0.0 }
 0xa7d   :  { %4503 = vpow2.f32 %v2385_v19  ;;  %2605 = vadd.xlane.f32.xlu2 %v2604_v25 }
 0xa7f   :  { %v2368_v41 = vpop.xlane.xlu1 %2367  ;;  %v2576_v13 = vpop.xlane.xlu0 %2575 }
 0xa80   :  { %v2586_v40 = vsub.f32 %v6145_v45, %v2576_v13  ;;  %v2378_v2 = vsub.f32 %v6147_v27, %v2368_v41 }
 0xa82   :  { %v6238_v17 = vpop.eup %4501  ;;  %v2595_v4 = vmul.f32 1.442695, %v2586_v40  ;;  %v2387_v21 = vmul.f32 1.442695, %v2378_v2 }
 0xa83   :  { %v6240_v5 = vpop.eup %4503  ;;  %v2607_v23 = vsel %vm83_vm0, %v6238_v17, 0.0 }
 0xa84   :  { %2608 = vadd.xlane.f32.xlu0 %v2607_v23  ;;  %v2399_v12 = vsel %vm83_vm0, %v6240_v5, 0.0  ;;  %4505 = vpow2.f32 %v2595_v4 }
 0xa85   :  { %2400 = vadd.xlane.f32.xlu1 %v2399_v12  ;;  %4507 = vpow2.f32 %v2387_v21 }
 0xa87   :  { %v2371_v33 = vpop.xlane.xlu2 %2370  ;;  %v2579_v47 = vpop.xlane.xlu1 %2578 }
 0xa88   :  { %v2379_v45 = vsub.f32 %v6162_v43, %v2371_v33  ;;  %v2587_v27 = vsub.f32 %v6159_v35, %v2579_v47 }
 0xa8a   :  { %v2389_v18 = vmul.f32 1.442695, %v2379_v45  ;;  %v6248_v7 = vpop.eup %4505  ;;  %v2597_v14 = vmul.f32 1.442695, %v2587_v27 }
 0xa8b   :  { %v2610_v49 = vsel %vm83_vm0, %v6248_v7, 0.0  ;;  %v6254_v30 = vpop.eup %4507 }
 0xa8c   :  { %4509 = vpow2.f32 %v2389_v18  ;;  %2611 = vadd.xlane.f32.xlu2 %v2610_v49  ;;  %v2402_v48 = vsel %vm83_vm0, %v6254_v30, 0.0 }
 0xa8d   :  { %4511 = vpow2.f32 %v2597_v14 }
 0xa8f   :  { %v2582_v31 = vpop.xlane.xlu2 %2581  ;;  %v2374_v53 = vpop.xlane.xlu0 %2373 }
 0xa90   :  { %v2588_v56 = vsub.f32 %v6174_v51, %v2582_v31  ;;  %v2380_v44 = vsub.f32 %v6177_v11, %v2374_v53 }
 0xa92   :  { %v6256_v43 = vpop.eup %4509  ;;  %v2599_v24 = vmul.f32 1.442695, %v2588_v56  ;;  %v2391_v9 = vmul.f32 1.442695, %v2380_v44 }
 0xa93   :  { %v2405_v35 = vsel %vm83_vm0, %v6256_v43, 0.0  ;;  %v6265_v51 = vpop.eup %4511 }
 0xa94   :  { %4513 = vpow2.f32 %v2599_v24  ;;  %2406 = vadd.xlane.f32.xlu1 %v2405_v35  ;;  %2403 = vadd.xlane.f32.xlu2 %v2402_v48  ;;  %v2613_v10 = vsel %vm83_vm0, %v6265_v51, 0.0  ;;  %v3065_v48 = vpop.f32.mrf.mxu0 }
 0xa95   :  { %4515 = vpow2.f32 %v2391_v9 }
 0xa97   :  { %v3073_v4 = vpop.xlane.xlu2 %3072 }
 0xa98   :  { %4308 = vrot.lane.b32.xlu0 %v5977_v50, %s6836_s1  ;;  %v2823_v50 = vpop.xlane.xlu1 %2822  ;;  %v3089_v2 = vsub.f32 %v6183_v22, %v3073_v4 }
 0xa99   :  { %v2839_v46 = vsub.f32 %v6185_v26, %v2823_v50 }
 0xa9a   :  { %v6267_v42 = vpop.eup %4513  ;;  %v3095_v21 = vmul.f32 1.442695, %v3089_v2 }
 0xa9b   :  { %v2616_v11 = vsel %vm83_vm0, %v6267_v42, 0.0  ;;  %v6273_v36 = vpop.eup %4515  ;;  %v2845_v6 = vmul.f32 1.442695, %v2839_v46  ;;  %v6319_v46 = vadd.f32 %v6156_v0, %v3065_v48 }
 0xa9c   :  { %2617 = vadd.xlane.f32.xlu1 %v2616_v11  ;;  %2614 = vadd.xlane.f32.xlu2 %v2613_v10  ;;  %v2408_v28 = vsel %vm83_vm0, %v6273_v36, 0.0 }
 0xa9d   :  { %4517 = vpow2.f32 %v2845_v6  ;;  %v3079_v25 = vpop.xlane.xlu0 %3078 }
 0xa9e   :  { %v3091_v9 = vsub.f32 %v6193_v37, %v3079_v25  ;;  %v2815_v37 = vpop.f32.mrf.mxu2 }
 0xaa0   :  { %v3076_v19 = vpop.xlane.xlu1 %3075  ;;  %v3099_v6 = vmul.f32 1.442695, %v3091_v9 }
 0xaa3   :  { %v6282_v60 = vpop.eup %4517 }
 0xaa4   :  { %2409 = vadd.xlane.f32.xlu1 %v2408_v28  ;;  %v2857_v38 = vsel %vm83_vm0, %v6282_v60, 0.0 }
 0xaa7   :  { %v2829_v13 = vpop.xlane.xlu0 %2828 }
 0xaa8   :  { %v2826_v41 = vpop.xlane.xlu1 %2825 }
 0xaa9   :  { %v2840_v26 = vsub.f32 %v6199_v16, %v2826_v41  ;;  %v3090_v16 = vsub.f32 %v6191_v29, %v3076_v19 }
 0xaab   :  { %v2847_v40 = vmul.f32 1.442695, %v2840_v26  ;;  %v3097_v27 = vmul.f32 1.442695, %v3090_v16 }
 0xaad   :  { %4519 = vpow2.f32 %v2847_v40 }
 0xaaf   :  { %v3082_v23 = vpop.xlane.xlu0 %3081 }
 0xab0   :  { %v3092_v45 = vsub.f32 %v6207_v20, %v3082_v23 }
 0xab2   :  { %v3101_v18 = vmul.f32 1.442695, %v3092_v45 }
 0xab3   :  { %v6291_v33 = vpop.eup %4519 }
 0xab4   :  { %2998 = vrot.lane.b32.xlu2 %v6022_v63, %s6836_s1  ;;  %v2841_v63 = vsub.f32 %v6201_v15, %v2829_v13  ;;  %v2860_v15 = vsel %vm83_vm0, %v6291_v33, 0.0 }
 0xab6   :  { %v2849_v12 = vmul.f32 1.442695, %v2841_v63  ;;  %v6332_v63 = vadd.f32 %v6156_v0, %v2815_v37 }
 0xab7   :  { %v2832_v22 = vpop.xlane.xlu0 %2831 }
 0xab8   :  { %4521 = vpow2.f32 %v2849_v12  ;;  %v2842_v20 = vsub.f32 %v6211_v34, %v2832_v22  ;;  %v2833_v12 = vsel %vm83_vm0, %v6332_v63, -inf }
 0xab9   :  { %4523 = vpow2.f32 %v3095_v21 }
 0xaba   :  { %v2851_v24 = vmul.f32 1.442695, %v2842_v20 }
 0xabd   :  { %4303 = vrot.lane.b32.xlu1 %v5973_v8, %s6835_s24 }
 0xac2   :  { %2858 = vadd.xlane.f32.xlu0 %v2857_v38  ;;  %v3083_v38 = vsel %vm83_vm0, %v6319_v46, -inf }
 0xad6   :  { %4313 = vrot.lane.b32.xlu0 %v5973_v8, %s6836_s1  ;;  %v6297_v8 = vpop.eup %4521 }
 0xad7   :  { %v6299_v49 = vpop.eup %4523  ;;  %v2863_v31 = vsel %vm83_vm0, %v6297_v8, 0.0 }
 0xad8   :  { %v3107_v53 = vsel %vm83_vm0, %v6299_v49, 0.0 }
 0xadd   :  { %v2603_v47 = vpop.xlane.xlu2 %2602  ;;  %2861 = vadd.xlane.f32.xlu2 %v2860_v15 }
 0xade   :  { %4525 = vrcp.f32 %v2603_v47 }
 0xadf   :  { %4527 = vpow2.f32 %v3101_v18 }
 0xae0   :  { %4529 = vpow2.f32 %v3097_v27 }
 0xae4   :  { %v4526_v14 = vpop.eup %4525 }
 0xae5   :  { %v2625_v29 = vmul.f32 %v4526_v14, %v6216_v1  ;;  %2864 = vadd.xlane.f32.xlu2 %v2863_v31  ;;  %v6308_v44 = vpop.eup %4527 }
 0xae6   :  { %v6310_v35 = vpop.eup %4529  ;;  %v3116_v34 = vsel %vm83_vm0, %v6308_v44, 0.0 }
 0xae7   :  { %3108 = vadd.xlane.f32.xlu1 %v3107_v53  ;;  %v2395_v56 = vpop.xlane.xlu0 %2394  ;;  %4074 = vmatmul.msk.f32.vlgmr.msra.gmra.mxu1 %vm83_vm0, %v2625_v29  ;;  %v3110_v11 = vsel %vm83_vm0, %v6310_v35, 0.0 }
 0xae8   :  { %4531 = vrcp.f32 %v2395_v56 }
 0xae9   :  { %4533 = vpow2.f32 %v2851_v24 }
 0xaed   :  { %3117 = vadd.xlane.f32.xlu2 %v3116_v34 }
 0xaee   :  { %v4532_v1 = vpop.eup %4531 }
 0xaef   :  { %v2417_v10 = vmul.f32 %v4532_v1, %v6223_v55  ;;  %v2398_v28 = vpop.xlane.xlu1 %2397  ;;  %3111 = vadd.xlane.f32.xlu1 %v3110_v11  ;;  %v6322_v19 = vpop.eup %4533 }
 0xaf0   :  { %4535 = vrcp.f32 %v2398_v28  ;;  %v2606_v50 = vpop.xlane.xlu2 %2605  ;;  %v2866_v55 = vsel %vm83_vm0, %v6322_v19, 0.0 }
 0xaf1   :  { %4537 = vrcp.f32 %v2606_v50  ;;  %4056 = vmatmul.msk.f32.vlgmr.msrb.gmra.mxu3 %vm83_vm0, %v2417_v10 }
 0xaf2   :  { %4539 = vpow2.f32 %v3099_v6 }
 0xaf5   :  { %3084 = vmax.xlane.f32.xlu2 %v3083_v38 }
 0xaf6   :  { %v4536_v25 = vpop.eup %4535 }
 0xaf7   :  { %v4538_v41 = vpop.eup %4537  ;;  %2867 = vadd.xlane.f32.xlu1 %v2866_v55  ;;  %v2609_v13 = vpop.xlane.xlu0 %2608  ;;  %v2418_v26 = vmul.f32 %v4536_v25, %v6229_v54 }
 0xaf8   :  { %v2401_v40 = vpop.xlane.xlu1 %2400  ;;  %4541 = vrcp.f32 %v2609_v13  ;;  %v2626_v4 = vmul.f32 %v4538_v41, %v6231_v59  ;;  %v6335_v2 = vpop.eup %4539 }
 0xaf9   :  { %4543 = vrcp.f32 %v2401_v40  ;;  %4057 = vmatmul.msk.f32.gmra.mxu3 %vm83_vm0, %v2418_v26  ;;  %v2818_v54 = vpop.f32.mrf.mxu2  ;;  %v3113_v59 = vsel %vm83_vm0, %v6335_v2, 0.0 }
 0xafa   :  { %4075 = vmatmul.msk.f32.gmra.mxu1 %vm83_vm0, %v2626_v4  ;;  %v6344_v47 = vadd.f32 %v6171_v57, %v2818_v54 }
 0xafc   :  { %v2836_v15 = vsel %vm83_vm0, %v6344_v47, -inf }
 0xafe   :  { %v4542_v23 = vpop.eup %4541 }
 0xaff   :  { %v4544_v21 = vpop.eup %4543  ;;  %2834 = vmax.xlane.f32.xlu1 %v2833_v12  ;;  %v2627_v45 = vmul.f32 %v4542_v23, %v6238_v17  ;;  %v2612_v16 = vpop.xlane.xlu2 %2611 }
 0xb00   :  { %3114 = vadd.xlane.f32.xlu0 %v3113_v59  ;;  %v2419_v0 = vmul.f32 %v4544_v21, %v6240_v5  ;;  %4545 = vrcp.f32 %v2612_v16 }
 0xb02   :  { %4058 = vmatmul.msk.f32.gmra.mxu3 %vm83_vm0, %v2419_v0  ;;  %4076 = vmatmul.msk.f32.gmra.mxu1 %vm83_vm0, %v2627_v45 }
 0xb06   :  { %v4546_v22 = vpop.eup %4545 }
 0xb07   :  { %v2407_v18 = vpop.xlane.xlu1 %2406  ;;  %2837 = vmax.xlane.f32.xlu1 %v2836_v15  ;;  %v2404_v27 = vpop.xlane.xlu2 %2403  ;;  %v2628_v17 = vmul.f32 %v4546_v22, %v6248_v7 }
 0xb08   :  { %4547 = vrcp.f32 %v2404_v27 }
 0xb09   :  { %4549 = vrcp.f32 %v2407_v18 }
 0xb0a   :  { %4077 = vmatmul.msk.f32.gmra.mxu1 %vm83_vm0, %v2628_v17  ;;  %v4309_v5 = vpop.permute.xlu0 %4308 }
 0xb0b   :  { %v4310_v14 = vunpack.i.l.bf16 %v4309_v5  ;;  %v4311_v20 = vunpack.i.h.bf16 %v4309_v5 }
 0xb0d   :  { %3185 = vmatpush.msrb.mxu1 %v4310_v14 }
 0xb0e   :  { %v4548_v29 = vpop.eup %4547 }
 0xb0f   :  { %v2618_v31 = vpop.xlane.xlu1 %2617  ;;  %3186 = vmatpush.msrb.mxu1 %v4311_v20  ;;  %v2615_v53 = vpop.xlane.xlu2 %2614  ;;  %v2420_v56 = vmul.f32 %v4548_v29, %v6254_v30 }
 0xb10   :  { %4551 = vrcp.f32 %v2615_v53  ;;  %v4550_v24 = vpop.eup %4549 }
 0xb11   :  { %4059 = vmatmul.msk.f32.gmra.mxu3 %vm83_vm0, %v2420_v56  ;;  %4553 = vrcp.f32 %v2618_v31  ;;  %v2421_v48 = vmul.f32 %v4550_v24, %v6256_v43 }
 0xb16   :  { %v4552_v34 = vpop.eup %4551 }
 0xb17   :  { %v2410_v7 = vpop.xlane.xlu1 %2409  ;;  %v2999_v1 = vpop.permute.xlu2 %2998  ;;  %v2629_v9 = vmul.f32 %v4552_v34, %v6265_v51 }
 0xb18   :  { %4555 = vrcp.f32 %v2410_v7  ;;  %4109 = vmatmul.msk.f32.gmra.mxu0 %vm449_vm7, %v2999_v1  ;;  %v4554_v30 = vpop.eup %4553 }
 0xb19   :  { %4060 = vmatmul.msk.f32.gmra.mxu3 %vm83_vm0, %v2421_v48  ;;  %4078 = vmatmul.msk.f32.gmra.mxu1 %vm83_vm0, %v2629_v9  ;;  %v2630_v28 = vmul.f32 %v4554_v30, %v6267_v42 }
 0xb1e   :  { %v4556_v11 = vpop.eup %4555 }
 0xb1f   :  { %v2422_v10 = vmul.f32 %v4556_v11, %v6273_v36 }
 0xb21   :  { %4061 = vmatmul.msk.f32.gmra.mxu3 %vm83_vm0, %v2422_v10  ;;  %4079 = vmatmul.msk.f32.gmra.mxu1 %vm83_vm0, %v2630_v28 }
 0xb2f   :  { %v4304_v50 = vpop.permute.xlu1 %4303 }
 0xb30   :  { %v4305_v43 = vunpack.i.l.bf16 %v4304_v50  ;;  %v4306_v6 = vunpack.i.h.bf16 %v4304_v50 }
 0xb32   :  { %2937 = vmatpush.msra.mxu3 %v4305_v43 }
 0xb34   :  { %2938 = vmatpush.msra.mxu3 %v4306_v6 }
 0xb35   :  { %v2859_v51 = vpop.xlane.xlu0 %2858 }
 0xb36   :  { %4557 = vrcp.f32 %v2859_v51 }
 0xb3c   :  { %v4558_v37 = vpop.eup %4557 }
 0xb3d   :  { %v2881_v38 = vmul.f32 %v4558_v37, %v6282_v60 }
 0xb3f   :  { %4092 = vmatmul.msk.f32.vlgmr.msra.gmra.mxu3 %vm83_vm0, %v2881_v38 }
 0xb48   :  { %v4314_v25 = vpop.permute.xlu0 %4313 }
 0xb49   :  { %v4315_v36 = vunpack.i.l.bf16 %v4314_v25  ;;  %v4316_v55 = vunpack.i.h.bf16 %v4314_v25 }
 0xb4b   :  { %3187 = vmatpush.msrb.mxu1 %v4315_v36 }
 0xb4d   :  { %3188 = vmatpush.msrb.mxu1 %v4316_v55 }
 0xb50   :  { %v2862_v42 = vpop.xlane.xlu2 %2861 }
 0xb51   :  { %4559 = vrcp.f32 %v2862_v42 }
 0xb57   :  { %v4560_v41 = vpop.eup %4559 }
 0xb58   :  { %v2865_v13 = vpop.xlane.xlu2 %2864  ;;  %v2882_v26 = vmul.f32 %v4560_v41, %v6291_v33 }
 0xb59   :  { %4561 = vrcp.f32 %v2865_v13 }
 0xb5a   :  { %v3109_v40 = vpop.xlane.xlu1 %3108  ;;  %4093 = vmatmul.msk.f32.gmra.mxu3 %vm83_vm0, %v2882_v26 }
 0xb5b   :  { %4563 = vrcp.f32 %v3109_v40 }
 0xb5f   :  { %v4562_v4 = vpop.eup %4561 }
 0xb60   :  { %v2883_v23 = vmul.f32 %v4562_v4, %v6297_v8  ;;  %v3118_v18 = vpop.xlane.xlu2 %3117 }
 0xb61   :  { %v4564_v60 = vpop.eup %4563 }
 0xb62   :  { %v3131_v12 = vmul.f32 %v4564_v60, %v6299_v49  ;;  %v3112_v21 = vpop.xlane.xlu1 %3111  ;;  %4094 = vmatmul.msk.f32.gmra.mxu3 %vm83_vm0, %v2883_v23 }
 0xb63   :  { %4565 = vrcp.f32 %v3112_v21 }
 0xb64   :  { %4110 = vmatmul.msk.f32.vlgmr.msrb.gmra.mxu1 %vm83_vm0, %v3131_v12  ;;  %v2690_v29 = vpop.f32.mrf.mxu1 }
 0xb68   :  { %v3085_v36 = vpop.xlane.xlu2 %3084 }
 0xb69   :  { %v4566_v54 = vpop.eup %4565  ;;  %v3093_v13 = vsub.f32 %v6319_v46, %v3085_v36 }
 0xb6a   :  { %v2868_v59 = vpop.xlane.xlu1 %2867  ;;  %v3132_v33 = vmul.f32 %v4566_v54, %v6310_v35 }
 0xb6b   :  { %4567 = vrcp.f32 %v2868_v59  ;;  %v3103_v4 = vmul.f32 1.442695, %v3093_v13 }
 0xb6c   :  { %4111 = vmatmul.msk.f32.gmra.mxu1 %vm83_vm0, %v3132_v33 }
 0xb71   :  { %v4568_v45 = vpop.eup %4567 }
 0xb72   :  { %v2835_v16 = vpop.xlane.xlu1 %2834  ;;  %v2884_v0 = vmul.f32 %v4568_v45, %v6322_v19 }
 0xb73   :  { %v2843_v8 = vsub.f32 %v6332_v63, %v2835_v16  ;;  %v3115_v49 = vpop.xlane.xlu0 %3114  ;;  %v4123_v16 = vld [vmem:[%s6797_s8 + $0x78] sm:$0xff] }
 0xb74   :  { %4569 = vrcp.f32 %v3115_v49  ;;  %v2458_v15 = vpop.f32.mrf.mxu3  ;;  %4095 = vmatmul.msk.f32.gmra.mxu3 %vm83_vm0, %v2884_v0  ;;  %v4122_v0 = vld [vmem:[%s6797_s8 + $0x70] sm:$0xff]  ;;  %3284 = vmatpush.msra.mxu2 %v4123_v16 }
 0xb75   :  { %v2853_v22 = vmul.f32 1.442695, %v2843_v8  ;;  %2476 = vst.msk [vmem:[#allocation2] sm:$0xff] %vm449_vm7, %v2458_v15  ;;  %v4120_v15 = vld [vmem:[%s6797_s8 + $0x60] sm:$0xff] }
 0xb76   :  { %3285 = vmatpush.msra.mxu2 %v4122_v0 }
 0xb77   :  { %4571 = vpow2.f32 %v2853_v22  ;;  %v2693_v24 = vpop.f32.mrf.mxu1  ;;  %v4119_v22 = vld [vmem:[%s6797_s8 + $0x58] sm:$0xff] }
 0xb78   :  { %4573 = vrcp.f32 %v3118_v18  ;;  %v4118_v18 = vld [vmem:[%s6797_s8 + $0x50] sm:$0xff] }
 0xb7a   :  { %v4570_v35 = vpop.eup %4569  ;;  %v2838_v50 = vpop.xlane.xlu1 %2837 }
 0xb7b   :  { %v3133_v27 = vmul.f32 %v4570_v35, %v6335_v2  ;;  %v2844_v21 = vsub.f32 %v6344_v47, %v2838_v50  ;;  %v4121_v47 = vld [vmem:[%s6797_s8 + $0x68] sm:$0xff]  ;;  %v6466_v50 = vld [vmem:[%s6799_s10 + $0x1] ss:$0 sm:$0xff] }
 0xb7c   :  { %v2461_v17 = vpop.f32.mrf.mxu3  ;;  %3286 = vmatpush.msra.mxu2 %v4121_v47  ;;  %v4117_v35 = vld [vmem:[%s6797_s8 + $0x48] sm:$0xff] }
 0xb7d   :  { %v4572_v5 = vpop.eup %4571  ;;  %2477 = vst.msk [vmem:[#allocation2 + $0x8] sm:$0xff] %vm449_vm7, %v2461_v17  ;;  %4112 = vmatmul.msk.f32.gmra.mxu1 %vm83_vm0, %v3133_v27  ;;  %v2855_v59 = vmul.f32 1.442695, %v2844_v21  ;;  %v4116_v17 = vld [vmem:[%s6797_s8 + $0x40] sm:$0xff] }
 0xb7e   :  { %v2869_v19 = vsel %vm83_vm0, %v4572_v5, 0.0  ;;  %v4574_v63 = vpop.eup %4573  ;;  %3287 = vmatpush.msra.mxu2 %v4120_v15  ;;  %v4144_v15 = vld [vmem:[%s6802_s13 + $0xd0] sm:$0xff] }
 0xb7f   :  { %2870 = vadd.xlane.f32.xlu1 %v2869_v19  ;;  %v3134_v14 = vmul.f32 %v4574_v63, %v6308_v44  ;;  %v2696_v44 = vpop.f32.mrf.mxu1 }
 0xb80   :  { %3288 = vmatpush.msra.mxu2 %v4119_v22  ;;  %v4145_v22 = vld [vmem:[%s6802_s13 + $0xd8] sm:$0xff] }
 0xb82   :  { %3289 = vmatpush.msra.mxu2 %v4118_v18 }
 0xb84   :  { %3290 = vmatpush.msra.mxu2 %v4117_v35  ;;  %v4142_v35 = vld [vmem:[%s6802_s13 + $0xc0] sm:$0xff] }
 0xb85   :  { %v2464_v20 = vpop.f32.mrf.mxu3  ;;  %4113 = vmatmul.msk.f32.gmra.mxu1 %vm83_vm0, %v3134_v14 }
 0xb86   :  { %2478 = vst.msk [vmem:[#allocation2 + $0x10] sm:$0xff] %vm449_vm7, %v2464_v20  ;;  %3291 = vmatpush.msra.mxu2 %v4116_v17  ;;  %v4140_v17 = vld [vmem:[%s6802_s13 + $0xb0] sm:$0xff] }
 0xb87   :  { %v2699_v1 = vpop.f32.mrf.mxu1 }
 0xb94   :  { %v2467_v31 = vpop.f32.mrf.mxu3 }
 0xb95   :  { %2479 = vst.msk [vmem:[#allocation2 + $0x18] sm:$0xff] %vm449_vm7, %v2467_v31  ;;  %v3068_v2 = vpop.f32.mrf.mxu0 }
 0xb96   :  { %v3069_v53 = vadd.f32 %v6171_v57, %v3068_v2  ;;  %v6394_v48 = vpop.f32.mrf.mxu1 }
 0xb98   :  { %2714 = vrot.lane.b32.xlu1 %v2690_v29, %s6834_s22  ;;  %v3086_v56 = vsel %vm83_vm0, %v3069_v53, -inf }
 0xb99   :  { %3087 = vmax.xlane.f32.xlu2 %v3086_v56 }
 0xb9c   :  { %v2470_v34 = vpop.f32.mrf.mxu3 }
 0xb9d   :  { %2480 = vst.msk [vmem:[#allocation2 + $0x20] sm:$0xff] %vm449_vm7, %v2470_v34 }
 0xb9e   :  { %v6396_v9 = vpop.f32.mrf.mxu1 }
 0xba0   :  { %2716 = vrot.lane.b32.xlu1 %v2693_v24, %s6834_s22 }
 0xba4   :  { %v2473_v7 = vpop.f32.mrf.mxu3 }
 0xba5   :  { %2481 = vst.msk [vmem:[#allocation2 + $0x28] sm:$0xff] %vm449_vm7, %v2473_v7 }
 0xba8   :  { %2718 = vrot.lane.b32.xlu1 %v2696_v44, %s6834_s22 }
 0xbb0   :  { %2720 = vrot.lane.b32.xlu1 %v2699_v1, %s6834_s22 }
 0xbc2   :  { %v2940_v57 = vpop.f32.mrf.mxu3 }
 0xbc3   :  { %2964 = vrot.lane.b32.xlu2 %v2940_v57, %s6833_s7 }
 0xbdd   :  { %v2943_v30 = vpop.f32.mrf.mxu3 }
 0xbde   :  { %2966 = vrot.lane.b32.xlu2 %v2943_v30, %s6833_s7 }
 0xbe1   :  { %v3190_v11 = vpop.f32.mrf.mxu1 }
 0xbe2   :  { %3214 = vrot.lane.b32.xlu0 %v3190_v11, %s4639_s23 }
 0xbe5   :  { %v2946_v10 = vpop.f32.mrf.mxu3 }
 0xbe6   :  { %2968 = vrot.lane.b32.xlu2 %v2946_v10, %s6833_s7 }
 0xbe9   :  { %v3193_v28 = vpop.f32.mrf.mxu1 }
 0xbea   :  { %3216 = vrot.lane.b32.xlu0 %v3193_v28, %s4639_s23  ;;  %v6461_v28 = vld [vmem:[%s6798_s9 + $0x1] ss:$0 sm:$0xff] }
 0xbf2   :  { %v2871_v43 = vpop.xlane.xlu1 %2870 }
 0xbf3   :  { %4575 = vrcp.f32 %v2871_v43 }
 0xbf7   :  { %v2949_v6 = vpop.f32.mrf.mxu3 }
 0xbf8   :  { %2970 = vrot.lane.b32.xlu2 %v2949_v6, %s6833_s7 }
 0xbf9   :  { %v4576_v51 = vpop.eup %4575 }
 0xbfa   :  { %v3196_v37 = vpop.f32.mrf.mxu1  ;;  %v2885_v38 = vmul.f32 %v4576_v51, %v4572_v5 }
 0xbfb   :  { %3218 = vrot.lane.b32.xlu0 %v3196_v37, %s4639_s23 }
 0xbfc   :  { %4096 = vmatmul.msk.f32.gmra.mxu3 %vm83_vm0, %v2885_v38 }
 0xc02   :  { %v3199_v25 = vpop.f32.mrf.mxu1 }
 0xc03   :  { %3220 = vrot.lane.b32.xlu0 %v3199_v25, %s4639_s23 }
 0xc0a   :  { %v2715_v55 = vpop.permute.xlu1 %2714 }
 0xc0b   :  { %2732 = vst.msk [vmem:[#allocation2] sm:$0xff] %vm890_vm8, %v2715_v55 }
 0xc0c   :  { %v3088_v42 = vpop.xlane.xlu2 %3087 }
 0xc0d   :  { %v3094_v41 = vsub.f32 %v3069_v53, %v3088_v42 }
 0xc0f   :  { %v3105_v26 = vmul.f32 1.442695, %v3094_v41 }
 0xc11   :  { %4577 = vpow2.f32 %v3105_v26 }
 0xc12   :  { %v2717_v40 = vpop.permute.xlu1 %2716  ;;  %4579 = vpow2.f32 %v3103_v4 }
 0xc13   :  { %2733 = vst.msk [vmem:[#allocation2 + $0x8] sm:$0xff] %vm890_vm8, %v2717_v40  ;;  %4581 = vpow2.f32 %v2855_v59 }
 0xc17   :  { %v6409_v60 = vpop.eup %4577 }
 0xc18   :  { %v3122_v23 = vsel %vm83_vm0, %v6409_v60, 0.0  ;;  %v4580_v54 = vpop.eup %4579 }
 0xc19   :  { %3123 = vadd.xlane.f32.xlu1 %v3122_v23  ;;  %v3119_v33 = vsel %vm83_vm0, %v4580_v54, 0.0  ;;  %v4582_v8 = vpop.eup %4581 }
 0xc1a   :  { %v2719_v12 = vpop.permute.xlu1 %2718  ;;  %v2872_v49 = vsel %vm83_vm0, %v4582_v8, 0.0 }
 0xc1b   :  { %2734 = vst.msk [vmem:[#allocation2 + $0x10] sm:$0xff] %vm890_vm8, %v2719_v12 }
 0xc1d   :  { %v2965_v46 = vpop.permute.xlu2 %2964 }
 0xc1e   :  { %2982 = vst.msk [vmem:[#allocation2] sm:$0xff] %vm1141_vm9, %v2965_v46 }
 0xc21   :  { %3120 = vadd.xlane.f32.xlu2 %v3119_v33 }
 0xc22   :  { %v2721_v45 = vpop.permute.xlu1 %2720 }
 0xc23   :  { %2735 = vst.msk [vmem:[#allocation2 + $0x18] sm:$0xff] %vm890_vm8, %v2721_v45 }
 0xc2d   :  { %2873 = vadd.xlane.f32.xlu0 %v2872_v49  ;;  %v4146_v49 = vld [vmem:[%s6802_s13 + $0xe0] sm:$0xff] }
 0xc38   :  { %v2967_v27 = vpop.permute.xlu2 %2966 }
 0xc39   :  { %2983 = vst.msk [vmem:[#allocation2 + $0x8] sm:$0xff] %vm1141_vm9, %v2967_v27  ;;  %v4143_v27 = vld [vmem:[%s6802_s13 + $0xc8] sm:$0xff] }
 0xc40   :  { %v2969_v5 = vpop.permute.xlu2 %2968 }
 0xc41   :  { %2984 = vst.msk [vmem:[#allocation2 + $0x10] sm:$0xff] %vm1141_vm9, %v2969_v5  ;;  %v4141_v5 = vld [vmem:[%s6802_s13 + $0xb8] sm:$0xff] }
 0xc52   :  { %v2971_v19 = vpop.permute.xlu2 %2970 }
 0xc53   :  { %2985 = vst.msk [vmem:[#allocation2 + $0x18] sm:$0xff] %vm1141_vm9, %v2971_v19  ;;  %v4138_v19 = vld [vmem:[%s6802_s13 + $0xa0] sm:$0xff] }
 0xc54   :  { %v3215_v63 = vpop.permute.xlu0 %3214 }
 0xc55   :  { %3232 = vst.msk [vmem:[#allocation2] sm:$0xff] %vm1392_vm10, %v3215_v63  ;;  %v4139_v63 = vld [vmem:[%s6802_s13 + $0xa8] sm:$0xff] }
 0xc5c   :  { %v3217_v14 = vpop.permute.xlu0 %3216  ;;  %v3238_v20 = vld [vmem:[#allocation2] sm:$0xff] }
 0xc5d   :  { %3233 = vst.msk [vmem:[#allocation2 + $0x8] sm:$0xff] %vm1392_vm10, %v3217_v14  ;;  %4125 = vmatmul.msk.f32.vlgmr.msra.gmra.mxu2 %vm145_vm1, %v3238_v20  ;;  %v4136_v14 = vld [vmem:[%s6802_s13 + $0x90] sm:$0xff]  ;;  %v4137_v20 = vld [vmem:[%s6802_s13 + $0x98] sm:$0xff] }
 0xc64   :  { %v3239_v29 = vld [vmem:[#allocation2 + $0x8] sm:$0xff] }
 0xc65   :  { %4126 = vmatmul.msk.f32.gmra.mxu2 %vm145_vm1, %v3239_v29 }
 0xc6d   :  { %v3219_v31 = vpop.permute.xlu0 %3218 }
 0xc6e   :  { %3234 = vst.msk [vmem:[#allocation2 + $0x10] sm:$0xff] %vm1392_vm10, %v3219_v31  ;;  %v4134_v31 = vld [vmem:[%s6802_s13 + $0x80] sm:$0xff] }
 0xc75   :  { %v3221_v2 = vpop.permute.xlu0 %3220  ;;  %v3240_v53 = vld [vmem:[#allocation2 + $0x10] sm:$0xff] }
 0xc76   :  { %3235 = vst.msk [vmem:[#allocation2 + $0x18] sm:$0xff] %vm1392_vm10, %v3221_v2  ;;  %4127 = vmatmul.msk.f32.gmra.mxu2 %vm145_vm1, %v3240_v53  ;;  %v4135_v2 = vld [vmem:[%s6802_s13 + $0x88] sm:$0xff] }
 0xc7d   :  { %v3241_v56 = vld [vmem:[#allocation2 + $0x18] sm:$0xff] }
 0xc7e   :  { %4128 = vmatmul.msk.f32.gmra.mxu2 %vm145_vm1, %v3241_v56 }
 0xc7f   :  { %v2952_v4 = vpop.f32.mrf.mxu3 }
 0xc8c   :  { %v3124_v34 = vpop.xlane.xlu1 %3123 }
 0xc94   :  { %v3121_v24 = vpop.xlane.xlu2 %3120 }
 0xc95   :  { %4583 = vrcp.f32 %v3121_v24 }
 0xc96   :  { %4585 = vrcp.f32 %v3124_v34 }
 0xc9b   :  { %v4584_v44 = vpop.eup %4583 }
 0xc9c   :  { %v3135_v7 = vmul.f32 %v4584_v44, %v4580_v54  ;;  %v4586_v57 = vpop.eup %4585 }
 0xc9d   :  { %v3136_v30 = vmul.f32 %v4586_v57, %v6409_v60 }
 0xc9e   :  { %4114 = vmatmul.msk.f32.gmra.mxu1 %vm83_vm0, %v3135_v7 }
 0xca0   :  { %v2874_v1 = vpop.xlane.xlu0 %2873 }
 0xca1   :  { %4587 = vrcp.f32 %v2874_v1 }
 0xca6   :  { %4115 = vmatmul.msk.f32.gmra.mxu1 %vm83_vm0, %v3136_v30 }
 0xca7   :  { %v4588_v11 = vpop.eup %4587 }
 0xca8   :  { %v2886_v10 = vmul.f32 %v4588_v11, %v4582_v8  ;;  %v4149_v8 = vld [vmem:[%s6802_s13 + $0xf8] sm:$0xff] }
 0xca9   :  { %3579 = vmatpush.msrb.mxu0 %v4149_v8 }
 0xcaa   :  { %4097 = vmatmul.msk.f32.gmra.mxu3 %vm83_vm0, %v2886_v10 }
 0xce0   :  { %v3293_v43 = vpop.f32.mrf.mxu2 }
 0xce1   :  { %v3294_v6 = vadd.f32 %v6461_v28, %v3293_v43 }
 0xce3   :  { %v3316_v51 = vmul.f32 %v6466_v50, %v3294_v6 }
 0xce5   :  { %v6471_v37 = vadd.f32 %v3316_v51, %v5818_v32 }
 0xce7   :  { %v3332_v38 = vsel %vm145_vm1, %v6471_v37, 0.0  ;;  %v3356_v25 = vmul.f32 %v6471_v37, %v6471_v37 }
 0xce8   :  { %3333 = vadd.xlane.f32.xlu2 %v3332_v38  ;;  %v3296_v36 = vpop.f32.mrf.mxu2 }
 0xce9   :  { %v3297_v55 = vadd.f32 %v6461_v28, %v3296_v36  ;;  %v3362_v42 = vsel %vm145_vm1, %v3356_v25, 0.0 }
 0xcea   :  { %3363 = vadd.xlane.f32.xlu0 %v3362_v42 }
 0xceb   :  { %v3317_v41 = vmul.f32 %v6466_v50, %v3297_v55 }
 0xced   :  { %v6481_v13 = vadd.f32 %v3317_v41, %v5826_v39 }
 0xcef   :  { %v3335_v32 = vsel %vm145_vm1, %v6481_v13, 0.0  ;;  %v3357_v26 = vmul.f32 %v6481_v13, %v6481_v13 }
 0xcf0   :  { %3336 = vadd.xlane.f32.xlu1 %v3335_v32 }
 0xcf1   :  { %v3365_v40 = vsel %vm145_vm1, %v3357_v26, 0.0  ;;  %v6572_v26 = vld [vmem:[%s6800_s11 + $0x1] ss:$0 sm:$0xff] }
 0xcf2   :  { %3366 = vadd.xlane.f32.xlu2 %v3365_v40 }
 0xcf9   :  { %v3299_v60 = vpop.f32.mrf.mxu2 }
 0xcfa   :  { %v3300_v12 = vadd.f32 %v6461_v28, %v3299_v60 }
 0xcfc   :  { %v3318_v54 = vmul.f32 %v6466_v50, %v3300_v12 }
 0xcfe   :  { %v6497_v59 = vadd.f32 %v3318_v54, %v5834_v3 }
 0xd00   :  { %v3338_v47 = vsel %vm145_vm1, %v6497_v59, 0.0 }
 0xd01   :  { %v3302_v39 = vpop.f32.mrf.mxu2 }
 0xd02   :  { %v3303_v21 = vadd.f32 %v6461_v28, %v3302_v39  ;;  %v6577_v39 = vld [vmem:[%s6801_s12 + $0x1] ss:$0 sm:$0xff] }
 0xd04   :  { %v3319_v46 = vmul.f32 %v6466_v50, %v3303_v21 }
 0xd06   :  { %v6500_v33 = vadd.f32 %v3319_v46, %v5842_v62  ;;  %v4148_v62 = vld [vmem:[%s6802_s13 + $0xf0] sm:$0xff] }
 0xd07   :  { %3544 = vmatpush.msrb.mxu3 %v4148_v62 }
 0xd08   :  { %v3359_v45 = vmul.f32 %v6500_v33, %v6500_v33  ;;  %v3341_v3 = vsel %vm145_vm1, %v6500_v33, 0.0 }
 0xd09   :  { %2972 = vrot.lane.b32.xlu1 %v2952_v4, %s6833_s7  ;;  %3545 = vmatpush.msrb.mxu3 %v4146_v49 }
 0xd0a   :  { %2722 = vrot.lane.b32.xlu2 %v6394_v48, %s6834_s22  ;;  %v3358_v48 = vmul.f32 %v6497_v59, %v6497_v59  ;;  %v3371_v0 = vsel %vm145_vm1, %v3359_v45, 0.0 }
 0xd0b   :  { %3546 = vmatpush.msrb.mxu3 %v4144_v15 }
 0xd0c   :  { %v3368_v16 = vsel %vm145_vm1, %v3358_v48, 0.0 }
 0xd0d   :  { %3547 = vmatpush.msrb.mxu3 %v4142_v35 }
 0xd0f   :  { %3548 = vmatpush.msrb.mxu3 %v4140_v17 }
 0xd11   :  { %3549 = vmatpush.msrb.mxu3 %v4138_v19 }
 0xd13   :  { %3550 = vmatpush.msrb.mxu3 %v4136_v14 }
 0xd15   :  { %3551 = vmatpush.msrb.mxu3 %v4134_v31  ;;  %v4193_v31 = vld [vmem:[%s6803_s15 + $0x1f0] sm:$0xff] }
 0xd17   :  { %4211 = vmatpush.msra.mxu3 %v4149_v8 }
 0xd1b   :  { %v3202_v23 = vpop.f32.mrf.mxu1 }
 0xd1c   :  { %3222 = vrot.lane.b32.xlu0 %v3202_v23, %s4639_s23 }
 0xd23   :  { %v3205_v18 = vpop.f32.mrf.mxu1 }
 0xd2d   :  { %v2955_v7 = vpop.f32.mrf.mxu3 }
 0xd33   :  { %3369 = vadd.xlane.f32.xlu1 %v3368_v16  ;;  %3372 = vadd.xlane.f32.xlu2 %v3371_v0 }
 0xd46   :  { %3339 = vadd.xlane.f32.xlu0 %v3338_v47 }
 0xd4c   :  { %2724 = vrot.lane.b32.xlu1 %v6396_v9, %s6834_s22  ;;  %v4147_v9 = vld [vmem:[%s6802_s13 + $0xe8] sm:$0xff] }
 0xd4d   :  { %3580 = vmatpush.msrb.mxu0 %v4147_v9  ;;  %4212 = vmatpush.msra.mxu3 %v4147_v9 }
 0xd4e   :  { %3342 = vadd.xlane.f32.xlu0 %v3341_v3 }
 0xd4f   :  { %3581 = vmatpush.msrb.mxu0 %v4145_v22  ;;  %4213 = vmatpush.msra.mxu3 %v4145_v22 }
 0xd51   :  { %3582 = vmatpush.msrb.mxu0 %v4143_v27  ;;  %4214 = vmatpush.msra.mxu3 %v4143_v27 }
 0xd53   :  { %3583 = vmatpush.msrb.mxu0 %v4141_v5  ;;  %4215 = vmatpush.msra.mxu3 %v4141_v5 }
 0xd54   :  { %3224 = vrot.lane.b32.xlu1 %v3205_v18, %s4639_s23 }
 0xd55   :  { %3584 = vmatpush.msrb.mxu0 %v4139_v63  ;;  %4216 = vmatpush.msra.mxu3 %v4139_v63 }
 0xd57   :  { %3585 = vmatpush.msrb.mxu0 %v4137_v20  ;;  %4217 = vmatpush.msra.mxu3 %v4137_v20 }
 0xd59   :  { %3586 = vmatpush.msrb.mxu0 %v4135_v2  ;;  %4218 = vmatpush.msra.mxu3 %v4135_v2 }
 0xd5b   :  { %v3334_v29 = vpop.xlane.xlu2 %3333 }
 0xd5c   :  { %v3350_v53 = vmul.f32 %v3334_v29, %v4870_v61  ;;  %v4194_v29 = vld [vmem:[%s6803_s15 + $0x1f8] sm:$0xff] }
 0xd5d   :  { %v3364_v56 = vpop.xlane.xlu0 %3363  ;;  %3783 = vmatpush.msrb.mxu2 %v4194_v29  ;;  %v4180_v29 = vld [vmem:[%s6803_s15 + $0x188] sm:$0xff] }
 0xd5e   :  { %v3386_v24 = vmul.f32 %v3350_v53, %v3350_v53  ;;  %v3380_v34 = vmul.f32 %v3364_v56, %v4870_v61  ;;  %v3398_v12 = vsub.f32 %v6471_v37, %v3350_v53  ;;  %v4192_v56 = vld [vmem:[%s6803_s15 + $0x1e8] sm:$0xff] }
 0xd5f   :  { %3784 = vmatpush.msrb.mxu2 %v4193_v31  ;;  %v4166_v31 = vld [vmem:[%s6803_s15 + $0x118] sm:$0xff] }
 0xd60   :  { %v3392_v44 = vsub.f32 %v3380_v34, %v3386_v24 }
 0xd61   :  { %3785 = vmatpush.msrb.mxu2 %v4192_v56  ;;  %v4165_v56 = vld [vmem:[%s6803_s15 + $0x110] sm:$0xff] }
 0xd62   :  { %v3404_v1 = vadd.f32 1e-06, %v3392_v44  ;;  %2974 = vrot.lane.b32.xlu0 %v2955_v7, %s6833_s7 }
 0xd63   :  { %v3337_v57 = vpop.xlane.xlu1 %3336 }
 0xd64   :  { %4589 = vrsqrt.f32 %v3404_v1  ;;  %v3351_v30 = vmul.f32 %v3337_v57, %v4870_v61  ;;  %vm3416_vm7 = vweird.f32 %v3404_v1 }
 0xd65   :  { %v3367_v11 = vpop.xlane.xlu2 %3366 }
 0xd66   :  { %v3387_v10 = vmul.f32 %v3351_v30, %v3351_v30  ;;  %v3381_v43 = vmul.f32 %v3367_v11, %v4870_v61  ;;  %v3399_v3 = vsub.f32 %v6481_v13, %v3351_v30 }
 0xd68   :  { %v3393_v6 = vsub.f32 %v3381_v43, %v3387_v10 }
 0xd6a   :  { %v4590_v51 = vpop.eup %4589  ;;  %v3405_v38 = vadd.f32 1e-06, %v3393_v6 }
 0xd6b   :  { %v3411_v25 = vmul.f32 %v4590_v51, %v3404_v1  ;;  %vm3417_vm0 = vweird.f32 %v4590_v51 }
 0xd6c   :  { %4591 = vrsqrt.f32 %v3405_v38  ;;  %vm3418_vm3 = vmor %vm3416_vm7, %vm3417_vm0  ;;  %vm3426_vm5 = vweird.f32 %v3405_v38 }
 0xd6d   :  { %v3412_v36 = vmul.f32 %v4590_v51, %v3411_v25  ;;  %v2723_v55 = vpop.permute.xlu2 %2722 }
 0xd6e   :  { %2736 = vst.msk [vmem:[#allocation2 + $0x20] sm:$0xff] %vm890_vm8, %v2723_v55 }
 0xd6f   :  { %v3413_v42 = vmul.f32 0.5, %v3412_v36 }
 0xd71   :  { %v3414_v41 = vsub.f32 1.5, %v3413_v42 }
 0xd72   :  { %v4592_v32 = vpop.eup %4591 }
 0xd73   :  { %v3415_v40 = vmul.f32 %v4590_v51, %v3414_v41  ;;  %v3421_v4 = vmul.f32 %v4592_v32, %v3405_v38  ;;  %vm3427_vm4 = vweird.f32 %v4592_v32 }
 0xd74   :  { %vm3428_vm6 = vmor %vm3426_vm5, %vm3427_vm4  ;;  %vm3826_vm4 = vcmask 1040384   ;;  %vm3830_vm5 = vcmask 517120  }
 0xd75   :  { %v3419_v60 = vsel %vm3418_vm3, %v4590_v51, %v3415_v40  ;;  %v3422_v23 = vmul.f32 %v4592_v32, %v3421_v4 }
 0xd76   :  { %v3473_v21 = vmul.f32 %v6572_v26, %v3419_v60  ;;  %v4191_v60 = vld [vmem:[%s6803_s15 + $0x1e0] sm:$0xff] }
 0xd77   :  { %v3423_v54 = vmul.f32 0.5, %v3422_v23  ;;  %3786 = vmatpush.msrb.mxu2 %v4191_v60 }
 0xd78   :  { %v3479_v46 = vmul.f32 %v3473_v21, %v3398_v12 }
 0xd79   :  { %v3424_v48 = vsub.f32 1.5, %v3423_v54  ;;  %v4177_v54 = vld [vmem:[%s6803_s15 + $0x170] sm:$0xff] }
 0xd7a   :  { %v3488_v45 = vadd.f32 %v6577_v39, %v3479_v46  ;;  %v4190_v46 = vld [vmem:[%s6803_s15 + $0x1d8] sm:$0xff] }
 0xd7b   :  { %v3425_v16 = vmul.f32 %v4592_v32, %v3424_v48  ;;  %v2973_v0 = vpop.permute.xlu1 %2972  ;;  %3787 = vmatpush.msrb.mxu2 %v4190_v46 }
 0xd7c   :  { %2986 = vst.msk [vmem:[#allocation2 + $0x20] sm:$0xff] %vm1141_vm9, %v2973_v0  ;;  %4151 = vmatmul.msk.f32.vlgmr.msrb.gmra.mxu3 %vm145_vm1, %v3488_v45  ;;  %4157 = vmatmul.msk.f32.vlgmr.msrb.gmra.mxu0 %vm145_vm1, %v3488_v45  ;;  %v4189_v0 = vld [vmem:[%s6803_s15 + $0x1d0] sm:$0xff] }
 0xd7d   :  { %v3429_v47 = vsel %vm3428_vm6, %v4592_v32, %v3425_v16  ;;  %v4176_v16 = vld [vmem:[%s6803_s15 + $0x168] sm:$0xff]  ;;  %3788 = vmatpush.msrb.mxu2 %v4189_v0 }
 0xd7e   :  { %v3474_v62 = vmul.f32 %v6572_v26, %v3429_v47 }
 0xd80   :  { %v3480_v8 = vmul.f32 %v3474_v62, %v3399_v3  ;;  %v4175_v3 = vld [vmem:[%s6803_s15 + $0x160] sm:$0xff]  ;;  %v4188_v62 = vld [vmem:[%s6803_s15 + $0x1c8] sm:$0xff] }
 0xd81   :  { %3789 = vmatpush.msrb.mxu2 %v4188_v62 }
 0xd82   :  { %v3489_v49 = vadd.f32 %v6577_v39, %v3480_v8  ;;  %v4174_v8 = vld [vmem:[%s6803_s15 + $0x158] sm:$0xff] }
 0xd84   :  { %4152 = vmatmul.msk.f32.gmra.mxu3 %vm145_vm1, %v3489_v49  ;;  %4158 = vmatmul.msk.f32.gmra.mxu0 %vm145_vm1, %v3489_v49  ;;  %v4187_v49 = vld [vmem:[%s6803_s15 + $0x1c0] sm:$0xff] }
 0xd85   :  { %3790 = vmatpush.msrb.mxu2 %v4187_v49 }
 0xd8e   :  { %v3223_v9 = vpop.permute.xlu0 %3222 }
 0xd8f   :  { %3236 = vst.msk [vmem:[#allocation2 + $0x20] sm:$0xff] %vm1392_vm10, %v3223_v9  ;;  %v4173_v9 = vld [vmem:[%s6803_s15 + $0x150] sm:$0xff] }
 0xd96   :  { %v3242_v15 = vld [vmem:[#allocation2 + $0x20] sm:$0xff] }
 0xd97   :  { %4129 = vmatmul.msk.f32.gmra.mxu2 %vm145_vm1, %v3242_v15  ;;  %v4186_v15 = vld [vmem:[%s6803_s15 + $0x1b8] sm:$0xff] }
 0xd98   :  { %3791 = vmatpush.msrb.mxu2 %v4186_v15 }
 0xda6   :  { %v3370_v22 = vpop.xlane.xlu1 %3369  ;;  %v3373_v63 = vpop.xlane.xlu2 %3372 }
 0xda7   :  { %v3382_v13 = vmul.f32 %v3370_v22, %v4870_v61  ;;  %v3383_v2 = vmul.f32 %v3373_v63, %v4870_v61  ;;  %v4172_v22 = vld [vmem:[%s6803_s15 + $0x148] sm:$0xff] }
 0xda8   :  { %v4168_v63 = vld [vmem:[%s6803_s15 + $0x128] sm:$0xff] }
 0xdb9   :  { %v3340_v18 = vpop.xlane.xlu0 %3339 }
 0xdba   :  { %v3352_v35 = vmul.f32 %v3340_v18, %v4870_v61  ;;  %v4185_v18 = vld [vmem:[%s6803_s15 + $0x1b0] sm:$0xff] }
 0xdbb   :  { %3792 = vmatpush.msrb.mxu2 %v4185_v18 }
 0xdbc   :  { %v3388_v27 = vmul.f32 %v3352_v35, %v3352_v35  ;;  %v3400_v38 = vsub.f32 %v6497_v59, %v3352_v35  ;;  %v4178_v59 = vld [vmem:[%s6803_s15 + $0x178] sm:$0xff]  ;;  %v4171_v35 = vld [vmem:[%s6803_s15 + $0x140] sm:$0xff] }
 0xdbd   :  { %3752 = vmatpush.msra.mxu1 %v4178_v59 }
 0xdbe   :  { %v3394_v17 = vsub.f32 %v3382_v13, %v3388_v27  ;;  %v2725_v5 = vpop.permute.xlu1 %2724  ;;  %v4184_v13 = vld [vmem:[%s6803_s15 + $0x1a8] sm:$0xff]  ;;  %v4170_v27 = vld [vmem:[%s6803_s15 + $0x138] sm:$0xff] }
 0xdbf   :  { %2737 = vst.msk [vmem:[#allocation2 + $0x28] sm:$0xff] %vm890_vm8, %v2725_v5  ;;  %3753 = vmatpush.msra.mxu1 %v4177_v54  ;;  %3793 = vmatpush.msrb.mxu2 %v4184_v13  ;;  %v4169_v5 = vld [vmem:[%s6803_s15 + $0x130] sm:$0xff] }
 0xdc0   :  { %v3406_v19 = vadd.f32 1e-06, %v3394_v17  ;;  %v4183_v17 = vld [vmem:[%s6803_s15 + $0x1a0] sm:$0xff] }
 0xdc1   :  { %v3343_v14 = vpop.xlane.xlu0 %3342  ;;  %3754 = vmatpush.msra.mxu1 %v4176_v16  ;;  %3794 = vmatpush.msrb.mxu2 %v4183_v17 }
 0xdc2   :  { %4593 = vrsqrt.f32 %v3406_v19  ;;  %v3353_v20 = vmul.f32 %v3343_v14, %v4870_v61  ;;  %vm3436_vm11 = vweird.f32 %v3406_v19  ;;  %v4181_v14 = vld [vmem:[%s6803_s15 + $0x190] sm:$0xff] }
 0xdc3   :  { %3755 = vmatpush.msra.mxu1 %v4175_v3 }
 0xdc4   :  { %v3389_v53 = vmul.f32 %v3353_v20, %v3353_v20  ;;  %v3401_v12 = vsub.f32 %v6500_v33, %v3353_v20  ;;  %v4167_v20 = vld [vmem:[%s6803_s15 + $0x120] sm:$0xff] }
 0xdc5   :  { %3756 = vmatpush.msra.mxu1 %v4174_v8 }
 0xdc6   :  { %v3395_v24 = vsub.f32 %v3383_v2, %v3389_v53  ;;  %v3225_v42 = vpop.permute.xlu1 %3224  ;;  %v4179_v2 = vld [vmem:[%s6803_s15 + $0x180] sm:$0xff] }
 0xdc7   :  { %3757 = vmatpush.msra.mxu1 %v4173_v9  ;;  %v4150_v53 = vld [vmem:[%s6805_s14 + $0x2] sm:$0x3] }
 0xdc8   :  { %v4594_v34 = vpop.eup %4593  ;;  %v3407_v44 = vadd.f32 1e-06, %v3395_v24  ;;  %v6703_v24 = vperm.slane %v4150_v53, 1 }
 0xdc9   :  { %v3431_v7 = vmul.f32 %v4594_v34, %v3406_v19  ;;  %vm3437_vm8 = vweird.f32 %v4594_v34  ;;  %3758 = vmatpush.msra.mxu1 %v4172_v22  ;;  %v4182_v19 = vld [vmem:[%s6803_s15 + $0x198] sm:$0xff] }
 0xdca   :  { %4595 = vrsqrt.f32 %v3407_v44  ;;  %vm3438_vm12 = vmor %vm3436_vm11, %vm3437_vm8  ;;  %vm3446_vm14 = vweird.f32 %v3407_v44  ;;  %3795 = vmatpush.msrb.mxu2 %v4182_v19 }
 0xdcb   :  { %v3432_v1 = vmul.f32 %v4594_v34, %v3431_v7  ;;  %3759 = vmatpush.msra.mxu1 %v4171_v35 }
 0xdcc   :  { %3796 = vmatpush.msrb.mxu2 %v4181_v14 }
 0xdcd   :  { %v3433_v57 = vmul.f32 0.5, %v3432_v1  ;;  %3760 = vmatpush.msra.mxu1 %v4170_v27 }
 0xdce   :  { %3797 = vmatpush.msrb.mxu2 %v4180_v29 }
 0xdcf   :  { %v3434_v30 = vsub.f32 1.5, %v3433_v57  ;;  %3761 = vmatpush.msra.mxu1 %v4169_v5 }
 0xdd0   :  { %v4596_v11 = vpop.eup %4595  ;;  %3798 = vmatpush.msrb.mxu2 %v4179_v2 }
 0xdd1   :  { %v3435_v10 = vmul.f32 %v4594_v34, %v3434_v30  ;;  %v3441_v43 = vmul.f32 %v4596_v11, %v3407_v44  ;;  %vm3447_vm13 = vweird.f32 %v4596_v11  ;;  %3762 = vmatpush.msra.mxu1 %v4168_v63  ;;  %v4163_v44 = vld [vmem:[%s6803_s15 + $0x100] sm:$0xff]  ;;  %v6712_v30 = vperm.slane %v4150_v53, 0 }
 0xdd2   :  { %vm3448_vm15 = vmor %vm3446_vm14, %vm3447_vm13 }
 0xdd3   :  { %v3439_v6 = vsel %vm3438_vm12, %v4594_v34, %v3435_v10  ;;  %v3442_v51 = vmul.f32 %v4596_v11, %v3441_v43  ;;  %3763 = vmatpush.msra.mxu1 %v4167_v20  ;;  %v4164_v34 = vld [vmem:[%s6803_s15 + $0x108] sm:$0xff] }
 0xdd4   :  { %v3475_v25 = vmul.f32 %v6572_v26, %v3439_v6  ;;  %v2975_v36 = vpop.permute.xlu0 %2974 }
 0xdd5   :  { %v3443_v55 = vmul.f32 0.5, %v3442_v51  ;;  %2987 = vst.msk [vmem:[#allocation2 + $0x28] sm:$0xff] %vm1141_vm9, %v2975_v36  ;;  %3764 = vmatpush.msra.mxu1 %v4166_v31 }
 0xdd6   :  { %v3481_v41 = vmul.f32 %v3475_v25, %v3400_v38  ;;  %3237 = vst.msk [vmem:[#allocation2 + $0x28] sm:$0xff] %vm1392_vm10, %v3225_v42 }
 0xdd7   :  { %v3444_v32 = vsub.f32 1.5, %v3443_v55  ;;  %3765 = vmatpush.msra.mxu1 %v4165_v56 }
 0xdd8   :  { %v3490_v40 = vadd.f32 %v6577_v39, %v3481_v41 }
 0xdd9   :  { %v3445_v4 = vmul.f32 %v4596_v11, %v3444_v32  ;;  %3766 = vmatpush.msra.mxu1 %v4164_v34 }
 0xdda   :  { %4153 = vmatmul.msk.f32.gmra.mxu3 %vm145_vm1, %v3490_v40  ;;  %4159 = vmatmul.msk.f32.gmra.mxu0 %vm145_vm1, %v3490_v40 }
 0xddb   :  { %v3449_v23 = vsel %vm3448_vm15, %v4596_v11, %v3445_v4  ;;  %3767 = vmatpush.msra.mxu1 %v4163_v44 }
 0xddc   :  { %v3476_v21 = vmul.f32 %v6572_v26, %v3449_v23 }
 0xddd   :  { %v3243_v48 = vld [vmem:[#allocation2 + $0x28] sm:$0xff] }
 0xdde   :  { %v3482_v45 = vmul.f32 %v3476_v21, %v3401_v12  ;;  %4130 = vmatmul.msk.f32.gmra.mxu2 %vm145_vm1, %v3243_v48 }
 0xde0   :  { %v3491_v47 = vadd.f32 %v6577_v39, %v3482_v45 }
 0xde2   :  { %4154 = vmatmul.msk.f32.gmra.mxu3 %vm145_vm1, %v3491_v47  ;;  %4160 = vmatmul.msk.f32.gmra.mxu0 %vm145_vm1, %v3491_v47 }
 0xdf9   :  { %v3588_v7 = vpop.f32.mrf.mxu0 }
 0xdfa   :  { %v3589_v1 = vadd.f32 %v3588_v7, %v6703_v24 }
 0xdfc   :  { %v3607_v57 = vmul.f32 %v3589_v1, %v3589_v1 }
 0xdfe   :  { %v3619_v11 = vmul.f32 %v3607_v57, %v3589_v1 }
 0xdff   :  { %v3553_v10 = vpop.f32.mrf.mxu3 }
 0xe00   :  { %v3631_v43 = vmul.f32 0.044715, %v3619_v11  ;;  %v3554_v6 = vadd.f32 %v3553_v10, %v6712_v30 }
 0xe01   :  { %v3591_v51 = vpop.f32.mrf.mxu0 }
 0xe02   :  { %v3643_v38 = vadd.f32 %v3631_v43, %v3589_v1  ;;  %v3606_v25 = vmul.f32 %v3554_v6, %v3554_v6  ;;  %v3592_v36 = vadd.f32 %v3591_v51, %v6703_v24 }
 0xe04   :  { %v3655_v55 = vmul.f32 0.7978846, %v3643_v38  ;;  %v3618_v42 = vmul.f32 %v3606_v25, %v3554_v6  ;;  %v3609_v41 = vmul.f32 %v3592_v36, %v3592_v36 }
 0xe06   :  { %4597 = vtanh.f32 %v3655_v55  ;;  %v3630_v32 = vmul.f32 0.044715, %v3618_v42  ;;  %v3621_v40 = vmul.f32 %v3609_v41, %v3592_v36 }
 0xe07   :  { %v3556_v4 = vpop.f32.mrf.mxu3 }
 0xe08   :  { %v3642_v59 = vadd.f32 %v3630_v32, %v3554_v6  ;;  %v3633_v60 = vmul.f32 0.044715, %v3621_v40  ;;  %v3557_v23 = vadd.f32 %v3556_v4, %v6712_v30 }
 0xe0a   :  { %v3654_v12 = vmul.f32 0.7978846, %v3642_v59  ;;  %v3645_v21 = vadd.f32 %v3633_v60, %v3592_v36  ;;  %v3608_v54 = vmul.f32 %v3557_v23, %v3557_v23 }
 0xe0c   :  { %v4598_v46 = vpop.eup %4597  ;;  %4599 = vtanh.f32 %v3654_v12  ;;  %v3620_v48 = vmul.f32 %v3608_v54, %v3557_v23  ;;  %v3657_v45 = vmul.f32 0.7978846, %v3645_v21 }
 0xe0d   :  { %v3679_v16 = vadd.f32 1.0, %v4598_v46 }
 0xe0e   :  { %v3632_v0 = vmul.f32 0.044715, %v3620_v48  ;;  %4601 = vtanh.f32 %v3657_v45 }
 0xe0f   :  { %v3691_v47 = vmul.f32 0.5, %v3679_v16 }
 0xe10   :  { %v3644_v3 = vadd.f32 %v3632_v0, %v3557_v23 }
 0xe11   :  { %v3703_v62 = vmul.f32 %v3691_v47, %v3589_v1 }
 0xe12   :  { %v4600_v8 = vpop.eup %4599  ;;  %v3656_v49 = vmul.f32 0.7978846, %v3644_v3 }
 0xe13   :  { %v3678_v9 = vadd.f32 1.0, %v4600_v8  ;;  %3799 = vmatmul.f32.vlgmr.msrb.gmra.mxu2 %v3703_v62 }
 0xe14   :  { %v4602_v15 = vpop.eup %4601  ;;  %4603 = vtanh.f32 %v3656_v49 }
 0xe15   :  { %v3690_v22 = vmul.f32 0.5, %v3678_v9  ;;  %v3681_v18 = vadd.f32 1.0, %v4602_v15 }
 0xe17   :  { %v3702_v35 = vmul.f32 %v3690_v22, %v3554_v6  ;;  %v3693_v13 = vmul.f32 0.5, %v3681_v18 }
 0xe19   :  { %3768 = vmatmul.f32.vlgmr.msra.gmra.mxu1 %v3702_v35  ;;  %v3705_v27 = vmul.f32 %v3693_v13, %v3592_v36 }
 0xe1a   :  { %v4604_v17 = vpop.eup %4603  ;;  %v3305_v5 = vpop.f32.mrf.mxu2 }
 0xe1b   :  { %v3306_v19 = vadd.f32 %v6461_v28, %v3305_v5  ;;  %3802 = vmatmul.f32.gmra.mxu2 %v3705_v27  ;;  %v3680_v63 = vadd.f32 1.0, %v4604_v17 }
 0xe1d   :  { %v3320_v14 = vmul.f32 %v6466_v50, %v3306_v19  ;;  %v3692_v20 = vmul.f32 0.5, %v3680_v63 }
 0xe1f   :  { %v6720_v29 = vadd.f32 %v3320_v14, %v5850_v52  ;;  %v3704_v31 = vmul.f32 %v3692_v20, %v3557_v23  ;;  %v4331_v20 = vld [vmem:[%s6804_s16 + $0x1] ss:$0 sm:$0xff] }
 0xe21   :  { %3771 = vmatmul.f32.gmra.mxu1 %v3704_v31  ;;  %v3344_v2 = vsel %vm145_vm1, %v6720_v29, 0.0  ;;  %v3360_v53 = vmul.f32 %v6720_v29, %v6720_v29 }
 0xe22   :  { %3345 = vadd.xlane.f32.xlu0 %v3344_v2 }
 0xe23   :  { %v3374_v56 = vsel %vm145_vm1, %v3360_v53, 0.0 }
 0xe24   :  { %3375 = vadd.xlane.f32.xlu1 %v3374_v56 }
 0xe57   :  { %v3594_v34 = vpop.f32.mrf.mxu0 }
 0xe58   :  { %v3595_v44 = vadd.f32 %v3594_v34, %v6703_v24 }
 0xe5a   :  { %v3611_v7 = vmul.f32 %v3595_v44, %v3595_v44 }
 0xe5c   :  { %v3623_v1 = vmul.f32 %v3611_v7, %v3595_v44 }
 0xe5d   :  { %v3559_v57 = vpop.f32.mrf.mxu3 }
 0xe5e   :  { %v3635_v52 = vmul.f32 0.044715, %v3623_v1  ;;  %v3560_v11 = vadd.f32 %v3559_v57, %v6712_v30 }
 0xe5f   :  { %v3597_v10 = vpop.f32.mrf.mxu0 }
 0xe60   :  { %v3647_v43 = vadd.f32 %v3635_v52, %v3595_v44  ;;  %v3610_v6 = vmul.f32 %v3560_v11, %v3560_v11  ;;  %v3598_v51 = vadd.f32 %v3597_v10, %v6703_v24 }
 0xe61   :  { %v3308_v38 = vpop.f32.mrf.mxu2 }
 0xe62   :  { %v3622_v25 = vmul.f32 %v3610_v6, %v3560_v11  ;;  %v3613_v36 = vmul.f32 %v3598_v51, %v3598_v51  ;;  %v3309_v55 = vadd.f32 %v6461_v28, %v3308_v38  ;;  %v3659_v42 = vmul.f32 0.7978846, %v3647_v43 }
 0xe64   :  { %v3634_v41 = vmul.f32 0.044715, %v3622_v25  ;;  %v3625_v32 = vmul.f32 %v3613_v36, %v3598_v51  ;;  %v3321_v40 = vmul.f32 %v6466_v50, %v3309_v55  ;;  %4605 = vtanh.f32 %v3659_v42 }
 0xe65   :  { %v3562_v4 = vpop.f32.mrf.mxu3 }
 0xe66   :  { %v3646_v59 = vadd.f32 %v3634_v41, %v3560_v11  ;;  %v3637_v60 = vmul.f32 0.044715, %v3625_v32  ;;  %v6733_v23 = vadd.f32 %v3321_v40, %v5858_v58  ;;  %v3563_v12 = vadd.f32 %v3562_v4, %v6712_v30 }
 0xe68   :  { %v3649_v21 = vadd.f32 %v3637_v60, %v3598_v51  ;;  %v3612_v54 = vmul.f32 %v3563_v12, %v3563_v12  ;;  %v3347_v46 = vsel %vm145_vm1, %v6733_v23, 0.0  ;;  %v3658_v28 = vmul.f32 0.7978846, %v3646_v59 }
 0xe69   :  { %3348 = vadd.xlane.f32.xlu2 %v3347_v46  ;;  %v3361_v47 = vmul.f32 %v6733_v23, %v6733_v23 }
 0xe6a   :  { %v4606_v48 = vpop.eup %4605  ;;  %v3624_v45 = vmul.f32 %v3612_v54, %v3563_v12  ;;  %v3661_v16 = vmul.f32 0.7978846, %v3649_v21  ;;  %4607 = vtanh.f32 %v3658_v28 }
 0xe6b   :  { %v3683_v50 = vadd.f32 1.0, %v4606_v48  ;;  %v3377_v8 = vsel %vm145_vm1, %v3361_v47, 0.0 }
 0xe6c   :  { %v3636_v0 = vmul.f32 0.044715, %v3624_v45  ;;  %4609 = vtanh.f32 %v3661_v16 }
 0xe6d   :  { %v3695_v58 = vmul.f32 0.5, %v3683_v50 }
 0xe6e   :  { %v3648_v3 = vadd.f32 %v3636_v0, %v3563_v12 }
 0xe6f   :  { %v3707_v62 = vmul.f32 %v3695_v58, %v3595_v44 }
 0xe70   :  { %v3660_v49 = vmul.f32 0.7978846, %v3648_v3  ;;  %v4608_v9 = vpop.eup %4607 }
 0xe71   :  { %3804 = vmatmul.f32.gmra.mxu2 %v3707_v62  ;;  %3378 = vadd.xlane.f32.xlu2 %v3377_v8  ;;  %v3682_v22 = vadd.f32 1.0, %v4608_v9  ;;  %v4332_v9 = vld [vmem:[%s6806_s17 + $0x1] ss:$0 sm:$0xff] }
 0xe72   :  { %v4610_v15 = vpop.eup %4609  ;;  %4611 = vtanh.f32 %v3660_v49 }
 0xe73   :  { %v3685_v18 = vadd.f32 1.0, %v4610_v15  ;;  %v3694_v35 = vmul.f32 0.5, %v3682_v22 }
 0xe75   :  { %v3697_v13 = vmul.f32 0.5, %v3685_v18  ;;  %v3706_v27 = vmul.f32 %v3694_v35, %v3560_v11 }
 0xe77   :  { %v3709_v17 = vmul.f32 %v3697_v13, %v3598_v51  ;;  %3773 = vmatmul.f32.gmra.mxu1 %v3706_v27 }
 0xe78   :  { %v4612_v5 = vpop.eup %4611 }
 0xe79   :  { %3806 = vmatmul.f32.gmra.mxu2 %v3709_v17  ;;  %v3684_v19 = vadd.f32 1.0, %v4612_v5 }
 0xe7b   :  { %v3696_v63 = vmul.f32 0.5, %v3684_v19 }
 0xe7d   :  { %v3708_v14 = vmul.f32 %v3696_v63, %v3563_v12 }
 0xe7f   :  { %3775 = vmatmul.f32.gmra.mxu1 %v3708_v14 }
 0xe95   :  { %v3346_v31 = vpop.xlane.xlu0 %3345 }
 0xe96   :  { %v3354_v2 = vmul.f32 %v3346_v31, %v4870_v61  ;;  %v3769_v53 = vpop.f32.mrf.mxu1  ;;  %v3800_v56 = vpop.f32.mrf.mxu2 }
 0xe97   :  { %v3770_v34 = vadd.f32 %v4331_v20, %v3769_v53  ;;  %v3376_v44 = vpop.xlane.xlu1 %3375 }
 0xe98   :  { %v3390_v7 = vmul.f32 %v3354_v2, %v3354_v2  ;;  %v3384_v1 = vmul.f32 %v3376_v44, %v4870_v61  ;;  %v3402_v41 = vsub.f32 %v6720_v29, %v3354_v2 }
 0xe99   :  { %v3801_v57 = vadd.f32 %v3800_v56, %v3770_v34 }
 0xe9a   :  { %v3396_v52 = vsub.f32 %v3384_v1, %v3390_v7 }
 0xe9b   :  { %v3819_v27 = vmul.f32 %v4332_v9, %v3801_v57 }
 0xe9c   :  { %v3408_v11 = vadd.f32 1e-06, %v3396_v52 }
 0xe9e   :  { %4613 = vrsqrt.f32 %v3408_v11  ;;  %v3772_v10 = vpop.f32.mrf.mxu1  ;;  %v3803_v43 = vpop.f32.mrf.mxu2  ;;  %vm3456_vm10 = vweird.f32 %v3408_v11 }
 0xea4   :  { %v4614_v6 = vpop.eup %4613 }
 0xea5   :  { %v3451_v51 = vmul.f32 %v4614_v6, %v3408_v11  ;;  %vm3457_vm9 = vweird.f32 %v4614_v6 }
 0xea6   :  { %vm3458_vm2 = vmor %vm3456_vm10, %vm3457_vm9 }
 0xea7   :  { %v3452_v38 = vmul.f32 %v4614_v6, %v3451_v51 }
 0xea9   :  { %v3453_v25 = vmul.f32 0.5, %v3452_v38 }
 0xeab   :  { %v3454_v36 = vsub.f32 1.5, %v3453_v25 }
 0xead   :  { %v3455_v55 = vmul.f32 %v4614_v6, %v3454_v36 }
 0xeaf   :  { %v3459_v42 = vsel %vm3458_vm2, %v4614_v6, %v3455_v55 }
 0xeb0   :  { %v3477_v32 = vmul.f32 %v6572_v26, %v3459_v42 }
 0xeb2   :  { %v3483_v40 = vmul.f32 %v3477_v32, %v3402_v41 }
 0xeb4   :  { %v3492_v4 = vadd.f32 %v6577_v39, %v3483_v40 }
 0xeb6   :  { %4155 = vmatmul.msk.f32.gmra.mxu3 %vm145_vm1, %v3492_v4  ;;  %4161 = vmatmul.msk.f32.gmra.mxu0 %vm145_vm1, %v3492_v4 }
 0xedc   :  { %v3349_v59 = vpop.xlane.xlu2 %3348 }
 0xedd   :  { %v3355_v60 = vmul.f32 %v3349_v59, %v4870_v61 }
 0xedf   :  { %v3391_v21 = vmul.f32 %v3355_v60, %v3355_v60  ;;  %v3403_v62 = vsub.f32 %v6733_v23, %v3355_v60  ;;  %v3821_v23 = vadd.f32 %v3819_v27, %v6471_v37 }
 0xee4   :  { %v3379_v12 = vpop.xlane.xlu2 %3378 }
 0xee5   :  { %v3385_v54 = vmul.f32 %v3379_v12, %v4870_v61 }
 0xee7   :  { %v3397_v46 = vsub.f32 %v3385_v54, %v3391_v21 }
 0xee9   :  { %v3409_v28 = vadd.f32 1e-06, %v3397_v46 }
 0xeeb   :  { %4615 = vrsqrt.f32 %v3409_v28  ;;  %vm3466_vm7 = vweird.f32 %v3409_v28 }
 0xef1   :  { %v4616_v29 = vpop.eup %4615 }
 0xef2   :  { %v3461_v48 = vmul.f32 %v4616_v29, %v3409_v28  ;;  %vm3467_vm0 = vweird.f32 %v4616_v29 }
 0xef3   :  { %vm3468_vm3 = vmor %vm3466_vm7, %vm3467_vm0 }
 0xef4   :  { %v3462_v45 = vmul.f32 %v4616_v29, %v3461_v48  ;;  %v3805_v16 = vpop.f32.mrf.mxu2  ;;  %v3774_v50 = vpop.f32.mrf.mxu1 }
 0xef6   :  { %v3463_v0 = vmul.f32 0.5, %v3462_v45 }
 0xef8   :  { %v3464_v47 = vsub.f32 1.5, %v3463_v0 }
 0xefa   :  { %v3465_v58 = vmul.f32 %v4616_v29, %v3464_v47 }
 0xefc   :  { %v3469_v3 = vsel %vm3468_vm3, %v4616_v29, %v3465_v58  ;;  %v3776_v8 = vpop.f32.mrf.mxu1  ;;  %v3807_v22 = vpop.f32.mrf.mxu2 }
 0xefd   :  { %v3478_v49 = vmul.f32 %v6572_v26, %v3469_v3  ;;  %v3777_v15 = vadd.f32 %v4331_v20, %v3776_v8 }
 0xeff   :  { %v3484_v18 = vmul.f32 %v3478_v49, %v3403_v62  ;;  %v3808_v35 = vadd.f32 %v3807_v22, %v3777_v15 }
 0xf01   :  { %v3493_v13 = vadd.f32 %v6577_v39, %v3484_v18  ;;  %v3820_v17 = vmul.f32 %v4332_v9, %v3808_v35  ;;  %v4334_v18 = vld [vmem:[%s6808_s19] ss:$0 sm:$0xff] }
 0xf03   :  { %4156 = vmatmul.msk.f32.gmra.mxu3 %vm145_vm1, %v3493_v13  ;;  %v3822_v5 = vadd.f32 %v3820_v17, %v6500_v33 }
 0xf05   :  { %v3824_v26 = vrot.slane %v3822_v5, 7 }
 0xf07   :  { %v6762_v19 = vsel %vm3826_vm4, %v3821_v23, %v3824_v26 }
 0xf08   :  { %v3831_v63 = vsel %vm3830_vm5, %v6762_v19, 0.0  ;;  %v3835_v14 = vmul.f32 %v6762_v19, %v6762_v19 }
 0xf09   :  { %3832 = vadd.xlane.f32.xlu2 %v3831_v63 }
 0xf0a   :  { %v3836_v39 = vsel %vm3830_vm5, %v3835_v14, 0.0 }
 0xf0b   :  { %4162 = vmatmul.msk.f32.vlgmr.msra.gmra.mxu3 %vm145_vm1, %v3493_v13  ;;  %3837 = vadd.xlane.f32.xlu0 %v3836_v39 }
 0xf33   :  { %v3600_v33 = vpop.f32.mrf.mxu0 }
 0xf34   :  { %v3601_v20 = vadd.f32 %v3600_v33, %v6703_v24 }
 0xf36   :  { %v3615_v37 = vmul.f32 %v3601_v20, %v3601_v20 }
 0xf38   :  { %v3627_v31 = vmul.f32 %v3615_v37, %v3601_v20 }
 0xf39   :  { %v3565_v2 = vpop.f32.mrf.mxu3 }
 0xf3a   :  { %v3639_v53 = vmul.f32 0.044715, %v3627_v31  ;;  %v3566_v56 = vadd.f32 %v3565_v2, %v6712_v30 }
 0xf3c   :  { %v3651_v34 = vadd.f32 %v3639_v53, %v3601_v20  ;;  %v3614_v44 = vmul.f32 %v3566_v56, %v3566_v56 }
 0xf3e   :  { %v3626_v7 = vmul.f32 %v3614_v44, %v3566_v56  ;;  %v3663_v1 = vmul.f32 0.7978846, %v3651_v34 }
 0xf40   :  { %v3638_v57 = vmul.f32 0.044715, %v3626_v7  ;;  %4617 = vtanh.f32 %v3663_v1 }
 0xf42   :  { %v3650_v52 = vadd.f32 %v3638_v57, %v3566_v56 }
 0xf44   :  { %v3662_v11 = vmul.f32 0.7978846, %v3650_v52 }
 0xf46   :  { %v4618_v10 = vpop.eup %4617  ;;  %4619 = vtanh.f32 %v3662_v11 }
 0xf47   :  { %v3687_v43 = vadd.f32 1.0, %v4618_v10 }
 0xf49   :  { %v3699_v6 = vmul.f32 0.5, %v3687_v43 }
 0xf4b   :  { %v3711_v51 = vmul.f32 %v3699_v6, %v3601_v20 }
 0xf4c   :  { %v4620_v38 = vpop.eup %4619 }
 0xf4d   :  { %3809 = vmatmul.f32.gmra.mxu2 %v3711_v51  ;;  %v3686_v25 = vadd.f32 1.0, %v4620_v38 }
 0xf4f   :  { %v3698_v36 = vmul.f32 0.5, %v3686_v25 }
 0xf51   :  { %v3710_v55 = vmul.f32 %v3698_v36, %v3566_v56 }
 0xf53   :  { %3778 = vmatmul.f32.gmra.mxu1 %v3710_v55 }
 0xf7c   :  { %v3833_v42 = vpop.xlane.xlu2 %3832 }
 0xf7d   :  { %v3834_v41 = vmul.f32 %v3833_v42, %v4870_v61 }
 0xf7e   :  { %v3838_v32 = vpop.xlane.xlu0 %3837 }
 0xf7f   :  { %v3840_v40 = vmul.f32 %v3834_v41, %v3834_v41  ;;  %v3839_v4 = vmul.f32 %v3838_v32, %v4870_v61  ;;  %v3842_v22 = vsub.f32 %v6762_v19, %v3834_v41 }
 0xf81   :  { %v3841_v59 = vsub.f32 %v3839_v4, %v3840_v40 }
 0xf83   :  { %v3843_v60 = vadd.f32 1e-06, %v3841_v59 }
 0xf85   :  { %4621 = vrsqrt.f32 %v3843_v60  ;;  %vm3850_vm8 = vweird.f32 %v3843_v60 }
 0xf86   :  { %v3568_v12 = vpop.f32.mrf.mxu3 }
 0xf87   :  { %v3569_v21 = vadd.f32 %v3568_v12, %v6712_v30  ;;  %v4333_v30 = vld [vmem:[%s6807_s18] ss:$0 sm:$0xff] }
 0xf89   :  { %v3616_v54 = vmul.f32 %v3569_v21, %v3569_v21 }
 0xf8b   :  { %v3628_v46 = vmul.f32 %v3616_v54, %v3569_v21  ;;  %v4622_v28 = vpop.eup %4621 }
 0xf8c   :  { %v3845_v29 = vmul.f32 %v4622_v28, %v3843_v60  ;;  %vm3851_vm6 = vweird.f32 %v4622_v28 }
 0xf8d   :  { %v3640_v48 = vmul.f32 0.044715, %v3628_v46  ;;  %vm3852_vm11 = vmor %vm3850_vm8, %vm3851_vm6 }
 0xf8e   :  { %v3603_v45 = vpop.f32.mrf.mxu3  ;;  %v3846_v16 = vmul.f32 %v4622_v28, %v3845_v29 }
 0xf8f   :  { %v3652_v50 = vadd.f32 %v3640_v48, %v3569_v21  ;;  %v3604_v0 = vadd.f32 %v3603_v45, %v6703_v24 }
 0xf90   :  { %v3847_v47 = vmul.f32 0.5, %v3846_v16 }
 0xf91   :  { %v3617_v58 = vmul.f32 %v3604_v0, %v3604_v0  ;;  %v3664_v3 = vmul.f32 0.7978846, %v3652_v50 }
 0xf92   :  { %v3848_v61 = vsub.f32 1.5, %v3847_v47 }
 0xf93   :  { %v3629_v62 = vmul.f32 %v3617_v58, %v3604_v0  ;;  %4623 = vtanh.f32 %v3664_v3 }
 0xf94   :  { %v3849_v8 = vmul.f32 %v4622_v28, %v3848_v61 }
 0xf95   :  { %v3641_v49 = vmul.f32 0.044715, %v3629_v62 }
 0xf96   :  { %v3853_v9 = vsel %vm3852_vm11, %v4622_v28, %v3849_v8 }
 0xf97   :  { %v3653_v15 = vadd.f32 %v3641_v49, %v3604_v0  ;;  %v3857_v24 = vmul.f32 %v4333_v30, %v3853_v9 }
 0xf99   :  { %v4624_v35 = vpop.eup %4623  ;;  %v3665_v13 = vmul.f32 0.7978846, %v3653_v15  ;;  %v3858_v17 = vmul.f32 %v3857_v24, %v3842_v22 }
 0xf9a   :  { %v3688_v27 = vadd.f32 1.0, %v4624_v35 }
 0xf9b   :  { %4625 = vtanh.f32 %v3665_v13  ;;  %v3862_v23 = vadd.f32 %v4334_v18, %v3858_v17 }
 0xf9c   :  { %v3700_v5 = vmul.f32 0.5, %v3688_v27 }
 0xf9d   :  { %v3863_v63 = vmul.f32 %v3862_v23, %v3862_v23 }
 0xf9e   :  { %v3712_v26 = vmul.f32 %v3700_v5, %v3569_v21 }
 0xf9f   :  { %v3864_v14 = vsel %vm3830_vm5, %v3863_v63, 0.0 }
 0xfa0   :  { %3780 = vmatmul.f32.gmra.mxu1 %v3712_v26  ;;  %3865 = vadd.xlane.f32.xlu2 %v3864_v14 }
 0xfa1   :  { %v4626_v39 = vpop.eup %4625 }
 0xfa2   :  { %v3689_v19 = vadd.f32 1.0, %v4626_v39 }
 0xfa4   :  { %v3701_v33 = vmul.f32 0.5, %v3689_v19 }
 0xfa6   :  { %v3713_v20 = vmul.f32 %v3701_v33, %v3604_v0 }
 0xfa8   :  { %3811 = vmatmul.f32.gmra.mxu2 %v3713_v20 }
 0xfd0   :  { %v3779_v37 = vpop.f32.mrf.mxu1  ;;  %v3810_v31 = vpop.f32.mrf.mxu2 }
0x1013   :  { %v3866_v2 = vpop.xlane.xlu2 %3865 }
0x1014   :  { %4627 = vrsqrt.f32 %v3866_v2  ;;  %vm3874_vm12 = vcmp.eq.f32.partialorder %v3866_v2, inf  ;;  %v3877_v11 = vand.u32 2147483648, %v3866_v2  ;;  %vm3876_vm13 = vcmp.eq.f32.partialorder %v3866_v2, 0.0 }
0x101a   :  { %v4628_v53 = vpop.eup %4627 }
0x101b   :  { %v3868_v56 = vmul.f32 %v4628_v53, %v3866_v2 }
0x101d   :  { %v3781_v34 = vpop.f32.mrf.mxu1  ;;  %v3869_v44 = vmul.f32 %v4628_v53, %v3868_v56 }
0x101f   :  { %v3870_v7 = vmul.f32 0.5, %v3869_v44 }
0x1021   :  { %v3871_v1 = vsub.f32 1.5, %v3870_v7 }
0x1023   :  { %v3872_v57 = vmul.f32 %v4628_v53, %v3871_v1 }
0x1025   :  { %v3873_v52 = vmul.f32 %v3872_v57, %v3866_v2 }
0x1027   :  { %v3875_v10 = vsel %vm3874_vm12, %v3866_v2, %v3873_v52 }
0x1028   :  { %v3878_v43 = vsel %vm3876_vm13, %v3877_v11, %v3875_v10 }
0x1029   :  { %v3879_v6 = vmax.f32 %v3878_v43, 1e-12 }
0x102b   :  { %v3812_v51 = vpop.f32.mrf.mxu2  ;;  %4629 = vrcp.f32 %v3879_v6  ;;  %v3891_v55 = vand.u32 2147483648, %v3879_v6  ;;  %v3889_v41 = vand.u32 2147483647, %v3879_v6  ;;  %vm3885_vm15 = vweird.f32 %v3879_v6 }
0x102d   :  { %v3892_v40 = vor.u32 1.1754944e-38, %v3891_v55  ;;  %vm3890_vm10 = vcmp.eq.f32.partialorder %v3889_v41, 8.507059e+37 }
0x1031   :  { %v4630_v38 = vpop.eup %4629 }
0x1032   :  { %v3881_v25 = vmul.f32 %v4630_v38, %v3879_v6  ;;  %vm3886_vm14 = vweird.f32 %v4630_v38 }
0x1033   :  { %vm3887_vm9 = vmor %vm3885_vm15, %vm3886_vm14 }
0x1034   :  { %v3882_v36 = vsub.f32 1.0, %v3881_v25 }
0x1036   :  { %v3883_v42 = vmul.f32 %v4630_v38, %v3882_v36 }
0x1038   :  { %v3884_v32 = vadd.f32 %v4630_v38, %v3883_v42 }
0x103a   :  { %v3888_v4 = vsel %vm3887_vm9, %v4630_v38, %v3884_v32 }
0x103b   :  { %v3893_v59 = vsel %vm3890_vm10, %v3892_v40, %v3888_v4 }
0x103c   :  { %v3894_v60 = vmul.f32 %v3893_v59, %v3862_v23 }
0x103e   :  { %3896 = vrot.lane.b32.xlu1 %v3894_v60, %s4638_s25 }
0x10b0   :  { %v3897_v12 = vpop.permute.xlu1 %3896 }
0x10b1   :  { %v3899_v21 = vsel %vm145_vm1, %v3862_v23, %v3897_v12 }
0x10b2   :  { %3900 = vst [vmem:[%s6809_s20] sm:$0x3] %v3899_v21 }

</bundles_post_ra>
